<compile_context>
chip_gen: v6e
topology: v6e:2x2x1
jax: 0.10.0
libtpu: 0.0.40
codegen_flags: <defaults>
</compile_context>

<pallas_src>
import jax
import jax.numpy as jnp
import numpy as np
from jax.experimental import pallas as pl
from jax.experimental.pallas import tpu as pltpu


_L_IN = 100                      # module requires input (N, 1, 100)
_XW, _H1, _H2, _H3 = 128, 640, 256, 128   # 128-lane padded layer widths
_TILE_N_MAX = 2048               # largest batch tile (~17 MiB body temporaries)


def _toeplitz_conv_matrix(w, l_in, stride):
    """Expand Conv1d weight (Cout, Cin, K) into (Lin*Cin, Lout*Cout) matmul matrix.

    Row index = li*Cin + ci, col index = lo*Cout + co,
    value = w[co, ci, li - lo*stride] when 0 <= li - lo*stride < K, else 0.
    Reproduces y[n, co, lo] = sum_{ci,k} w[co, ci, k] * x[n, ci, lo*stride + k]
    for channel-minor flattened activations.
    """
    w = np.asarray(w, dtype=np.float32)
    c_out, c_in, k = w.shape
    l_out = (l_in - k) // stride + 1
    mat = np.zeros((l_in * c_in, l_out * c_out), dtype=np.float32)
    for lo in range(l_out):
        for kk in range(k):
            li = lo * stride + kk
            mat[li * c_in:(li + 1) * c_in, lo * c_out:(lo + 1) * c_out] = w[:, :, kk].T
    return mat, l_out


def _pad_to(mat, rows, cols):
    out = np.zeros((rows, cols), dtype=np.float32)
    out[: mat.shape[0], : mat.shape[1]] = mat
    return out


def build_cnn2_constants(params):
    """Host-side glue, run ONCE per parameter set (hoisted out of the call path).

    Builds 128-lane-padded bf16 matmul weights, f32 (position-major,
    channel-minor) tiled conv biases, and the scalar linear bias (SMEM).
    None of the constants depend on the batch tile size.
    """
    w1, b1, w2, b2, w3, b3, wl, bl = (np.asarray(p, np.float32) for p in params)

    a1, l1 = _toeplitz_conv_matrix(w1, _L_IN, 2)  # (100, 48*12=576)
    a2, l2 = _toeplitz_conv_matrix(w2, l1, 6)     # (576, 7*24=168)
    a3, l3 = _toeplitz_conv_matrix(w3, l2, 7)     # (168, 1*40=40)

    a1p = jnp.asarray(_pad_to(a1, _XW, _H1), jnp.bfloat16)               # (128, 640)
    a2p = jnp.asarray(_pad_to(a2, _H1, _H2), jnp.bfloat16)               # (640, 256)
    a3p = jnp.asarray(_pad_to(a3, _H2, _H3), jnp.bfloat16)               # (256, 128)
    a4p = jnp.asarray(_pad_to(wl.reshape(1, -1), 1, _H3), jnp.bfloat16)  # (1, 128)

    c1p = jnp.asarray(_pad_to(np.tile(b1, l1)[None, :], 1, _H1), jnp.float32)  # (1, 640)
    c2p = jnp.asarray(_pad_to(np.tile(b2, l2)[None, :], 1, _H2), jnp.float32)  # (1, 256)
    c3p = jnp.asarray(_pad_to(np.tile(b3, l3)[None, :], 1, _H3), jnp.float32)  # (1, 128)
    b4 = jnp.asarray(bl.reshape(1), jnp.float32)                               # (1,) scalar

    return (a1p, c1p, a2p, c2p, a3p, c3p, a4p, b4)


def _cnn2_kernel(x_ref, a1_ref, c1_ref, a2_ref, c2_ref, a3_ref, c3_ref,
                 a4_ref, b4_ref, o_ref, xpad_ref):
    # In-kernel lane pad 100 -> 128 (+ bf16 cast) via VMEM scratch. Pad lanes
    # are explicit zeros; a1 rows 100..127 are also zero, so results are exact.
    xpad_ref[...] = jnp.zeros_like(xpad_ref)
    xpad_ref[:, :_L_IN] = x_ref[...].astype(jnp.bfloat16)
    h = xpad_ref[...]                                                     # (T, 128) bf16

    # conv1 (1->12, k=5, s=2) + ReLU
    h = jnp.maximum(jnp.dot(h, a1_ref[...],
                            preferred_element_type=jnp.float32) + c1_ref[...], 0.0)  # (T, 640)
    # conv2 (12->24, k=10, s=6) + ReLU
    h = jnp.maximum(jnp.dot(h.astype(jnp.bfloat16), a2_ref[...],
                            preferred_element_type=jnp.float32) + c2_ref[...], 0.0)  # (T, 256)
    # conv3 (24->40, k=7, s=7) + ReLU  (Lout=1 -> already the flatten(-2))
    h = jnp.maximum(jnp.dot(h.astype(jnp.bfloat16), a3_ref[...],
                            preferred_element_type=jnp.float32) + c3_ref[...], 0.0)  # (T, 128)
    # linear1 (40 -> 1): MXU-native A·B^T contraction over lanes -> (1, T)
    # lane-dense output (no masked lane-width-1 stores, no activation transpose).
    y = jax.lax.dot_general(a4_ref[...], h.astype(jnp.bfloat16),
                            dimension_numbers=(((1,), (1,)), ((), ())),
                            preferred_element_type=jnp.float32)           # (1, T)
    o_ref[...] = y + b4_ref[0]                                            # scalar bias (SMEM)


def _choose_tile(n):
    """Largest tile <= _TILE_N_MAX that still yields >= 2 grid steps (so both
    v7x TensorCores get work under 'parallel'); otherwise the smallest tile."""
    for t in (2048, 1024, 512, 256):
        if pl.cdiv(n, t) >= 2:
            return t
    return 256


def cnn2_forward(x, consts):
    """x: (N, 1, 100) float32 (PyTorch NCW). consts: from build_cnn2_constants.
    Returns (N,) float32."""
    a1, c1, a2, c2, a3, c3, a4, b4 = consts
    n = x.shape[0]
    assert x.shape[1:] == (1, _L_IN), "module requires input (N, 1, 100)"

    tile_n = _choose_tile(n)
    n_pad = pl.cdiv(n, tile_n) * tile_n

    # Free reshape (contiguous, C=1); only the batch dim is padded (and only
    # when n is not already a tile multiple). No full staging copy of x.
    x2 = x.reshape(n, _L_IN)
    if n_pad != n:
        x2 = jnp.pad(x2, ((0, n_pad - n), (0, 0)))

    grid = (n_pad // tile_n,)

    flops = 2 * n_pad * (_XW * _H1 + _H1 * _H2 + _H2 * _H3 + _H3)
    bytes_accessed = (x2.size * 4
                      + (a1.size + a2.size + a3.size + a4.size) * 2
                      + (c1.size + c2.size + c3.size) * 4 + 4
                      + n_pad * 4)

    out = pl.pallas_call(
        _cnn2_kernel,
        out_shape=jax.ShapeDtypeStruct((1, n_pad), jnp.float32),
        grid=grid,
        in_specs=[
            pl.BlockSpec((tile_n, _L_IN), lambda i: (i, 0)),    # x tile (pipelined)
            pl.BlockSpec((_XW, _H1), lambda i: (0, 0)),         # a1 (resident in VMEM)
            pl.BlockSpec((1, _H1), lambda i: (0, 0)),           # c1
            pl.BlockSpec((_H1, _H2), lambda i: (0, 0)),         # a2
            pl.BlockSpec((1, _H2), lambda i: (0, 0)),           # c2
            pl.BlockSpec((_H2, _H3), lambda i: (0, 0)),         # a3
            pl.BlockSpec((1, _H3), lambda i: (0, 0)),           # c3
            pl.BlockSpec((1, _H3), lambda i: (0, 0)),           # a4 row
            pl.BlockSpec(memory_space=pltpu.MemorySpace.SMEM),  # linear bias scalar
        ],
        out_specs=pl.BlockSpec((1, tile_n), lambda i: (0, i)),
        scratch_shapes=[pltpu.VMEM((tile_n, _XW), jnp.bfloat16)],  # lane-pad buffer
        compiler_params=pltpu.CompilerParams(
            dimension_semantics=("parallel",),          # megacore sharding on v7x
            vmem_limit_bytes=48 * 1024 * 1024,          # v5e default (16MiB) too small at T>=1024
        ),
        cost_estimate=pl.CostEstimate(flops=flops, transcendentals=0,
                                      bytes_accessed=bytes_accessed),
    )(x2, a1, c1, a2, c2, a3, c3, a4, b4)

    return out[0, :n]


def reference_forward(x, params):
    """Pure-JAX f32 reference of the PyTorch forward (NCW convs)."""
    w1, b1, w2, b2, w3, b3, wl, bl = params

    def conv_relu(h, w, b, s):
        y = jax.lax.conv_general_dilated(h, w, window_strides=(s,), padding="VALID",
                                         dimension_numbers=("NCH", "OIH", "NCH"))
        return jax.nn.relu(y + b[None, :, None])

    h = conv_relu(x, w1, b1, 2)
    h = conv_relu(h, w2, b2, 6)
    h = conv_relu(h, w3, b3, 7)
    h = h.reshape(h.shape[0], -1)          # flatten(-2): (N, 40)
    return (h @ wl.T + bl).reshape(-1)


if __name__ == "__main__":
    key = jax.random.PRNGKey(0)
    ks = jax.random.split(key, 10)

    def u(k, shape, fan_in):
        bound = 1.0 / np.sqrt(fan_in)
        return jax.random.uniform(k, shape, jnp.float32, -bound, bound)

    # Deterministic parameters (PyTorch default-init style bounds).
    w1 = u(ks[0], (12, 1, 5), 1 * 5);     b1 = u(ks[1], (12,), 1 * 5)
    w2 = u(ks[2], (24, 12, 10), 12 * 10); b2 = u(ks[3], (24,), 12 * 10)
    w3 = u(ks[4], (40, 24, 7), 24 * 7);   b3 = u(ks[5], (40,), 24 * 7)
    wl = u(ks[6], (1, 40), 40);           bl = u(ks[7], (1,), 40)
    params = (w1, b1, w2, b2, w3, b3, wl, bl)

    # Build Toeplitz/linear constants once (hoisted out of the per-call path).
    consts = build_cnn2_constants(params)

    # Small primary test (module fixes W=100, C=1).
    n = 2
    x = jax.random.normal(ks[8], (n, 1, 100), jnp.float32)
    out = jax.block_until_ready(cnn2_forward(x, consts))
    ref = jax.block_until_ready(reference_forward(x, params))
    assert out.shape == (n,)
    # bf16 matmul operands (f32 accumulate): loosened tolerance vs f32 reference.
    np.testing.assert_allclose(np.asarray(out), np.asarray(ref), rtol=5e-2, atol=5e-2)

    # Secondary test exercising multiple grid steps + ragged batch tail.
    n2 = 600
    x2 = jax.random.normal(ks[9], (n2, 1, 100), jnp.float32)
    out2 = jax.block_until_ready(cnn2_forward(x2, consts))
    ref2 = jax.block_until_ready(reference_forward(x2, params))
    assert out2.shape == (n2,)
    np.testing.assert_allclose(np.asarray(out2), np.asarray(ref2), rtol=5e-2, atol=5e-2)

    print("KERNEL_OK")
</pallas_src>

<mosaic_0001>
module attributes {stable_mosaic.version = 11 : i64} {
  func.func @_cnn2_kernel(%arg0: i32, %arg1: memref<256x100xf32, #tpu.memory_space<vmem>>, %arg2: memref<128x640xbf16, #tpu.memory_space<vmem>>, %arg3: memref<1x640xf32, #tpu.memory_space<vmem>>, %arg4: memref<640x256xbf16, #tpu.memory_space<vmem>>, %arg5: memref<1x256xf32, #tpu.memory_space<vmem>>, %arg6: memref<256x128xbf16, #tpu.memory_space<vmem>>, %arg7: memref<1x128xf32, #tpu.memory_space<vmem>>, %arg8: memref<1x128xbf16, #tpu.memory_space<vmem>>, %arg9: memref<1xf32, #tpu.memory_space<smem>>, %arg10: memref<1x256xf32, #tpu.memory_space<vmem>>, %arg11: memref<256x128xbf16, #tpu.memory_space<vmem>>) attributes {dimension_semantics = [#tpu.dimension_semantics<parallel>], iteration_bounds = array<i64: 1>, scalar_prefetch = 0 : i64, scratch_operands = 1 : i64, tpu.core_type = #tpu.core_type<tc>, window_params = [{transform_indices = @transform_0, window_bounds = array<i64: 256, 100>}, {pipeline_mode = #tpu.pipeline_mode<synchronous>, transform_indices = @transform_1, window_bounds = array<i64: 128, 640>}, {pipeline_mode = #tpu.pipeline_mode<synchronous>, transform_indices = @transform_2, window_bounds = array<i64: 1, 640>}, {pipeline_mode = #tpu.pipeline_mode<synchronous>, transform_indices = @transform_3, window_bounds = array<i64: 640, 256>}, {pipeline_mode = #tpu.pipeline_mode<synchronous>, transform_indices = @transform_4, window_bounds = array<i64: 1, 256>}, {pipeline_mode = #tpu.pipeline_mode<synchronous>, transform_indices = @transform_5, window_bounds = array<i64: 256, 128>}, {pipeline_mode = #tpu.pipeline_mode<synchronous>, transform_indices = @transform_6, window_bounds = array<i64: 1, 128>}, {pipeline_mode = #tpu.pipeline_mode<synchronous>, transform_indices = @transform_7, window_bounds = array<i64: 1, 128>}, {transform_indices = @transform_8, window_bounds = array<i64: 1>}, {transform_indices = @transform_9, window_bounds = array<i64: 1, 256>}]} {
    %cst = arith.constant 0.000000e+00 : bf16
    %0 = vector.broadcast %cst : bf16 to vector<256x128xbf16>
    %c0 = arith.constant 0 : index
    %c0_0 = arith.constant 0 : index
    %1 = vector.load %arg11[%c0, %c0_0] : memref<256x128xbf16, #tpu.memory_space<vmem>>, vector<256x128xbf16>
    tpu.vector_store %arg11[%c0, %c0_0], %0 {strides = array<i32>} : memref<256x128xbf16, #tpu.memory_space<vmem>>, vector<256x128xbf16>,
    %c0_1 = arith.constant 0 : index
    %c0_2 = arith.constant 0 : index
    %2 = vector.load %arg1[%c0_1, %c0_2] : memref<256x100xf32, #tpu.memory_space<vmem>>, vector<256x100xf32>
    %3 = arith.truncf %2 : vector<256x100xf32> to vector<256x100xbf16>
    %c0_3 = arith.constant 0 : index
    %c0_4 = arith.constant 0 : index
    %4 = vector.load %arg11[%c0_3, %c0_4] : memref<256x128xbf16, #tpu.memory_space<vmem>>, vector<256x100xbf16>
    tpu.vector_store %arg11[%c0_3, %c0_4], %3 {strides = array<i32>} : memref<256x128xbf16, #tpu.memory_space<vmem>>, vector<256x100xbf16>,
    %c0_5 = arith.constant 0 : index
    %c0_6 = arith.constant 0 : index
    %5 = vector.load %arg11[%c0_5, %c0_6] : memref<256x128xbf16, #tpu.memory_space<vmem>>, vector<256x128xbf16>
    %c0_7 = arith.constant 0 : index
    %c0_8 = arith.constant 0 : index
    %6 = vector.load %arg2[%c0_7, %c0_8] : memref<128x640xbf16, #tpu.memory_space<vmem>>, vector<128x640xbf16>
    %cst_9 = arith.constant dense<0.000000e+00> : vector<256x640xf32>
    %7 = tpu.matmul %5, %6, %cst_9 {dimension_numbers = #tpu.dot_dimension_numbers<[1], [0], [0], [1], [0, 0, 1, 1], [], []>} : vector<256x128xbf16>, vector<128x640xbf16>, vector<256x640xf32> -> vector<256x640xf32>
    %c0_10 = arith.constant 0 : index
    %c0_11 = arith.constant 0 : index
    %8 = vector.load %arg3[%c0_10, %c0_11] : memref<1x640xf32, #tpu.memory_space<vmem>>, vector<1x640xf32>
    %9 = vector.broadcast %8 : vector<1x640xf32> to vector<256x640xf32>
    %10 = arith.addf %7, %9 : vector<256x640xf32>
    %cst_12 = arith.constant 0.000000e+00 : f32
    %11 = vector.broadcast %cst_12 : f32 to vector<256x640xf32>
    %12 = arith.maximumf %10, %11 : vector<256x640xf32>
    %13 = arith.truncf %12 : vector<256x640xf32> to vector<256x640xbf16>
    %c0_13 = arith.constant 0 : index
    %c0_14 = arith.constant 0 : index
    %14 = vector.load %arg4[%c0_13, %c0_14] : memref<640x256xbf16, #tpu.memory_space<vmem>>, vector<640x256xbf16>
    %cst_15 = arith.constant dense<0.000000e+00> : vector<256x256xf32>
    %15 = tpu.matmul %13, %14, %cst_15 {dimension_numbers = #tpu.dot_dimension_numbers<[1], [0], [0], [1], [0, 0, 1, 1], [], []>} : vector<256x640xbf16>, vector<640x256xbf16>, vector<256x256xf32> -> vector<256x256xf32>
    %c0_16 = arith.constant 0 : index
    %c0_17 = arith.constant 0 : index
    %16 = vector.load %arg5[%c0_16, %c0_17] : memref<1x256xf32, #tpu.memory_space<vmem>>, vector<1x256xf32>
    %17 = vector.broadcast %16 : vector<1x256xf32> to vector<256x256xf32>
    %18 = arith.addf %15, %17 : vector<256x256xf32>
    %cst_18 = arith.constant 0.000000e+00 : f32
    %19 = vector.broadcast %cst_18 : f32 to vector<256x256xf32>
    %20 = arith.maximumf %18, %19 : vector<256x256xf32>
    %21 = arith.truncf %20 : vector<256x256xf32> to vector<256x256xbf16>
    %c0_19 = arith.constant 0 : index
    %c0_20 = arith.constant 0 : index
    %22 = vector.load %arg6[%c0_19, %c0_20] : memref<256x128xbf16, #tpu.memory_space<vmem>>, vector<256x128xbf16>
    %cst_21 = arith.constant dense<0.000000e+00> : vector<256x128xf32>
    %23 = tpu.matmul %21, %22, %cst_21 {dimension_numbers = #tpu.dot_dimension_numbers<[1], [0], [0], [1], [0, 0, 1, 1], [], []>} : vector<256x256xbf16>, vector<256x128xbf16>, vector<256x128xf32> -> vector<256x128xf32>
    %c0_22 = arith.constant 0 : index
    %c0_23 = arith.constant 0 : index
    %24 = vector.load %arg7[%c0_22, %c0_23] : memref<1x128xf32, #tpu.memory_space<vmem>>, vector<1x128xf32>
    %25 = vector.broadcast %24 : vector<1x128xf32> to vector<256x128xf32>
    %26 = arith.addf %23, %25 : vector<256x128xf32>
    %cst_24 = arith.constant 0.000000e+00 : f32
    %27 = vector.broadcast %cst_24 : f32 to vector<256x128xf32>
    %28 = arith.maximumf %26, %27 : vector<256x128xf32>
    %c0_25 = arith.constant 0 : index
    %c0_26 = arith.constant 0 : index
    %29 = vector.load %arg8[%c0_25, %c0_26] : memref<1x128xbf16, #tpu.memory_space<vmem>>, vector<1x128xbf16>
    %30 = arith.truncf %28 : vector<256x128xf32> to vector<256x128xbf16>
    %cst_27 = arith.constant dense<0.000000e+00> : vector<1x256xf32>
    %31 = tpu.matmul %29, %30, %cst_27 {dimension_numbers = #tpu.dot_dimension_numbers<[1], [1], [0], [0], [0, 0, 1, 0], [], []>} : vector<1x128xbf16>, vector<256x128xbf16>, vector<1x256xf32> -> vector<1x256xf32>
    %c0_28 = arith.constant 0 : index
    %32 = memref.load %arg9[%c0_28] : memref<1xf32, #tpu.memory_space<smem>>
    %33 = vector.broadcast %32 : f32 to vector<1x256xf32>
    %34 = arith.addf %31, %33 : vector<1x256xf32>
    %c0_29 = arith.constant 0 : index
    %c0_30 = arith.constant 0 : index
    %35 = vector.load %arg10[%c0_29, %c0_30] : memref<1x256xf32, #tpu.memory_space<vmem>>, vector<1x256xf32>
    tpu.vector_store %arg10[%c0_29, %c0_30], %34 {strides = array<i32>} : memref<1x256xf32, #tpu.memory_space<vmem>>, vector<1x256xf32>,
    return
  }
  func.func @transform_0(%arg0: i32) -> (i32, i32) {
    %c0_i32 = arith.constant 0 : i32
    %c0_i32_0 = arith.constant 0 : i32
    return %arg0, %c0_i32 : i32, i32
  }
  func.func @transform_1(%arg0: i32) -> (i32, i32) {
    %c0_i32 = arith.constant 0 : i32
    %c0_i32_0 = arith.constant 0 : i32
    %c0_i32_1 = arith.constant 0 : i32
    return %c0_i32, %c0_i32_0 : i32, i32
  }
  func.func @transform_2(%arg0: i32) -> (i32, i32) {
    %c0_i32 = arith.constant 0 : i32
    %c0_i32_0 = arith.constant 0 : i32
    %c0_i32_1 = arith.constant 0 : i32
    return %c0_i32, %c0_i32_0 : i32, i32
  }
  func.func @transform_3(%arg0: i32) -> (i32, i32) {
    %c0_i32 = arith.constant 0 : i32
    %c0_i32_0 = arith.constant 0 : i32
    %c0_i32_1 = arith.constant 0 : i32
    return %c0_i32, %c0_i32_0 : i32, i32
  }
  func.func @transform_4(%arg0: i32) -> (i32, i32) {
    %c0_i32 = arith.constant 0 : i32
    %c0_i32_0 = arith.constant 0 : i32
    %c0_i32_1 = arith.constant 0 : i32
    return %c0_i32, %c0_i32_0 : i32, i32
  }
  func.func @transform_5(%arg0: i32) -> (i32, i32) {
    %c0_i32 = arith.constant 0 : i32
    %c0_i32_0 = arith.constant 0 : i32
    %c0_i32_1 = arith.constant 0 : i32
    return %c0_i32, %c0_i32_0 : i32, i32
  }
  func.func @transform_6(%arg0: i32) -> (i32, i32) {
    %c0_i32 = arith.constant 0 : i32
    %c0_i32_0 = arith.constant 0 : i32
    %c0_i32_1 = arith.constant 0 : i32
    return %c0_i32, %c0_i32_0 : i32, i32
  }
  func.func @transform_7(%arg0: i32) -> (i32, i32) {
    %c0_i32 = arith.constant 0 : i32
    %c0_i32_0 = arith.constant 0 : i32
    %c0_i32_1 = arith.constant 0 : i32
    return %c0_i32, %c0_i32_0 : i32, i32
  }
  func.func @transform_8(%arg0: i32) -> i32 {
    %c0_i32 = arith.constant 0 : i32
    %c0_i32_0 = arith.constant 0 : i32
    return %c0_i32 : i32
  }
  func.func @transform_9(%arg0: i32) -> (i32, i32) {
    %c0_i32 = arith.constant 0 : i32
    %c0_i32_0 = arith.constant 0 : i32
    return %c0_i32, %arg0 : i32, i32
  }
}

</mosaic_0001>

<bundles_post_ra>
// kernel: tpu_custom_call.1
= control target key start
LH: loop header
LB: loop body
LE: loop exit
PB: predicated region body
PF: predicated region fallthrough
CT: control target
= control target key end

     0   :  { %15 = vsyncpa [#allocation5], 0  ;;  %s5002_s0 = inlined_call_operand.vmem [shape: f32[256,100], index: 0, kind: input, shape index: {}]   ;;  %s5003_s1 = inlined_call_operand.vmem [shape: bf16[128,640], index: 1, kind: input, shape index: {}]   ;;  %s5004_s2 = inlined_call_operand.vmem [shape: f32[1,640], index: 2, kind: input, shape index: {}]   ;;  %s5005_s3 = inlined_call_operand.hbm [shape: bf16[640,256], index: 3, kind: input, shape index: {}]   ;;  %s5006_s4 = inlined_call_operand.vmem [shape: f32[1,256], index: 4, kind: input, shape index: {}]   ;;  %s5007_s5 = inlined_call_operand.vmem [shape: bf16[256,128], index: 5, kind: input, shape index: {}]   ;;  %s5008_s6 = inlined_call_operand.vmem [shape: f32[1,128], index: 6, kind: input, shape index: {}]   ;;  %s5009_s7 = inlined_call_operand.vmem [shape: bf16[1,128], index: 7, kind: input, shape index: {}]   ;;  %s5010_s8 = inlined_call_operand.<no memory space> [shape: f32[1], index: 8, kind: input, shape index: {}]   ;;  %s5011_s9 = inlined_call_operand.hbm [shape: f32[1,256], index: 9, kind: output, shape index: {}]  }
   0x1   :  { %16 = vsyncpa [#allocation6], 0  ;;  %s3743_s30 = smov [#allocation4]  }
   0x2   :  { %s28_s10 = sshll.u32 %s3743_s30, 4  ;;  %s29_s10 = int_to_ptr.vmem [resolvable:$true] %s28_s10 }
   0x3   :  { %s3707_s11 = scalar_lea.vmem %s29_s10, 10240  ;;  %p3712_p1 = scmp.lt.s32.totalorder %s29_s10, %s29_s10 }
   0x4   :  { %p3708_p0 = scmp.ne.s32.totalorder %s29_s10, %s3707_s11  ;;  %p3713_p2 = scmp.lt.s32.totalorder %s3707_s11, %s3707_s11 }
   0x6   :  { %p3714_p3 = por %p3713_p2, %p3712_p1 }
   0x8   :  { %p3715_p4 = pnand %p3714_p3, %p3708_p0 }
   0xa   :  { %3718 = shalt.err (!%p3715_p4)
}
   0xb   :  { %s3744_s12 = smov 128   ;;  %s3745_s13 = smov 8  }
   0xc   :  { %34 = dma.hbm_to_vmem [thread:$0]  %s5005_s3, 10240, %s29_s10, [#allocation5], %s3744_s12, %s3744_s12, %s3745_s13  }
   0xd   :  { %3739 = dma.done.wait [#allocation5], 10240  }
   0xe   :  { %3740 = vsyncadd [#allocation5], 4294957056  ;;  %v3746_v0 = vmov 0   ;;  %v3490_v1 = vld [vmem:[%s5003_s1 + $0x11c] ss:$20 sps:$4 sm:$0xff]   ;;  %v81_v28 = vld [vmem:[%s5002_s0] sm:$0xff] }
   0xf   :  { %717 = vmatprep.mubr.bf16.mxu0 %v3746_v0  ;;  %49 = vst [vmem:[#allocation2] sm:$0xf] %v3746_v0  ;;  %50 = vst [vmem:[#allocation2 + $0x4] sm:$0xf] %v3746_v0  ;;  %910 = vmatprep.mubr.bf16.mxu1 %v3746_v0  ;;  %v3492_v2 = vld [vmem:[%s5003_s1 + $0x118] ss:$20 sps:$4 sm:$0xff]   ;;  %v3250_v31 = vpack.c.bf16 %v81_v28, %v81_v28 }
  0x10   :  { %51 = vst [vmem:[#allocation2 + $0x8] sm:$0xf] %v3746_v0  ;;  %52 = vst [vmem:[#allocation2 + $0xc] sm:$0xf] %v3746_v0  ;;  %685 = vmatprep.subr.bf16.mxu0 %v3490_v1  ;;  %v3493_v3 = vld [vmem:[%s5003_s1 + $0x124] ss:$20 sps:$4 sm:$0xff]  }
  0x11   :  { %53 = vst [vmem:[#allocation2 + $0x10] sm:$0xf] %v3746_v0  ;;  %54 = vst [vmem:[#allocation2 + $0x14] sm:$0xf] %v3746_v0  ;;  %v3495_v4 = vld [vmem:[%s5003_s1 + $0x120] ss:$20 sps:$4 sm:$0xff]   ;;  %686 = vmatpush1.bf16.msra.mxu0 %v3492_v2  ;;  %878 = vmatprep.subr.bf16.mxu1 %v3493_v3 }
  0x12   :  { %55 = vst [vmem:[#allocation2 + $0x18] sm:$0xf] %v3746_v0  ;;  %56 = vst [vmem:[#allocation2 + $0x1c] sm:$0xf] %v3746_v0  ;;  %v3496_v5 = vld [vmem:[%s5003_s1 + $0xf4] ss:$20 sps:$4 sm:$0xff]   ;;  %879 = vmatpush1.bf16.msra.mxu1 %v3495_v4 }
  0x13   :  { %57 = vst [vmem:[#allocation2 + $0x20] sm:$0xf] %v3746_v0  ;;  %58 = vst [vmem:[#allocation2 + $0x24] sm:$0xf] %v3746_v0  ;;  %v3498_v6 = vld [vmem:[%s5003_s1 + $0xf0] ss:$20 sps:$4 sm:$0xff]   ;;  %687 = vmatprep.subr.bf16.mxu0 %v3496_v5 }
  0x14   :  { %59 = vst [vmem:[#allocation2 + $0x28] sm:$0xf] %v3746_v0  ;;  %60 = vst [vmem:[#allocation2 + $0x2c] sm:$0xf] %v3746_v0  ;;  %v3499_v7 = vld [vmem:[%s5003_s1 + $0xfc] ss:$20 sps:$4 sm:$0xff]  }
  0x15   :  { %61 = vst [vmem:[#allocation2 + $0x30] sm:$0xf] %v3746_v0  ;;  %62 = vst [vmem:[#allocation2 + $0x34] sm:$0xf] %v3746_v0  ;;  %v3501_v8 = vld [vmem:[%s5003_s1 + $0xf8] ss:$20 sps:$4 sm:$0xff]   ;;  %880 = vmatprep.subr.bf16.mxu1 %v3499_v7  ;;  %688 = vmatpush1.bf16.msra.mxu0 %v3498_v6 }
  0x16   :  { %63 = vst [vmem:[#allocation2 + $0x38] sm:$0xf] %v3746_v0  ;;  %64 = vst [vmem:[#allocation2 + $0x3c] sm:$0xf] %v3746_v0  ;;  %v3502_v9 = vld [vmem:[%s5003_s1 + $0xcc] ss:$20 sps:$4 sm:$0xff]   ;;  %881 = vmatpush1.bf16.msra.mxu1 %v3501_v8 }
  0x17   :  { %65 = vst [vmem:[#allocation2 + $0x40] sm:$0xf] %v3746_v0  ;;  %66 = vst [vmem:[#allocation2 + $0x44] sm:$0xf] %v3746_v0  ;;  %v3504_v10 = vld [vmem:[%s5003_s1 + $0xc8] ss:$20 sps:$4 sm:$0xff]   ;;  %689 = vmatprep.subr.bf16.mxu0 %v3502_v9 }
  0x18   :  { %67 = vst [vmem:[#allocation2 + $0x48] sm:$0xf] %v3746_v0  ;;  %68 = vst [vmem:[#allocation2 + $0x4c] sm:$0xf] %v3746_v0  ;;  %v3505_v11 = vld [vmem:[%s5003_s1 + $0xd4] ss:$20 sps:$4 sm:$0xff]  }
  0x19   :  { %69 = vst [vmem:[#allocation2 + $0x50] sm:$0xf] %v3746_v0  ;;  %70 = vst [vmem:[#allocation2 + $0x54] sm:$0xf] %v3746_v0  ;;  %v3508_v12 = vld [vmem:[%s5003_s1 + $0xa4] ss:$20 sps:$4 sm:$0xff]   ;;  %882 = vmatprep.subr.bf16.mxu1 %v3505_v11  ;;  %690 = vmatpush1.bf16.msra.mxu0 %v3504_v10 }
  0x1a   :  { %71 = vst [vmem:[#allocation2 + $0x58] sm:$0xf] %v3746_v0  ;;  %72 = vst [vmem:[#allocation2 + $0x5c] sm:$0xf] %v3746_v0  ;;  %v3507_v13 = vld [vmem:[%s5003_s1 + $0xd0] ss:$20 sps:$4 sm:$0xff]   ;;  %691 = vmatprep.subr.bf16.mxu0 %v3508_v12 }
  0x1b   :  { %73 = vst [vmem:[#allocation2 + $0x60] sm:$0xf] %v3746_v0  ;;  %74 = vst [vmem:[#allocation2 + $0x64] sm:$0xf] %v3746_v0  ;;  %v3511_v14 = vld [vmem:[%s5003_s1 + $0xac] ss:$20 sps:$4 sm:$0xff]   ;;  %883 = vmatpush1.bf16.msra.mxu1 %v3507_v13 }
  0x1c   :  { %75 = vst [vmem:[#allocation2 + $0x68] sm:$0xf] %v3746_v0  ;;  %76 = vst [vmem:[#allocation2 + $0x6c] sm:$0xf] %v3746_v0  ;;  %v3510_v15 = vld [vmem:[%s5003_s1 + $0xa0] ss:$20 sps:$4 sm:$0xff]   ;;  %884 = vmatprep.subr.bf16.mxu1 %v3511_v14 }
  0x1d   :  { %77 = vst [vmem:[#allocation2 + $0x70] sm:$0xf] %v3746_v0  ;;  %78 = vst [vmem:[#allocation2 + $0x74] sm:$0xf] %v3746_v0  ;;  %v3514_v16 = vld [vmem:[%s5003_s1 + $0x7c] ss:$20 sps:$4 sm:$0xff]   ;;  %692 = vmatpush1.bf16.msra.mxu0 %v3510_v15 }
  0x1e   :  { %79 = vst [vmem:[#allocation2 + $0x78] sm:$0xf] %v3746_v0  ;;  %80 = vst [vmem:[#allocation2 + $0x7c] sm:$0xf] %v3746_v0  ;;  %v3513_v17 = vld [vmem:[%s5003_s1 + $0xa8] ss:$20 sps:$4 sm:$0xff]   ;;  %693 = vmatprep.subr.bf16.mxu0 %v3514_v16 }
  0x1f   :  { %v3517_v18 = vld [vmem:[%s5003_s1 + $0x84] ss:$20 sps:$4 sm:$0xff]   ;;  %v3520_v20 = vld [vmem:[%s5003_s1 + $0x54] ss:$20 sps:$4 sm:$0xff]   ;;  %885 = vmatpush1.bf16.msra.mxu1 %v3513_v17  ;;  %v3523_v22 = vld [vmem:[%s5003_s1 + $0x5c] ss:$20 sps:$4 sm:$0xff]  }
  0x20   :  { %v3516_v19 = vld [vmem:[%s5003_s1 + $0x78] ss:$20 sps:$4 sm:$0xff]   ;;  %v3519_v21 = vld [vmem:[%s5003_s1 + $0x80] ss:$20 sps:$4 sm:$0xff]   ;;  %886 = vmatprep.subr.bf16.mxu1 %v3517_v18  ;;  %v3522_v23 = vld [vmem:[%s5003_s1 + $0x50] ss:$20 sps:$4 sm:$0xff]  }
  0x21   :  { %694 = vmatpush1.bf16.msra.mxu0 %v3516_v19  ;;  %v3525_v24 = vld [vmem:[%s5003_s1 + $0x58] ss:$20 sps:$4 sm:$0xff]   ;;  %v3528_v26 = vld [vmem:[%s5003_s1 + $0x28] ss:$20 sps:$4 sm:$0xff]   ;;  %vm241_vm0 = vcmask 814080   ;;  %v83_v33 = vld [vmem:[%s5002_s0 + $0x10] sm:$0xff] }
  0x22   :  { %695 = vmatprep.subr.bf16.mxu0 %v3520_v20  ;;  %v3526_v25 = vld [vmem:[%s5003_s1 + $0x2c] ss:$20 sps:$4 sm:$0xff]   ;;  %v3529_v27 = vld [vmem:[%s5003_s1 + $0x34] ss:$20 sps:$4 sm:$0xff]   ;;  %v3532_v30 = vld [vmem:[%s5003_s1 + $0x4] ss:$20 sps:$4 sm:$0xff]   ;;  %v3252_v37 = vpack.c.bf16 %v83_v33, %v83_v33 }
  0x23   :  { %887 = vmatpush1.bf16.msra.mxu1 %v3519_v21  ;;  %v82_v29 = vld [vmem:[%s5002_s0 + $0x8] sm:$0xff]  ;;  %v84_v34 = vld [vmem:[%s5002_s0 + $0x18] sm:$0xff]  ;;  %v85_v35 = vld [vmem:[%s5002_s0 + $0x20] sm:$0xff]  ;;  %242 = vst.msk [vmem:[#allocation2] sm:$0xf] %vm241_vm0, %v3250_v31  ;;  %s3748_s17 = smov [#allocation7]  }
  0x24   :  { %888 = vmatprep.subr.bf16.mxu1 %v3523_v22  ;;  %v3251_v32 = vpack.c.bf16 %v82_v29, %v82_v29  ;;  %v3531_v36 = vld [vmem:[%s5003_s1 + $0x30] ss:$20 sps:$4 sm:$0xff]   ;;  %v3253_v38 = vpack.c.bf16 %v84_v34, %v84_v34  ;;  %v86_v39 = vld [vmem:[%s5002_s0 + $0x28] sm:$0xff]  ;;  %v3254_v40 = vpack.c.bf16 %v85_v35, %v85_v35  ;;  %v88_v42 = vld [vmem:[%s5002_s0 + $0x38] sm:$0xff]  ;;  %244 = vst.msk [vmem:[#allocation2 + $0x8] sm:$0xf] %vm241_vm0, %v3252_v37 }
  0x25   :  { %696 = vmatpush1.bf16.msra.mxu0 %v3522_v23  ;;  %v87_v41 = vld [vmem:[%s5002_s0 + $0x30] sm:$0xff]  ;;  %v3535_v43 = vld [vmem:[%s5003_s1 + $0xc] ss:$20 sps:$4 sm:$0xff]   ;;  %v3255_v44 = vpack.c.bf16 %v86_v39, %v86_v39  ;;  %v3257_v46 = vpack.c.bf16 %v88_v42, %v88_v42  ;;  %v92_v53 = vld [vmem:[%s5002_s0 + $0x58] sm:$0xff]  ;;  %s3056_s18 = sshll.u32 %s3748_s17, 4  ;;  %s3057_s18 = int_to_ptr.vmem [resolvable:$true] %s3056_s18 }
  0x26   :  { %697 = vmatprep.subr.bf16.mxu0 %v3526_v25  ;;  %243 = vst.msk [vmem:[#allocation2 + $0x4] sm:$0xf] %vm241_vm0, %v3251_v32  ;;  %v3256_v45 = vpack.c.bf16 %v87_v41, %v87_v41  ;;  %v89_v47 = vld [vmem:[%s5002_s0 + $0x40] sm:$0xff]  ;;  %v90_v48 = vld [vmem:[%s5002_s0 + $0x48] sm:$0xff]  ;;  %v91_v49 = vld [vmem:[%s5002_s0 + $0x50] sm:$0xff]  ;;  %v3261_v57 = vpack.c.bf16 %v92_v53, %v92_v53  ;;  %s3719_s19 = scalar_lea.vmem %s3057_s18, 32  ;;  %p3724_p6 = scmp.lt.s32.totalorder %s3057_s18, %s3057_s18 }
  0x27   :  { %889 = vmatpush1.bf16.msra.mxu1 %v3525_v24  ;;  %v3534_v50 = vld [vmem:[%s5003_s1] ss:$20 sps:$4 sm:$0xff]   ;;  %245 = vst.msk [vmem:[#allocation2 + $0xc] sm:$0xf] %vm241_vm0, %v3253_v38  ;;  %246 = vst.msk [vmem:[#allocation2 + $0x10] sm:$0xf] %vm241_vm0, %v3254_v40  ;;  %v3258_v51 = vpack.c.bf16 %v89_v47, %v89_v47  ;;  %v3259_v52 = vpack.c.bf16 %v90_v48, %v90_v48  ;;  %v3260_v54 = vpack.c.bf16 %v91_v49, %v91_v49  ;;  %p3720_p5 = scmp.ne.s32.totalorder %s3057_s18, %s3719_s19  ;;  %p3725_p7 = scmp.lt.s32.totalorder %s3719_s19, %s3719_s19 }
  0x28   :  { %v93_v55 = vld [vmem:[%s5002_s0 + $0x60] sm:$0xff]  ;;  %v94_v56 = vld [vmem:[%s5002_s0 + $0x68] sm:$0xff]  ;;  %890 = vmatprep.subr.bf16.mxu1 %v3529_v27  ;;  %247 = vst.msk [vmem:[#allocation2 + $0x14] sm:$0xf] %vm241_vm0, %v3255_v44  ;;  %248 = vst.msk [vmem:[#allocation2 + $0x18] sm:$0xf] %vm241_vm0, %v3256_v45 }
  0x29   :  { %249 = vst.msk [vmem:[#allocation2 + $0x1c] sm:$0xf] %vm241_vm0, %v3257_v46  ;;  %v3262_v58 = vpack.c.bf16 %v93_v55, %v93_v55  ;;  %v3263_v59 = vpack.c.bf16 %v94_v56, %v94_v56  ;;  %v95_v60 = vld [vmem:[%s5002_s0 + $0x70] sm:$0xff]  ;;  %v96_v61 = vld [vmem:[%s5002_s0 + $0x78] sm:$0xff]  ;;  %v97_v62 = vld [vmem:[%s5002_s0 + $0x80] sm:$0xff]  ;;  %698 = vmatpush1.bf16.msra.mxu0 %v3528_v26  ;;  %p3726_p8 = por %p3725_p7, %p3724_p6 }
  0x2a   :  { %v3537_v63 = vld [vmem:[%s5003_s1 + $0x8] ss:$20 sps:$4 sm:$0xff]   ;;  %250 = vst.msk [vmem:[#allocation2 + $0x20] sm:$0xf] %vm241_vm0, %v3258_v51  ;;  %251 = vst.msk [vmem:[#allocation2 + $0x24] sm:$0xf] %vm241_vm0, %v3259_v52  ;;  %v3264_v1 = vpack.c.bf16 %v95_v60, %v95_v60  ;;  %v3265_v2 = vpack.c.bf16 %v96_v61, %v96_v61  ;;  %v3266_v4 = vpack.c.bf16 %v97_v62, %v97_v62  ;;  %699 = vmatprep.subr.bf16.mxu0 %v3532_v30 }
  0x2b   :  { %252 = vst.msk [vmem:[#allocation2 + $0x28] sm:$0xf] %vm241_vm0, %v3260_v54  ;;  %v98_v3 = vld [vmem:[%s5002_s0 + $0x88] sm:$0xff]  ;;  %253 = vst.msk [vmem:[#allocation2 + $0x2c] sm:$0xf] %vm241_vm0, %v3261_v57  ;;  %v99_v7 = vld [vmem:[%s5002_s0 + $0x90] sm:$0xff]  ;;  %891 = vmatpush1.bf16.msra.mxu1 %v3531_v36  ;;  %p3727_p9 = pnand %p3726_p8, %p3720_p5 }
  0x2c   :  { %254 = vst.msk [vmem:[#allocation2 + $0x30] sm:$0xf] %vm241_vm0, %v3262_v58  ;;  %255 = vst.msk [vmem:[#allocation2 + $0x34] sm:$0xf] %vm241_vm0, %v3263_v59  ;;  %v3267_v5 = vpack.c.bf16 %v98_v3, %v98_v3  ;;  %v3547_v6 = vld [vmem:[%s5003_s1 + $0x128] ss:$20 sps:$4 sm:$0xff]   ;;  %v3268_v9 = vpack.c.bf16 %v99_v7, %v99_v7  ;;  %892 = vmatprep.subr.bf16.mxu1 %v3535_v43 }
  0x2d   :  { %v100_v8 = vld [vmem:[%s5002_s0 + $0x98] sm:$0xff]  ;;  %256 = vst.msk [vmem:[#allocation2 + $0x38] sm:$0xf] %vm241_vm0, %v3264_v1  ;;  %257 = vst.msk [vmem:[#allocation2 + $0x3c] sm:$0xf] %vm241_vm0, %v3265_v2  ;;  %v101_v11 = vld [vmem:[%s5002_s0 + $0xa0] sm:$0xff]  ;;  %700 = vmatpush1.bf16.msra.mxu0 %v3534_v50 }
  0x2e   :  { %258 = vst.msk [vmem:[#allocation2 + $0x40] sm:$0xf] %vm241_vm0, %v3266_v4  ;;  %v3269_v10 = vpack.c.bf16 %v100_v8, %v100_v8  ;;  %v102_v12 = vld [vmem:[%s5002_s0 + $0xa8] sm:$0xff]  ;;  %259 = vst.msk [vmem:[#allocation2 + $0x44] sm:$0xf] %vm241_vm0, %v3267_v5  ;;  %v3270_v13 = vpack.c.bf16 %v101_v11, %v101_v11  ;;  %v103_v15 = vld [vmem:[%s5002_s0 + $0xb0] sm:$0xff]  ;;  %3436 = vmatprep.subr.bf16.mxu0 %v3547_v6 }
  0x2f   :  { %v3271_v14 = vpack.c.bf16 %v102_v12, %v102_v12  ;;  %v4022_v16 = vld [vmem:[#allocation2] sm:$0xff]   ;;  %260 = vst.msk [vmem:[#allocation2 + $0x48] sm:$0xf] %vm241_vm0, %v3268_v9  ;;  %v3272_v17 = vpack.c.bf16 %v103_v15, %v103_v15  ;;  %893 = vmatpush1.bf16.msra.mxu1 %v3537_v63  ;;  %v4036_v19 = vld [vmem:[#allocation2 + $0x8] sm:$0xff]   ;;  %v104_v20 = vld [vmem:[%s5002_s0 + $0xb8] sm:$0xff] }
  0x30   :  { %261 = vst.msk [vmem:[#allocation2 + $0x4c] sm:$0xf] %vm241_vm0, %v3269_v10  ;;  %262 = vst.msk [vmem:[#allocation2 + $0x50] sm:$0xf] %vm241_vm0, %v3270_v13  ;;  %v3550_v18 = vld [vmem:[%s5003_s1 + $0x100] ss:$20 sps:$4 sm:$0xff]   ;;  %718 = vmatmul.mubr.bf16.vlgmr.msra.gmra.mxu0 %v4022_v16  ;;  %v3273_v22 = vpack.c.bf16 %v104_v20, %v104_v20 }
  0x31   :  { %263 = vst.msk [vmem:[#allocation2 + $0x54] sm:$0xf] %vm241_vm0, %v3271_v14  ;;  %264 = vst.msk [vmem:[#allocation2 + $0x58] sm:$0xf] %vm241_vm0, %v3272_v17  ;;  %727 = vmatprep.mubr.bf16.mxu0 %v3746_v0  ;;  %3437 = vmatpush3.bf16.msra.mxu0 %v3547_v6  ;;  %v105_v21 = vld [vmem:[%s5002_s0 + $0xc0] sm:$0xff]  ;;  %v106_v23 = vld [vmem:[%s5002_s0 + $0xc8] sm:$0xff] }
  0x32   :  { %911 = vmatmul.mubr.bf16.vlgmr.msra.gmra.mxu1 %v4022_v16  ;;  %3438 = vmatprep.subr.bf16.mxu0 %v3550_v18  ;;  %v3274_v24 = vpack.c.bf16 %v105_v21, %v105_v21  ;;  %v4050_v25 = vld [vmem:[#allocation2 + $0x10] sm:$0xff]   ;;  %v3275_v26 = vpack.c.bf16 %v106_v23, %v106_v23  ;;  %v3553_v27 = vld [vmem:[%s5003_s1 + $0xd8] ss:$20 sps:$4 sm:$0xff]   ;;  %265 = vst.msk [vmem:[#allocation2 + $0x5c] sm:$0xf] %vm241_vm0, %v3273_v22  ;;  %v109_v33 = vld [vmem:[%s5002_s0 + $0xe0] sm:$0xff] }
  0x33   :  { %920 = vmatprep.mubr.bf16.mxu1 %v3746_v0  ;;  %v107_v28 = vld [vmem:[%s5002_s0 + $0xd0] sm:$0xff]  ;;  %v108_v29 = vld [vmem:[%s5002_s0 + $0xd8] sm:$0xff]  ;;  %v110_v34 = vld [vmem:[%s5002_s0 + $0xe8] sm:$0xff]  ;;  %v3278_v35 = vpack.c.bf16 %v109_v33, %v109_v33 }
  0x34   :  { %266 = vst.msk [vmem:[#allocation2 + $0x60] sm:$0xf] %vm241_vm0, %v3274_v24  ;;  %v3276_v30 = vpack.c.bf16 %v107_v28, %v107_v28  ;;  %v3277_v31 = vpack.c.bf16 %v108_v29, %v108_v29  ;;  %v3555_v32 = vld [vmem:[%s5003_s1 + $0xb0] ss:$20 sps:$4 sm:$0xff]   ;;  %267 = vst.msk [vmem:[#allocation2 + $0x64] sm:$0xf] %vm241_vm0, %v3275_v26  ;;  %v3279_v36 = vpack.c.bf16 %v110_v34, %v110_v34 }
  0x35   :  { %3439 = vmatpush3.bf16.msra.mxu0 %v3550_v18  ;;  %v3557_v37 = vld [vmem:[%s5003_s1 + $0x88] ss:$20 sps:$4 sm:$0xff]   ;;  %v111_v38 = vld [vmem:[%s5002_s0 + $0xf0] sm:$0xff]  ;;  %270 = vst.msk [vmem:[#allocation2 + $0x70] sm:$0xf] %vm241_vm0, %v3278_v35  ;;  %v4107_v50 = vld [vmem:[#allocation2 + $0x20] sm:$0xff]  }
  0x36   :  { %3440 = vmatprep.subr.bf16.mxu0 %v3553_v27  ;;  %268 = vst.msk [vmem:[#allocation2 + $0x68] sm:$0xf] %vm241_vm0, %v3276_v30  ;;  %269 = vst.msk [vmem:[#allocation2 + $0x6c] sm:$0xf] %vm241_vm0, %v3277_v31  ;;  %v112_v39 = vld [vmem:[%s5002_s0 + $0xf8] sm:$0xff]  ;;  %v3280_v40 = vpack.c.bf16 %v111_v38, %v111_v38  ;;  %v4114_v57 = vld [vmem:[#allocation2 + $0x28] sm:$0xff]  }
  0x37   :  { %271 = vst.msk [vmem:[#allocation2 + $0x74] sm:$0xf] %vm241_vm0, %v3279_v36  ;;  %v3281_v41 = vpack.c.bf16 %v112_v39, %v112_v39  ;;  %v3558_v42 = vld [vmem:[%s5003_s1 + $0x60] ss:$20 sps:$4 sm:$0xff]   ;;  %v4095_v43 = vld [vmem:[#allocation2 + $0x18] sm:$0xff]   ;;  %v4137_v14 = vld [vmem:[#allocation2 + $0x48] sm:$0xff]  }
  0x38   :  { %728 = vmatmul.mubr.bf16.gmra.mxu0 %v4036_v19  ;;  %272 = vst.msk [vmem:[#allocation2 + $0x78] sm:$0xf] %vm241_vm0, %v3280_v40  ;;  %v3562_v44 = vld [vmem:[#allocation4 + $0x70] ss:$8 sps:$4 sm:$0xff]   ;;  %v3564_v45 = vld [vmem:[#allocation4 + $0x74] ss:$8 sps:$4 sm:$0xff]  }
  0x39   :  { %737 = vmatprep.mubr.bf16.mxu0 %v3746_v0  ;;  %3441 = vmatpush3.bf16.msra.mxu0 %v3553_v27  ;;  %273 = vst.msk [vmem:[#allocation2 + $0x7c] sm:$0xf] %vm241_vm0, %v3281_v41  ;;  %v3560_v46 = vld [vmem:[%s5003_s1 + $0x38] ss:$20 sps:$4 sm:$0xff]   ;;  %v3568_v47 = vld [vmem:[#allocation4 + $0x60] ss:$8 sps:$4 sm:$0xff]  }
  0x3a   :  { %921 = vmatmul.mubr.bf16.gmra.mxu1 %v4036_v19  ;;  %3442 = vmatprep.subr.bf16.mxu0 %v3555_v32  ;;  %v3570_v48 = vld [vmem:[#allocation4 + $0x64] ss:$8 sps:$4 sm:$0xff]   ;;  %v3574_v51 = vld [vmem:[#allocation4 + $0x50] ss:$8 sps:$4 sm:$0xff]   ;;  %v3576_v52 = vld [vmem:[#allocation4 + $0x54] ss:$8 sps:$4 sm:$0xff]  }
  0x3b   :  { %930 = vmatprep.mubr.bf16.mxu1 %v3746_v0  ;;  %1964 = vmatprep.subr.bf16.mxu1 %v3564_v45  ;;  %v3561_v49 = vld [vmem:[%s5003_s1 + $0x10] ss:$20 sps:$4 sm:$0xff]   ;;  %v3567_v53 = vld [vmem:[#allocation4 + $0x174] ss:$8 sps:$4 sm:$0xff]   ;;  %v3580_v55 = vld [vmem:[#allocation4 + $0x40] ss:$8 sps:$4 sm:$0xff]  }
  0x3c   :  { %1965 = vmatpush1.bf16.msra.mxu1 %v3562_v44  ;;  %v3582_v54 = vld [vmem:[#allocation4 + $0x44] ss:$8 sps:$4 sm:$0xff]   ;;  %v3588_v56 = vld [vmem:[#allocation4 + $0x34] ss:$8 sps:$4 sm:$0xff]   ;;  %v3586_v58 = vld [vmem:[#allocation4 + $0x30] ss:$8 sps:$4 sm:$0xff]  }
  0x3d   :  { %3443 = vmatpush3.bf16.msra.mxu0 %v3555_v32  ;;  %1966 = vmatprep.subr.bf16.mxu1 %v3570_v48  ;;  %v3594_v59 = vld [vmem:[#allocation4 + $0x24] ss:$8 sps:$4 sm:$0xff]   ;;  %v3592_v60 = vld [vmem:[#allocation4 + $0x20] ss:$8 sps:$4 sm:$0xff]   ;;  %v3600_v61 = vld [vmem:[#allocation4 + $0x14] ss:$8 sps:$4 sm:$0xff]  }
  0x3e   :  { %3444 = vmatprep.subr.bf16.mxu0 %v3557_v37  ;;  %v4120_v62 = vld [vmem:[#allocation2 + $0x30] sm:$0xff]   ;;  %v3606_v1 = vld [vmem:[#allocation4 + $0x4] ss:$8 sps:$4 sm:$0xff]   ;;  %v3604_v2 = vld [vmem:[#allocation4] ss:$8 sps:$4 sm:$0xff]  }
  0x3f   :  { %v3598_v63 = vld [vmem:[#allocation4 + $0x10] ss:$8 sps:$4 sm:$0xff]   ;;  %v3612_v3 = vld [vmem:[#allocation4 + $0xf4] ss:$8 sps:$4 sm:$0xff]   ;;  %v3618_v6 = vld [vmem:[#allocation4 + $0xe4] ss:$8 sps:$4 sm:$0xff]  }
  0x40   :  { %738 = vmatmul.mubr.bf16.gmra.mxu0 %v4050_v25  ;;  %1967 = vmatpush1.bf16.msra.mxu1 %v3568_v47  ;;  %v4126_v4 = vld [vmem:[#allocation2 + $0x38] sm:$0xff]   ;;  %v3616_v7 = vld [vmem:[#allocation4 + $0xe0] ss:$8 sps:$4 sm:$0xff]   ;;  %v3630_v11 = vld [vmem:[#allocation4 + $0xc4] ss:$8 sps:$4 sm:$0xff]  }
  0x41   :  { %747 = vmatprep.mubr.bf16.mxu0 %v3746_v0  ;;  %3445 = vmatpush3.bf16.msra.mxu0 %v3557_v37  ;;  %v3610_v5 = vld [vmem:[#allocation4 + $0xf0] ss:$8 sps:$4 sm:$0xff]   ;;  %v3624_v8 = vld [vmem:[#allocation4 + $0xd4] ss:$8 sps:$4 sm:$0xff]   ;;  %v4131_v9 = vld [vmem:[#allocation2 + $0x40] sm:$0xff]  }
  0x42   :  { %931 = vmatmul.mubr.bf16.gmra.mxu1 %v4050_v25  ;;  %3446 = vmatprep.subr.bf16.mxu0 %v3558_v42  ;;  %v3622_v10 = vld [vmem:[#allocation4 + $0xd0] ss:$8 sps:$4 sm:$0xff]   ;;  %v3628_v12 = vld [vmem:[#allocation4 + $0xc0] ss:$8 sps:$4 sm:$0xff]   ;;  %v3636_v13 = vld [vmem:[#allocation4 + $0xb4] ss:$8 sps:$4 sm:$0xff]  }
  0x43   :  { %940 = vmatprep.mubr.bf16.mxu1 %v3746_v0  ;;  %1968 = vmatprep.subr.bf16.mxu1 %v3576_v52  ;;  %v3634_v15 = vld [vmem:[#allocation4 + $0xb0] ss:$8 sps:$4 sm:$0xff]   ;;  %v3642_v17 = vld [vmem:[#allocation4 + $0xa4] ss:$8 sps:$4 sm:$0xff]   ;;  %v3640_v18 = vld [vmem:[#allocation4 + $0xa0] ss:$8 sps:$4 sm:$0xff]  }
  0x44   :  { %1969 = vmatpush1.bf16.msra.mxu1 %v3574_v51  ;;  %v3648_v20 = vld [vmem:[#allocation4 + $0x94] ss:$8 sps:$4 sm:$0xff]   ;;  %v3646_v22 = vld [vmem:[#allocation4 + $0x90] ss:$8 sps:$4 sm:$0xff]   ;;  %v3654_v23 = vld [vmem:[#allocation4 + $0x84] ss:$8 sps:$4 sm:$0xff]  }
  0x45   :  { %3447 = vmatpush3.bf16.msra.mxu0 %v3558_v42  ;;  %1970 = vmatprep.subr.bf16.mxu1 %v3582_v54  ;;  %v4143_v21 = vld [vmem:[#allocation2 + $0x50] sm:$0xff]   ;;  %v3652_v24 = vld [vmem:[#allocation4 + $0x80] ss:$8 sps:$4 sm:$0xff]   ;;  %v4150_v26 = vld [vmem:[#allocation2 + $0x58] sm:$0xff]  }
  0x46   :  { %3448 = vmatprep.subr.bf16.mxu0 %v3560_v46  ;;  %v4156_v27 = vld [vmem:[#allocation2 + $0x60] sm:$0xff]   ;;  %v4162_v28 = vld [vmem:[#allocation2 + $0x68] sm:$0xff]   ;;  %v4168_v29 = vld [vmem:[#allocation2 + $0x70] sm:$0xff]  }
  0x47   :  { %v4174_v30 = vld [vmem:[#allocation2 + $0x78] sm:$0xff]   ;;  %v3573_v32 = vld [vmem:[#allocation4 + $0x164] ss:$8 sps:$4 sm:$0xff]   ;;  %v3571_v33 = vld [vmem:[#allocation4 + $0x160] ss:$8 sps:$4 sm:$0xff]  }
  0x48   :  { %748 = vmatmul.mubr.bf16.gmra.mxu0 %v4095_v43  ;;  %1971 = vmatpush1.bf16.msra.mxu1 %v3580_v55  ;;  %v3565_v31 = vld [vmem:[#allocation4 + $0x170] ss:$8 sps:$4 sm:$0xff]   ;;  %v3579_v34 = vld [vmem:[#allocation4 + $0x154] ss:$8 sps:$4 sm:$0xff]   ;;  %v3585_v36 = vld [vmem:[#allocation4 + $0x144] ss:$8 sps:$4 sm:$0xff]  }
  0x49   :  { %757 = vmatprep.mubr.bf16.mxu0 %v3746_v0  ;;  %3449 = vmatpush3.bf16.msra.mxu0 %v3560_v46  ;;  %v3577_v35 = vld [vmem:[#allocation4 + $0x150] ss:$8 sps:$4 sm:$0xff]   ;;  %v3591_v37 = vld [vmem:[#allocation4 + $0x134] ss:$8 sps:$4 sm:$0xff]   ;;  %v3595_v38 = vld [vmem:[#allocation4 + $0x120] ss:$8 sps:$4 sm:$0xff]  }
  0x4a   :  { %941 = vmatmul.mubr.bf16.gmra.mxu1 %v4095_v43  ;;  %3450 = vmatprep.subr.bf16.mxu0 %v3561_v49  ;;  %v3603_v39 = vld [vmem:[#allocation4 + $0x114] ss:$8 sps:$4 sm:$0xff]   ;;  %v3601_v41 = vld [vmem:[#allocation4 + $0x110] ss:$8 sps:$4 sm:$0xff]   ;;  %v3609_v42 = vld [vmem:[#allocation4 + $0x104] ss:$8 sps:$4 sm:$0xff]  }
  0x4b   :  { %950 = vmatprep.mubr.bf16.mxu1 %v3746_v0  ;;  %1972 = vmatprep.subr.bf16.mxu1 %v3588_v56  ;;  %v3660_v40 = vld [vmem:[#allocation4 + $0x274] ss:$8 sps:$4 sm:$0xff]   ;;  %v3613_v45 = vld [vmem:[#allocation4 + $0x1f0] ss:$8 sps:$4 sm:$0xff]   ;;  %v3621_v46 = vld [vmem:[#allocation4 + $0x1e4] ss:$8 sps:$4 sm:$0xff]  }
  0x4c   :  { %1973 = vmatpush1.bf16.msra.mxu1 %v3586_v58  ;;  %v3615_v44 = vld [vmem:[#allocation4 + $0x1f4] ss:$8 sps:$4 sm:$0xff]   ;;  %v3619_v47 = vld [vmem:[#allocation4 + $0x1e0] ss:$8 sps:$4 sm:$0xff]   ;;  %v3645_v54 = vld [vmem:[#allocation4 + $0x1a4] ss:$8 sps:$4 sm:$0xff]  }
  0x4d   :  { %3451 = vmatpush3.bf16.msra.mxu0 %v3561_v49  ;;  %1974 = vmatprep.subr.bf16.mxu1 %v3594_v59  ;;  %v3627_v48 = vld [vmem:[#allocation4 + $0x1d4] ss:$8 sps:$4 sm:$0xff]   ;;  %v3625_v49 = vld [vmem:[#allocation4 + $0x1d0] ss:$8 sps:$4 sm:$0xff]   ;;  %v3631_v51 = vld [vmem:[#allocation4 + $0x1c0] ss:$8 sps:$4 sm:$0xff]   ;;  %v5012_v59 = vlaneseq }
  0x4e   :  { %2157 = vmatprep.subr.bf16.mxu0 %v3567_v53  ;;  %v3639_v52 = vld [vmem:[#allocation4 + $0x1b4] ss:$8 sps:$4 sm:$0xff]   ;;  %v3637_v53 = vld [vmem:[#allocation4 + $0x1b0] ss:$8 sps:$4 sm:$0xff]   ;;  %v3643_v55 = vld [vmem:[#allocation4 + $0x1a0] ss:$8 sps:$4 sm:$0xff]  }
  0x4f   :  { %v3651_v56 = vld [vmem:[#allocation4 + $0x194] ss:$8 sps:$4 sm:$0xff]   ;;  %v3657_v58 = vld [vmem:[#allocation4 + $0x184] ss:$8 sps:$4 sm:$0xff]  }
  0x50   :  { %758 = vmatmul.mubr.bf16.gmra.mxu0 %v4107_v50  ;;  %1975 = vmatpush1.bf16.msra.mxu1 %v3592_v60  ;;  %v3655_v60 = vld [vmem:[#allocation4 + $0x180] ss:$8 sps:$4 sm:$0xff]  }
  0x51   :  { %767 = vmatprep.mubr.bf16.mxu0 %v3746_v0  ;;  %1976 = vmatprep.subr.bf16.mxu1 %v3600_v61  ;;  %v4195_v61 = vshrl.u32 %v5012_v59, 7 }
  0x52   :  { %951 = vmatmul.mubr.bf16.gmra.mxu1 %v4107_v50 }
  0x53   :  { %960 = vmatprep.mubr.bf16.mxu1 %v3746_v0  ;;  %5016 = vst [vmem:[#allocation10_spill] sm:$0xff] %v4195_v61 }
  0x54   :  { %1977 = vmatpush1.bf16.msra.mxu1 %v3598_v63  ;;  %v5013_v63 = vsub.s32 1, %v4195_v61 }
  0x55   :  { %1978 = vmatprep.subr.bf16.mxu1 %v3606_v1  ;;  %v370_v1 = vsub.s32 3, %v4195_v61 }
  0x58   :  { %768 = vmatmul.mubr.bf16.gmra.mxu0 %v4114_v57  ;;  %1979 = vmatpush1.bf16.msra.mxu1 %v3604_v2  ;;  %v5014_v2 = vsub.s32 0, %v4195_v61 }
  0x59   :  { %777 = vmatprep.mubr.bf16.mxu0 %v3746_v0  ;;  %1980 = vmatprep.subr.bf16.mxu1 %v3612_v3  ;;  %v354_v3 = vld [vmem:[%s5004_s2] sm:$0x1f] }
  0x5a   :  { %961 = vmatmul.mubr.bf16.gmra.mxu1 %v4114_v57 }
  0x5b   :  { %970 = vmatprep.mubr.bf16.mxu1 %v3746_v0 }
  0x5c   :  { %1981 = vmatpush2.bf16.msra.mxu1 %v3610_v5 }
  0x5d   :  { %1982 = vmatprep.subr.bf16.mxu1 %v3618_v6  ;;  %v4208_v6 = vrot.slane %v354_v3, %v5013_v63 }
  0x60   :  { %778 = vmatmul.mubr.bf16.gmra.mxu0 %v4120_v62  ;;  %1983 = vmatpush2.bf16.msra.mxu1 %v3616_v7 }
  0x61   :  { %787 = vmatprep.mubr.bf16.mxu0 %v3746_v0  ;;  %1984 = vmatprep.subr.bf16.mxu1 %v3624_v8 }
  0x62   :  { %971 = vmatmul.mubr.bf16.gmra.mxu1 %v4120_v62 }
  0x63   :  { %980 = vmatprep.mubr.bf16.mxu1 %v3746_v0 }
  0x64   :  { %1985 = vmatpush2.bf16.msra.mxu1 %v3622_v10  ;;  %v4214_v10 = vrot.slane %v354_v3, %v5014_v2 }
  0x65   :  { %1986 = vmatprep.subr.bf16.mxu1 %v3630_v11 }
  0x68   :  { %788 = vmatmul.mubr.bf16.gmra.mxu0 %v4126_v4  ;;  %1987 = vmatpush2.bf16.msra.mxu1 %v3628_v12 }
  0x69   :  { %797 = vmatprep.mubr.bf16.mxu0 %v3746_v0  ;;  %1988 = vmatprep.subr.bf16.mxu1 %v3636_v13 }
  0x6a   :  { %981 = vmatmul.mubr.bf16.gmra.mxu1 %v4126_v4 }
  0x6b   :  { %990 = vmatprep.mubr.bf16.mxu1 %v3746_v0 }
  0x6c   :  { %1989 = vmatpush2.bf16.msra.mxu1 %v3634_v15 }
  0x6d   :  { %1990 = vmatprep.subr.bf16.mxu1 %v3642_v17 }
  0x70   :  { %798 = vmatmul.mubr.bf16.gmra.mxu0 %v4131_v9  ;;  %1991 = vmatpush2.bf16.msra.mxu1 %v3640_v18 }
  0x71   :  { %807 = vmatprep.mubr.bf16.mxu0 %v3746_v0  ;;  %1992 = vmatprep.subr.bf16.mxu1 %v3648_v20 }
  0x72   :  { %991 = vmatmul.mubr.bf16.gmra.mxu1 %v4131_v9 }
  0x73   :  { %1000 = vmatprep.mubr.bf16.mxu1 %v3746_v0 }
  0x74   :  { %1993 = vmatpush2.bf16.msra.mxu1 %v3646_v22 }
  0x75   :  { %1994 = vmatprep.subr.bf16.mxu1 %v3654_v23 }
  0x78   :  { %808 = vmatmul.mubr.bf16.gmra.mxu0 %v4137_v14  ;;  %1995 = vmatpush2.bf16.msra.mxu1 %v3652_v24 }
  0x79   :  { %817 = vmatprep.mubr.bf16.mxu0 %v3746_v0  ;;  %2350 = vmatprep.subr.bf16.mxu1 %v3660_v40 }
  0x7a   :  { %1001 = vmatmul.mubr.bf16.gmra.mxu1 %v4137_v14 }
  0x7b   :  { %1010 = vmatprep.mubr.bf16.mxu1 %v3746_v0 }
  0x80   :  { %818 = vmatmul.mubr.bf16.gmra.mxu0 %v4143_v21 }
  0x81   :  { %827 = vmatprep.mubr.bf16.mxu0 %v3746_v0 }
  0x82   :  { %1011 = vmatmul.mubr.bf16.gmra.mxu1 %v4143_v21 }
  0x83   :  { %1020 = vmatprep.mubr.bf16.mxu1 %v3746_v0 }
  0x88   :  { %828 = vmatmul.mubr.bf16.gmra.mxu0 %v4150_v26 }
  0x89   :  { %837 = vmatprep.mubr.bf16.mxu0 %v3746_v0 }
  0x8a   :  { %1021 = vmatmul.mubr.bf16.gmra.mxu1 %v4150_v26 }
  0x8b   :  { %1030 = vmatprep.mubr.bf16.mxu1 %v3746_v0 }
  0x90   :  { %838 = vmatmul.mubr.bf16.gmra.mxu0 %v4156_v27 }
  0x91   :  { %847 = vmatprep.mubr.bf16.mxu0 %v3746_v0 }
  0x92   :  { %1031 = vmatmul.mubr.bf16.gmra.mxu1 %v4156_v27 }
  0x93   :  { %1040 = vmatprep.mubr.bf16.mxu1 %v3746_v0 }
  0x98   :  { %848 = vmatmul.mubr.bf16.gmra.mxu0 %v4162_v28 }
  0x99   :  { %857 = vmatprep.mubr.bf16.mxu0 %v3746_v0 }
  0x9a   :  { %1041 = vmatmul.mubr.bf16.gmra.mxu1 %v4162_v28 }
  0x9b   :  { %1050 = vmatprep.mubr.bf16.mxu1 %v3746_v0 }
  0xa0   :  { %858 = vmatmul.mubr.bf16.gmra.mxu0 %v4168_v29 }
  0xa1   :  { %867 = vmatprep.mubr.bf16.mxu0 %v3746_v0 }
  0xa2   :  { %1051 = vmatmul.mubr.bf16.gmra.mxu1 %v4168_v29 }
  0xa3   :  { %1060 = vmatprep.mubr.bf16.mxu1 %v3746_v0 }
  0xa8   :  { %868 = vmatmul.mubr.bf16.gmra.mxu0 %v4174_v30 }
  0xa9   :  { %3452 = vmatprep.mubr.bf16.mxu0 %v4022_v16  ;;  %v3583_v16 = vld [vmem:[#allocation4 + $0x140] ss:$8 sps:$4 sm:$0xff]  }
  0xaa   :  { %1061 = vmatmul.mubr.bf16.gmra.mxu1 %v4174_v30 }
  0xb0   :  { %3453 = vmatmul.mubr.bf16.vlgmr.msra.gmra.mxu0 %v4036_v19  ;;  %v3589_v19 = vld [vmem:[#allocation4 + $0x130] ss:$8 sps:$4 sm:$0xff]  }
  0xb1   :  { %3456 = vmatprep.mubr.bf16.mxu0 %v4050_v25  ;;  %2158 = vmatpush1.bf16.msra.mxu0 %v3565_v31  ;;  %v3597_v25 = vld [vmem:[#allocation4 + $0x124] ss:$8 sps:$4 sm:$0xff]  }
  0xb2   :  { %2159 = vmatprep.subr.bf16.mxu0 %v3573_v32 }
  0xb5   :  { %2160 = vmatpush1.bf16.msra.mxu0 %v3571_v33 }
  0xb6   :  { %2161 = vmatprep.subr.bf16.mxu0 %v3579_v34 }
  0xb8   :  { %3457 = vmatmul.mubr.bf16.gmra.mxu0 %v4095_v43  ;;  %v3607_v43 = vld [vmem:[#allocation4 + $0x100] ss:$8 sps:$4 sm:$0xff]  }
  0xb9   :  { %2162 = vmatpush1.bf16.msra.mxu0 %v3577_v35  ;;  %3460 = vmatprep.mubr.bf16.mxu0 %v4107_v50  ;;  %v3633_v50 = vld [vmem:[#allocation4 + $0x1c4] ss:$8 sps:$4 sm:$0xff]  }
  0xba   :  { %2163 = vmatprep.subr.bf16.mxu0 %v3585_v36 }
  0xbd   :  { %2164 = vmatpush1.bf16.msra.mxu0 %v3583_v16 }
  0xbe   :  { %2165 = vmatprep.subr.bf16.mxu0 %v3591_v37 }
  0xc0   :  { %3461 = vmatmul.mubr.bf16.gmra.mxu0 %v4114_v57  ;;  %v3649_v57 = vld [vmem:[#allocation4 + $0x190] ss:$8 sps:$4 sm:$0xff]  }
  0xc1   :  { %2166 = vmatpush1.bf16.msra.mxu0 %v3589_v19  ;;  %3464 = vmatprep.mubr.bf16.mxu0 %v4120_v62  ;;  %v366_v62 = vsub.s32 2, %v4195_v61 }
  0xc2   :  { %2167 = vmatprep.subr.bf16.mxu0 %v3597_v25 }
  0xc3   :  { %v4204_v5 = vrot.slane %v354_v3, %v366_v62 }
  0xc5   :  { %2168 = vmatpush1.bf16.msra.mxu0 %v3595_v38  ;;  %v3658_v38 = vld [vmem:[#allocation4 + $0x270] ss:$8 sps:$4 sm:$0xff]  }
  0xc6   :  { %2169 = vmatprep.subr.bf16.mxu0 %v3603_v39 }
  0xc8   :  { %3465 = vmatmul.mubr.bf16.gmra.mxu0 %v4126_v4 }
  0xc9   :  { %2170 = vmatpush1.bf16.msra.mxu0 %v3601_v41  ;;  %3468 = vmatprep.mubr.bf16.mxu0 %v4131_v9  ;;  %v4210_v9 = vrot.slane %v354_v3, %v370_v1 }
  0xca   :  { %2171 = vmatprep.subr.bf16.mxu0 %v3609_v42 }
  0xcd   :  { %2172 = vmatpush1.bf16.msra.mxu0 %v3607_v43  ;;  %v3663_v43 = vld [vmem:[#allocation4 + $0x264] ss:$8 sps:$4 sm:$0xff]  }
  0xce   :  { %2173 = vmatprep.subr.bf16.mxu0 %v3615_v44 }
  0xd0   :  { %3469 = vmatmul.mubr.bf16.gmra.mxu0 %v4137_v14 }
  0xd1   :  { %2174 = vmatpush2.bf16.msra.mxu0 %v3613_v45  ;;  %3472 = vmatprep.mubr.bf16.mxu0 %v4143_v21 }
  0xd2   :  { %2175 = vmatprep.subr.bf16.mxu0 %v3621_v46 }
  0xd5   :  { %2176 = vmatpush2.bf16.msra.mxu0 %v3619_v47 }
  0xd6   :  { %2177 = vmatprep.subr.bf16.mxu0 %v3627_v48 }
  0xd8   :  { %3473 = vmatmul.mubr.bf16.gmra.mxu0 %v4150_v26 }
  0xd9   :  { %2178 = vmatpush2.bf16.msra.mxu0 %v3625_v49  ;;  %3476 = vmatprep.mubr.bf16.mxu0 %v4156_v27 }
  0xda   :  { %2179 = vmatprep.subr.bf16.mxu0 %v3633_v50 }
  0xdd   :  { %2180 = vmatpush2.bf16.msra.mxu0 %v3631_v51 }
  0xde   :  { %2181 = vmatprep.subr.bf16.mxu0 %v3639_v52 }
  0xe0   :  { %3477 = vmatmul.mubr.bf16.gmra.mxu0 %v4162_v28 }
  0xe1   :  { %2182 = vmatpush2.bf16.msra.mxu0 %v3637_v53  ;;  %3480 = vmatprep.mubr.bf16.mxu0 %v4168_v29 }
  0xe2   :  { %2183 = vmatprep.subr.bf16.mxu0 %v3645_v54  ;;  %v3661_v54 = vld [vmem:[#allocation4 + $0x260] ss:$8 sps:$4 sm:$0xff]  }
  0xe5   :  { %2184 = vmatpush2.bf16.msra.mxu0 %v3643_v55 }
  0xe6   :  { %2185 = vmatprep.subr.bf16.mxu0 %v3651_v56 }
  0xe8   :  { %3481 = vmatmul.mubr.bf16.gmra.mxu0 %v4174_v30 }
  0xe9   :  { %2186 = vmatpush2.bf16.msra.mxu0 %v3649_v57 }
  0xea   :  { %2187 = vmatprep.subr.bf16.mxu0 %v3657_v58 }
  0xed   :  { %2188 = vmatpush2.bf16.msra.mxu0 %v3655_v60  ;;  %v3666_v60 = vld [vmem:[#allocation4 + $0x254] ss:$8 sps:$4 sm:$0xff]  }
  0xf0   :  { %v719_v4 = vpop.f32.mrf.mxu0 }
  0xf1   :  { %v720_v21 = vadd.f32 %v719_v4, %v4214_v10 }
  0xf2   :  { %v721_v7 = vpop.f32.mrf.mxu0  ;;  %v912_v8 = vpop.f32.mrf.mxu1 }
  0xf3   :  { %v913_v13 = vadd.f32 %v912_v8, %v4204_v5  ;;  %v722_v15 = vadd.f32 %v721_v7, %v4208_v6  ;;  %v1232_v36 = vmax.f32 %v720_v21, 0.0 }
  0xf4   :  { %v723_v11 = vpop.f32.mrf.mxu0  ;;  %v914_v12 = vpop.f32.mrf.mxu1 }
  0xf5   :  { %v724_v14 = vadd.f32 %v723_v11, %v4214_v10  ;;  %v915_v17 = vadd.f32 %v914_v12, %v4210_v9  ;;  %v1234_v27 = vmax.f32 %v913_v13, 0.0  ;;  %v1233_v31 = vmax.f32 %v722_v15, 0.0  ;;  %v3664_v15 = vld [vmem:[#allocation4 + $0x250] ss:$8 sps:$4 sm:$0xff]  }
  0xf6   :  { %v725_v18 = vpop.f32.mrf.mxu0  ;;  %v916_v20 = vpop.f32.mrf.mxu1 }
  0xf7   :  { %v726_v22 = vadd.f32 %v725_v18, %v4208_v6  ;;  %v917_v23 = vadd.f32 %v916_v20, %v4204_v5  ;;  %v1237_v28 = vmax.f32 %v724_v14, 0.0  ;;  %v1235_v32 = vmax.f32 %v915_v17, 0.0 }
  0xf8   :  { %v729_v24 = vpop.f32.mrf.mxu0  ;;  %v918_v26 = vpop.f32.mrf.mxu1 }
  0xf9   :  { %v1238_v29 = vmax.f32 %v726_v22, 0.0  ;;  %v1239_v30 = vmax.f32 %v917_v23, 0.0  ;;  %v919_v33 = vadd.f32 %v918_v26, %v4210_v9  ;;  %v1392_v39 = vpack.c.bf16 %v1237_v28, %v1232_v36  ;;  %v3669_v22 = vld [vmem:[#allocation4 + $0x244] ss:$8 sps:$4 sm:$0xff]  }
  0xfa   :  { %v731_v34 = vpop.f32.mrf.mxu0  ;;  %v922_v35 = vpop.f32.mrf.mxu1  ;;  %v730_v49 = vadd.f32 %v729_v24, %v4214_v10 }
  0xfb   :  { %v1240_v16 = vmax.f32 %v919_v33, 0.0  ;;  %v1393_v25 = vpack.c.bf16 %v1238_v29, %v1233_v31  ;;  %v1394_v40 = vpack.c.bf16 %v1239_v30, %v1234_v27  ;;  %v923_v41 = vadd.f32 %v922_v35, %v4204_v5 }
  0xfc   :  { %v733_v37 = vpop.f32.mrf.mxu0  ;;  %v924_v19 = vpop.f32.mrf.mxu1  ;;  %v732_v44 = vadd.f32 %v731_v34, %v4208_v6  ;;  %v1242_v8 = vmax.f32 %v730_v49, 0.0  ;;  %v3667_v34 = vld [vmem:[#allocation4 + $0x240] ss:$8 sps:$4 sm:$0xff]  }
  0xfd   :  { %v734_v42 = vadd.f32 %v733_v37, %v4214_v10  ;;  %v925_v45 = vadd.f32 %v924_v19, %v4210_v9  ;;  %1996 = vmatprep.mubr.bf16.mxu1 %v1393_v25  ;;  %v1395_v48 = vpack.c.bf16 %v1240_v16, %v1235_v32  ;;  %v1244_v55 = vmax.f32 %v923_v41, 0.0  ;;  %v3672_v19 = vld [vmem:[#allocation4 + $0x234] ss:$8 sps:$4 sm:$0xff]  }
  0xfe   :  { %v735_v46 = vpop.f32.mrf.mxu0  ;;  %v926_v47 = vpop.f32.mrf.mxu1  ;;  %1997 = vmatmul.mubr.bf16.vlgmr.msra.gmra.mxu1 %v1392_v39  ;;  %v1243_v62 = vmax.f32 %v732_v44, 0.0 }
  0xff   :  { %v736_v50 = vadd.f32 %v735_v46, %v4208_v6  ;;  %v927_v51 = vadd.f32 %v926_v47, %v4204_v5  ;;  %2189 = vmatprep.mubr.bf16.mxu0 %v1395_v48  ;;  %2351 = vmatpush1.bf16.msra.mxu1 %v3658_v38  ;;  %v1247_v56 = vmax.f32 %v734_v42, 0.0  ;;  %v1245_v1 = vmax.f32 %v925_v45, 0.0  ;;  %v3670_v47 = vld [vmem:[#allocation4 + $0x230] ss:$8 sps:$4 sm:$0xff]  }
 0x100   :  { %v739_v52 = vpop.f32.mrf.mxu0  ;;  %v928_v53 = vpop.f32.mrf.mxu1  ;;  %2190 = vmatmul.mubr.bf16.vlgmr.msra.gmra.mxu0 %v1394_v40  ;;  %2352 = vmatprep.subr.bf16.mxu1 %v3663_v43 }
 0x101   :  { %v1248_v57 = vmax.f32 %v736_v50, 0.0  ;;  %v1249_v58 = vmax.f32 %v927_v51, 0.0  ;;  %v929_v3 = vadd.f32 %v928_v53, %v4210_v9  ;;  %v1397_v17 = vpack.c.bf16 %v1247_v56, %v1242_v8 }
 0x102   :  { %v741_v4 = vpop.f32.mrf.mxu0  ;;  %v932_v7 = vpop.f32.mrf.mxu1  ;;  %v740_v29 = vadd.f32 %v739_v52, %v4214_v10  ;;  %v3675_v52 = vld [vmem:[#allocation4 + $0x224] ss:$8 sps:$4 sm:$0xff]  }
 0x103   :  { %v1250_v11 = vmax.f32 %v929_v3, 0.0  ;;  %v1398_v14 = vpack.c.bf16 %v1248_v57, %v1243_v62  ;;  %2353 = vmatpush1.bf16.msra.mxu1 %v3661_v54  ;;  %v1399_v18 = vpack.c.bf16 %v1249_v58, %v1244_v55  ;;  %v933_v20 = vadd.f32 %v932_v7, %v4204_v5 }
 0x104   :  { %v743_v12 = vpop.f32.mrf.mxu0  ;;  %v934_v13 = vpop.f32.mrf.mxu1  ;;  %2354 = vmatprep.subr.bf16.mxu1 %v3666_v60  ;;  %v742_v23 = vadd.f32 %v741_v4, %v4208_v6  ;;  %v1252_v42 = vmax.f32 %v740_v29, 0.0  ;;  %v3673_v4 = vld [vmem:[#allocation4 + $0x220] ss:$8 sps:$4 sm:$0xff]  }
 0x105   :  { %v744_v21 = vadd.f32 %v743_v12, %v4214_v10  ;;  %v935_v24 = vadd.f32 %v934_v13, %v4210_v9  ;;  %2006 = vmatprep.mubr.bf16.mxu1 %v1398_v14  ;;  %v1400_v28 = vpack.c.bf16 %v1250_v11, %v1245_v1  ;;  %v1254_v35 = vmax.f32 %v933_v20, 0.0  ;;  %v3678_v13 = vld [vmem:[#allocation4 + $0x214] ss:$8 sps:$4 sm:$0xff]  }
 0x106   :  { %v745_v26 = vpop.f32.mrf.mxu0  ;;  %v936_v27 = vpop.f32.mrf.mxu1  ;;  %2007 = vmatmul.mubr.bf16.gmra.mxu1 %v1397_v17  ;;  %v1253_v25 = vmax.f32 %v742_v23, 0.0 }
 0x107   :  { %v746_v30 = vadd.f32 %v745_v26, %v4208_v6  ;;  %v937_v31 = vadd.f32 %v936_v27, %v4204_v5  ;;  %2199 = vmatprep.mubr.bf16.mxu0 %v1400_v28  ;;  %2355 = vmatpush1.bf16.msra.mxu1 %v3664_v15  ;;  %v1257_v36 = vmax.f32 %v744_v21, 0.0  ;;  %v1255_v38 = vmax.f32 %v935_v24, 0.0  ;;  %v3676_v27 = vld [vmem:[#allocation4 + $0x210] ss:$8 sps:$4 sm:$0xff]  }
 0x108   :  { %v749_v32 = vpop.f32.mrf.mxu0  ;;  %v938_v33 = vpop.f32.mrf.mxu1  ;;  %2200 = vmatmul.mubr.bf16.gmra.mxu0 %v1399_v18  ;;  %2356 = vmatprep.subr.bf16.mxu1 %v3669_v22 }
 0x109   :  { %v1258_v16 = vmax.f32 %v746_v30, 0.0  ;;  %v1259_v37 = vmax.f32 %v937_v31, 0.0  ;;  %v939_v39 = vadd.f32 %v938_v33, %v4210_v9  ;;  %v1402_v48 = vpack.c.bf16 %v1257_v36, %v1252_v42 }
 0x10a   :  { %v751_v40 = vpop.f32.mrf.mxu0  ;;  %v942_v41 = vpop.f32.mrf.mxu1  ;;  %v750_v58 = vadd.f32 %v749_v32, %v4214_v10  ;;  %v3681_v32 = vld [vmem:[#allocation4 + $0x204] ss:$8 sps:$4 sm:$0xff]  }
 0x10b   :  { %v1260_v43 = vmax.f32 %v939_v39, 0.0  ;;  %v1403_v46 = vpack.c.bf16 %v1258_v16, %v1253_v25  ;;  %2357 = vmatpush1.bf16.msra.mxu1 %v3667_v34  ;;  %v1404_v49 = vpack.c.bf16 %v1259_v37, %v1254_v35  ;;  %v943_v50 = vadd.f32 %v942_v41, %v4204_v5 }
 0x10c   :  { %v753_v44 = vpop.f32.mrf.mxu0  ;;  %v944_v45 = vpop.f32.mrf.mxu1  ;;  %2358 = vmatprep.subr.bf16.mxu1 %v3672_v19  ;;  %v752_v53 = vadd.f32 %v751_v40, %v4208_v6  ;;  %v1262_v21 = vmax.f32 %v750_v58, 0.0  ;;  %v3679_v40 = vld [vmem:[#allocation4 + $0x200] ss:$8 sps:$4 sm:$0xff]  }
 0x10d   :  { %v754_v51 = vadd.f32 %v753_v44, %v4214_v10  ;;  %v945_v54 = vadd.f32 %v944_v45, %v4210_v9  ;;  %2016 = vmatprep.mubr.bf16.mxu1 %v1403_v46  ;;  %v1405_v57 = vpack.c.bf16 %v1260_v43, %v1255_v38  ;;  %v1264_v7 = vmax.f32 %v943_v50, 0.0 }
 0x10e   :  { %v755_v55 = vpop.f32.mrf.mxu0  ;;  %v946_v56 = vpop.f32.mrf.mxu1  ;;  %2017 = vmatmul.mubr.bf16.gmra.mxu1 %v1402_v48  ;;  %v1263_v14 = vmax.f32 %v752_v53, 0.0 }
 0x10f   :  { %v756_v60 = vadd.f32 %v755_v55, %v4208_v6  ;;  %v947_v62 = vadd.f32 %v946_v56, %v4204_v5  ;;  %2209 = vmatprep.mubr.bf16.mxu0 %v1405_v57  ;;  %2359 = vmatpush1.bf16.msra.mxu1 %v3670_v47  ;;  %v1267_v8 = vmax.f32 %v754_v51, 0.0  ;;  %v1265_v15 = vmax.f32 %v945_v54, 0.0 }
 0x110   :  { %v759_v1 = vpop.f32.mrf.mxu0  ;;  %v948_v3 = vpop.f32.mrf.mxu1  ;;  %2210 = vmatmul.mubr.bf16.gmra.mxu0 %v1404_v49  ;;  %2360 = vmatprep.subr.bf16.mxu1 %v3675_v52 }
 0x111   :  { %v1268_v11 = vmax.f32 %v756_v60, 0.0  ;;  %v1269_v12 = vmax.f32 %v947_v62, 0.0  ;;  %v949_v17 = vadd.f32 %v948_v3, %v4210_v9  ;;  %v1407_v28 = vpack.c.bf16 %v1267_v8, %v1262_v21 }
 0x112   :  { %v761_v18 = vpop.f32.mrf.mxu0  ;;  %v952_v20 = vpop.f32.mrf.mxu1  ;;  %v760_v37 = vadd.f32 %v759_v1, %v4214_v10 }
 0x113   :  { %v1270_v22 = vmax.f32 %v949_v17, 0.0  ;;  %v1408_v26 = vpack.c.bf16 %v1268_v11, %v1263_v14  ;;  %2361 = vmatpush1.bf16.msra.mxu1 %v3673_v4  ;;  %v1409_v29 = vpack.c.bf16 %v1269_v12, %v1264_v7  ;;  %v953_v30 = vadd.f32 %v952_v20, %v4204_v5 }
 0x114   :  { %v763_v23 = vpop.f32.mrf.mxu0  ;;  %v954_v24 = vpop.f32.mrf.mxu1  ;;  %2362 = vmatprep.subr.bf16.mxu1 %v3678_v13  ;;  %v762_v33 = vadd.f32 %v761_v18, %v4208_v6  ;;  %v1272_v50 = vmax.f32 %v760_v37, 0.0 }
 0x115   :  { %v764_v31 = vadd.f32 %v763_v23, %v4214_v10  ;;  %v955_v34 = vadd.f32 %v954_v24, %v4210_v9  ;;  %2026 = vmatprep.mubr.bf16.mxu1 %v1408_v26  ;;  %v1410_v16 = vpack.c.bf16 %v1270_v22, %v1265_v15  ;;  %v1274_v41 = vmax.f32 %v953_v30, 0.0 }
 0x116   :  { %v765_v35 = vpop.f32.mrf.mxu0  ;;  %v956_v36 = vpop.f32.mrf.mxu1  ;;  %2027 = vmatmul.mubr.bf16.gmra.mxu1 %v1407_v28  ;;  %v1273_v45 = vmax.f32 %v762_v33, 0.0 }
 0x117   :  { %v766_v19 = vadd.f32 %v765_v35, %v4208_v6  ;;  %v957_v25 = vadd.f32 %v956_v36, %v4204_v5  ;;  %2219 = vmatprep.mubr.bf16.mxu0 %v1410_v16  ;;  %2363 = vmatpush1.bf16.msra.mxu1 %v3676_v27  ;;  %v1277_v42 = vmax.f32 %v764_v31, 0.0  ;;  %v1275_v46 = vmax.f32 %v955_v34, 0.0 }
 0x118   :  { %v769_v38 = vpop.f32.mrf.mxu0  ;;  %v958_v39 = vpop.f32.mrf.mxu1  ;;  %2220 = vmatmul.mubr.bf16.gmra.mxu0 %v1409_v29  ;;  %2364 = vmatprep.subr.bf16.mxu1 %v3681_v32 }
 0x119   :  { %v1278_v43 = vmax.f32 %v766_v19, 0.0  ;;  %v1279_v44 = vmax.f32 %v957_v25, 0.0  ;;  %v959_v47 = vadd.f32 %v958_v39, %v4210_v9  ;;  %v1412_v55 = vpack.c.bf16 %v1277_v42, %v1272_v50 }
 0x11a   :  { %v771_v48 = vpop.f32.mrf.mxu0  ;;  %v962_v49 = vpop.f32.mrf.mxu1  ;;  %v770_v7 = vadd.f32 %v769_v38, %v4214_v10 }
 0x11b   :  { %v1280_v51 = vmax.f32 %v959_v47, 0.0  ;;  %v1413_v54 = vpack.c.bf16 %v1278_v43, %v1273_v45  ;;  %2365 = vmatpush1.bf16.msra.mxu1 %v3679_v40  ;;  %v1414_v56 = vpack.c.bf16 %v1279_v44, %v1274_v41  ;;  %v963_v57 = vadd.f32 %v962_v49, %v4204_v5 }
 0x11c   :  { %v773_v52 = vpop.f32.mrf.mxu0  ;;  %v964_v53 = vpop.f32.mrf.mxu1  ;;  %v772_v60 = vadd.f32 %v771_v48, %v4208_v6  ;;  %v1282_v26 = vmax.f32 %v770_v7, 0.0 }
 0x11d   :  { %v774_v58 = vadd.f32 %v773_v52, %v4214_v10  ;;  %v965_v62 = vadd.f32 %v964_v53, %v4210_v9  ;;  %2036 = vmatprep.mubr.bf16.mxu1 %v1413_v54  ;;  %v1415_v4 = vpack.c.bf16 %v1280_v51, %v1275_v46  ;;  %v1284_v14 = vmax.f32 %v963_v57, 0.0 }
 0x11e   :  { %v775_v1 = vpop.f32.mrf.mxu0  ;;  %v966_v3 = vpop.f32.mrf.mxu1  ;;  %2037 = vmatmul.mubr.bf16.gmra.mxu1 %v1412_v55  ;;  %v1283_v20 = vmax.f32 %v772_v60, 0.0 }
 0x11f   :  { %v776_v8 = vadd.f32 %v775_v1, %v4208_v6  ;;  %v967_v11 = vadd.f32 %v966_v3, %v4204_v5  ;;  %2229 = vmatprep.mubr.bf16.mxu0 %v1415_v4  ;;  %v1287_v15 = vmax.f32 %v774_v58, 0.0  ;;  %v1285_v21 = vmax.f32 %v965_v62, 0.0 }
 0x120   :  { %v779_v12 = vpop.f32.mrf.mxu0  ;;  %v968_v13 = vpop.f32.mrf.mxu1  ;;  %2230 = vmatmul.mubr.bf16.gmra.mxu0 %v1414_v56 }
 0x121   :  { %v1288_v17 = vmax.f32 %v776_v8, 0.0  ;;  %v1289_v18 = vmax.f32 %v967_v11, 0.0  ;;  %v969_v22 = vadd.f32 %v968_v13, %v4210_v9  ;;  %v1417_v31 = vpack.c.bf16 %v1287_v15, %v1282_v26 }
 0x122   :  { %v781_v23 = vpop.f32.mrf.mxu0  ;;  %v972_v24 = vpop.f32.mrf.mxu1  ;;  %v780_v25 = vadd.f32 %v779_v12, %v4214_v10 }
 0x123   :  { %v1290_v27 = vmax.f32 %v969_v22, 0.0  ;;  %v1418_v30 = vpack.c.bf16 %v1288_v17, %v1283_v20  ;;  %v1419_v32 = vpack.c.bf16 %v1289_v18, %v1284_v14  ;;  %v973_v33 = vadd.f32 %v972_v24, %v4204_v5 }
 0x124   :  { %v783_v28 = vpop.f32.mrf.mxu0  ;;  %v974_v29 = vpop.f32.mrf.mxu1  ;;  %v782_v35 = vadd.f32 %v781_v23, %v4208_v6  ;;  %v1292_v51 = vmax.f32 %v780_v25, 0.0 }
 0x125   :  { %v784_v34 = vadd.f32 %v783_v28, %v4214_v10  ;;  %v975_v36 = vadd.f32 %v974_v29, %v4210_v9  ;;  %2046 = vmatprep.mubr.bf16.mxu1 %v1418_v30  ;;  %v1420_v19 = vpack.c.bf16 %v1290_v27, %v1285_v21  ;;  %v1294_v42 = vmax.f32 %v973_v33, 0.0 }
 0x126   :  { %v785_v16 = vpop.f32.mrf.mxu0  ;;  %v976_v37 = vpop.f32.mrf.mxu1  ;;  %2047 = vmatmul.mubr.bf16.gmra.mxu1 %v1417_v31  ;;  %v1293_v46 = vmax.f32 %v782_v35, 0.0 }
 0x127   :  { %v786_v38 = vadd.f32 %v785_v16, %v4208_v6  ;;  %v977_v39 = vadd.f32 %v976_v37, %v4204_v5  ;;  %2239 = vmatprep.mubr.bf16.mxu0 %v1420_v19  ;;  %v1297_v43 = vmax.f32 %v784_v34, 0.0  ;;  %v1295_v47 = vmax.f32 %v975_v36, 0.0 }
 0x128   :  { %v789_v40 = vpop.f32.mrf.mxu0  ;;  %v978_v41 = vpop.f32.mrf.mxu1  ;;  %2240 = vmatmul.mubr.bf16.gmra.mxu0 %v1419_v32 }
 0x129   :  { %v1298_v44 = vmax.f32 %v786_v38, 0.0  ;;  %v1299_v45 = vmax.f32 %v977_v39, 0.0  ;;  %v979_v48 = vadd.f32 %v978_v41, %v4210_v9  ;;  %v1422_v56 = vpack.c.bf16 %v1297_v43, %v1292_v51 }
 0x12a   :  { %v791_v49 = vpop.f32.mrf.mxu0  ;;  %v982_v50 = vpop.f32.mrf.mxu1  ;;  %v790_v8 = vadd.f32 %v789_v40, %v4214_v10 }
 0x12b   :  { %v1300_v52 = vmax.f32 %v979_v48, 0.0  ;;  %v1423_v55 = vpack.c.bf16 %v1298_v44, %v1293_v46  ;;  %v1424_v57 = vpack.c.bf16 %v1299_v45, %v1294_v42  ;;  %v983_v58 = vadd.f32 %v982_v50, %v4204_v5 }
 0x12c   :  { %v793_v53 = vpop.f32.mrf.mxu0  ;;  %v984_v54 = vpop.f32.mrf.mxu1  ;;  %v792_v62 = vadd.f32 %v791_v49, %v4208_v6  ;;  %v1302_v27 = vmax.f32 %v790_v8, 0.0 }
 0x12d   :  { %v794_v60 = vadd.f32 %v793_v53, %v4214_v10  ;;  %v985_v1 = vadd.f32 %v984_v54, %v4210_v9  ;;  %2056 = vmatprep.mubr.bf16.mxu1 %v1423_v55  ;;  %v1425_v7 = vpack.c.bf16 %v1300_v52, %v1295_v47  ;;  %v1304_v15 = vmax.f32 %v983_v58, 0.0 }
 0x12e   :  { %v795_v3 = vpop.f32.mrf.mxu0  ;;  %v986_v4 = vpop.f32.mrf.mxu1  ;;  %2057 = vmatmul.mubr.bf16.gmra.mxu1 %v1422_v56  ;;  %v1303_v21 = vmax.f32 %v792_v62, 0.0 }
 0x12f   :  { %v796_v11 = vadd.f32 %v795_v3, %v4208_v6  ;;  %v987_v12 = vadd.f32 %v986_v4, %v4204_v5  ;;  %2249 = vmatprep.mubr.bf16.mxu0 %v1425_v7  ;;  %v1307_v17 = vmax.f32 %v794_v60, 0.0  ;;  %v1305_v22 = vmax.f32 %v985_v1, 0.0 }
 0x130   :  { %v799_v13 = vpop.f32.mrf.mxu0  ;;  %v988_v14 = vpop.f32.mrf.mxu1  ;;  %2250 = vmatmul.mubr.bf16.gmra.mxu0 %v1424_v57 }
 0x131   :  { %v1308_v18 = vmax.f32 %v796_v11, 0.0  ;;  %v1309_v20 = vmax.f32 %v987_v12, 0.0  ;;  %v989_v23 = vadd.f32 %v988_v14, %v4210_v9  ;;  %v1427_v32 = vpack.c.bf16 %v1307_v17, %v1302_v27 }
 0x132   :  { %v801_v24 = vpop.f32.mrf.mxu0  ;;  %v992_v26 = vpop.f32.mrf.mxu1  ;;  %v800_v38 = vadd.f32 %v799_v13, %v4214_v10 }
 0x133   :  { %v1310_v28 = vmax.f32 %v989_v23, 0.0  ;;  %v1428_v31 = vpack.c.bf16 %v1308_v18, %v1303_v21  ;;  %v1429_v33 = vpack.c.bf16 %v1309_v20, %v1304_v15  ;;  %v993_v34 = vadd.f32 %v992_v26, %v4204_v5 }
 0x134   :  { %v803_v29 = vpop.f32.mrf.mxu0  ;;  %v994_v30 = vpop.f32.mrf.mxu1  ;;  %v802_v36 = vadd.f32 %v801_v24, %v4208_v6  ;;  %v1312_v52 = vmax.f32 %v800_v38, 0.0 }
 0x135   :  { %v804_v35 = vadd.f32 %v803_v29, %v4214_v10  ;;  %v995_v16 = vadd.f32 %v994_v30, %v4210_v9  ;;  %2066 = vmatprep.mubr.bf16.mxu1 %v1428_v31  ;;  %v1430_v25 = vpack.c.bf16 %v1310_v28, %v1305_v22  ;;  %v1314_v43 = vmax.f32 %v993_v34, 0.0 }
 0x136   :  { %v805_v37 = vpop.f32.mrf.mxu0  ;;  %v996_v19 = vpop.f32.mrf.mxu1  ;;  %2067 = vmatmul.mubr.bf16.gmra.mxu1 %v1427_v32  ;;  %v1313_v47 = vmax.f32 %v802_v36, 0.0 }
 0x137   :  { %v806_v39 = vadd.f32 %v805_v37, %v4208_v6  ;;  %v997_v40 = vadd.f32 %v996_v19, %v4204_v5  ;;  %2259 = vmatprep.mubr.bf16.mxu0 %v1430_v25  ;;  %v1317_v44 = vmax.f32 %v804_v35, 0.0  ;;  %v1315_v48 = vmax.f32 %v995_v16, 0.0 }
 0x138   :  { %v809_v41 = vpop.f32.mrf.mxu0  ;;  %v998_v42 = vpop.f32.mrf.mxu1  ;;  %2260 = vmatmul.mubr.bf16.gmra.mxu0 %v1429_v33 }
 0x139   :  { %v1318_v45 = vmax.f32 %v806_v39, 0.0  ;;  %v1319_v46 = vmax.f32 %v997_v40, 0.0  ;;  %v999_v49 = vadd.f32 %v998_v42, %v4210_v9  ;;  %v1432_v57 = vpack.c.bf16 %v1317_v44, %v1312_v52 }
 0x13a   :  { %v811_v50 = vpop.f32.mrf.mxu0  ;;  %v1002_v51 = vpop.f32.mrf.mxu1  ;;  %v810_v11 = vadd.f32 %v809_v41, %v4214_v10 }
 0x13b   :  { %v1320_v53 = vmax.f32 %v999_v49, 0.0  ;;  %v1433_v56 = vpack.c.bf16 %v1318_v45, %v1313_v47  ;;  %v1434_v58 = vpack.c.bf16 %v1319_v46, %v1314_v43  ;;  %v1003_v60 = vadd.f32 %v1002_v51, %v4204_v5 }
 0x13c   :  { %v813_v54 = vpop.f32.mrf.mxu0  ;;  %v1004_v55 = vpop.f32.mrf.mxu1  ;;  %v812_v1 = vadd.f32 %v811_v50, %v4208_v6  ;;  %v1322_v28 = vmax.f32 %v810_v11, 0.0 }
 0x13d   :  { %v814_v62 = vadd.f32 %v813_v54, %v4214_v10  ;;  %v1005_v3 = vadd.f32 %v1004_v55, %v4210_v9  ;;  %2076 = vmatprep.mubr.bf16.mxu1 %v1433_v56  ;;  %v1435_v8 = vpack.c.bf16 %v1320_v53, %v1315_v48  ;;  %v1324_v17 = vmax.f32 %v1003_v60, 0.0 }
 0x13e   :  { %v815_v4 = vpop.f32.mrf.mxu0  ;;  %v1006_v7 = vpop.f32.mrf.mxu1  ;;  %2077 = vmatmul.mubr.bf16.gmra.mxu1 %v1432_v57  ;;  %v1323_v22 = vmax.f32 %v812_v1, 0.0 }
 0x13f   :  { %v816_v12 = vadd.f32 %v815_v4, %v4208_v6  ;;  %v1007_v13 = vadd.f32 %v1006_v7, %v4204_v5  ;;  %2269 = vmatprep.mubr.bf16.mxu0 %v1435_v8  ;;  %v1327_v18 = vmax.f32 %v814_v62, 0.0  ;;  %v1325_v23 = vmax.f32 %v1005_v3, 0.0 }
 0x140   :  { %v819_v14 = vpop.f32.mrf.mxu0  ;;  %v1008_v15 = vpop.f32.mrf.mxu1  ;;  %2270 = vmatmul.mubr.bf16.gmra.mxu0 %v1434_v58 }
 0x141   :  { %v1328_v20 = vmax.f32 %v816_v12, 0.0  ;;  %v1329_v21 = vmax.f32 %v1007_v13, 0.0  ;;  %v1009_v24 = vadd.f32 %v1008_v15, %v4210_v9  ;;  %v1437_v33 = vpack.c.bf16 %v1327_v18, %v1322_v28 }
 0x142   :  { %v821_v26 = vpop.f32.mrf.mxu0  ;;  %v1012_v27 = vpop.f32.mrf.mxu1  ;;  %v820_v39 = vadd.f32 %v819_v14, %v4214_v10 }
 0x143   :  { %v1330_v29 = vmax.f32 %v1009_v24, 0.0  ;;  %v1438_v32 = vpack.c.bf16 %v1328_v20, %v1323_v22  ;;  %v1439_v34 = vpack.c.bf16 %v1329_v21, %v1324_v17  ;;  %v1013_v35 = vadd.f32 %v1012_v27, %v4204_v5 }
 0x144   :  { %v823_v30 = vpop.f32.mrf.mxu0  ;;  %v1014_v31 = vpop.f32.mrf.mxu1  ;;  %v822_v16 = vadd.f32 %v821_v26, %v4208_v6  ;;  %v1332_v53 = vmax.f32 %v820_v39, 0.0 }
 0x145   :  { %v824_v36 = vadd.f32 %v823_v30, %v4214_v10  ;;  %v1015_v37 = vadd.f32 %v1014_v31, %v4210_v9  ;;  %2086 = vmatprep.mubr.bf16.mxu1 %v1438_v32  ;;  %v1440_v38 = vpack.c.bf16 %v1330_v29, %v1325_v23  ;;  %v1334_v44 = vmax.f32 %v1013_v35, 0.0 }
 0x146   :  { %v825_v19 = vpop.f32.mrf.mxu0  ;;  %v1016_v25 = vpop.f32.mrf.mxu1  ;;  %2087 = vmatmul.mubr.bf16.gmra.mxu1 %v1437_v33  ;;  %v1333_v48 = vmax.f32 %v822_v16, 0.0 }
 0x147   :  { %v826_v40 = vadd.f32 %v825_v19, %v4208_v6  ;;  %v1017_v41 = vadd.f32 %v1016_v25, %v4204_v5  ;;  %2279 = vmatprep.mubr.bf16.mxu0 %v1440_v38  ;;  %v1337_v45 = vmax.f32 %v824_v36, 0.0  ;;  %v1335_v49 = vmax.f32 %v1015_v37, 0.0 }
 0x148   :  { %v829_v42 = vpop.f32.mrf.mxu0  ;;  %v1018_v43 = vpop.f32.mrf.mxu1  ;;  %2280 = vmatmul.mubr.bf16.gmra.mxu0 %v1439_v34 }
 0x149   :  { %v1338_v46 = vmax.f32 %v826_v40, 0.0  ;;  %v1339_v47 = vmax.f32 %v1017_v41, 0.0  ;;  %v1019_v50 = vadd.f32 %v1018_v43, %v4210_v9  ;;  %v1442_v58 = vpack.c.bf16 %v1337_v45, %v1332_v53 }
 0x14a   :  { %v831_v51 = vpop.f32.mrf.mxu0  ;;  %v1022_v52 = vpop.f32.mrf.mxu1  ;;  %v830_v12 = vadd.f32 %v829_v42, %v4214_v10 }
 0x14b   :  { %v1340_v54 = vmax.f32 %v1019_v50, 0.0  ;;  %v1443_v57 = vpack.c.bf16 %v1338_v46, %v1333_v48  ;;  %v1444_v60 = vpack.c.bf16 %v1339_v47, %v1334_v44  ;;  %v1023_v62 = vadd.f32 %v1022_v52, %v4204_v5 }
 0x14c   :  { %v833_v55 = vpop.f32.mrf.mxu0  ;;  %v1024_v56 = vpop.f32.mrf.mxu1  ;;  %v832_v3 = vadd.f32 %v831_v51, %v4208_v6  ;;  %v1342_v29 = vmax.f32 %v830_v12, 0.0 }
 0x14d   :  { %v834_v1 = vadd.f32 %v833_v55, %v4214_v10  ;;  %v1025_v4 = vadd.f32 %v1024_v56, %v4210_v9  ;;  %2096 = vmatprep.mubr.bf16.mxu1 %v1443_v57  ;;  %v1445_v11 = vpack.c.bf16 %v1340_v54, %v1335_v49  ;;  %v1344_v18 = vmax.f32 %v1023_v62, 0.0 }
 0x14e   :  { %v835_v7 = vpop.f32.mrf.mxu0  ;;  %v1026_v8 = vpop.f32.mrf.mxu1  ;;  %2097 = vmatmul.mubr.bf16.gmra.mxu1 %v1442_v58  ;;  %v1343_v23 = vmax.f32 %v832_v3, 0.0 }
 0x14f   :  { %v836_v13 = vadd.f32 %v835_v7, %v4208_v6  ;;  %v1027_v14 = vadd.f32 %v1026_v8, %v4204_v5  ;;  %2289 = vmatprep.mubr.bf16.mxu0 %v1445_v11  ;;  %v1347_v20 = vmax.f32 %v834_v1, 0.0  ;;  %v1345_v24 = vmax.f32 %v1025_v4, 0.0 }
 0x150   :  { %v839_v15 = vpop.f32.mrf.mxu0  ;;  %v1028_v17 = vpop.f32.mrf.mxu1  ;;  %2290 = vmatmul.mubr.bf16.gmra.mxu0 %v1444_v60 }
 0x151   :  { %v1348_v21 = vmax.f32 %v836_v13, 0.0  ;;  %v1349_v22 = vmax.f32 %v1027_v14, 0.0  ;;  %v1029_v26 = vadd.f32 %v1028_v17, %v4210_v9  ;;  %v1447_v34 = vpack.c.bf16 %v1347_v20, %v1342_v29 }
 0x152   :  { %v841_v27 = vpop.f32.mrf.mxu0  ;;  %v1032_v28 = vpop.f32.mrf.mxu1  ;;  %v840_v40 = vadd.f32 %v839_v15, %v4214_v10 }
 0x153   :  { %v1350_v30 = vmax.f32 %v1029_v26, 0.0  ;;  %v1448_v33 = vpack.c.bf16 %v1348_v21, %v1343_v23  ;;  %v1449_v35 = vpack.c.bf16 %v1349_v22, %v1344_v18  ;;  %v1033_v36 = vadd.f32 %v1032_v28, %v4204_v5 }
 0x154   :  { %v843_v31 = vpop.f32.mrf.mxu0  ;;  %v1034_v32 = vpop.f32.mrf.mxu1  ;;  %v842_v37 = vadd.f32 %v841_v27, %v4208_v6  ;;  %v1352_v54 = vmax.f32 %v840_v40, 0.0 }
 0x155   :  { %v844_v16 = vadd.f32 %v843_v31, %v4214_v10  ;;  %v1035_v19 = vadd.f32 %v1034_v32, %v4210_v9  ;;  %2106 = vmatprep.mubr.bf16.mxu1 %v1448_v33  ;;  %v1450_v39 = vpack.c.bf16 %v1350_v30, %v1345_v24  ;;  %v1354_v45 = vmax.f32 %v1033_v36, 0.0 }
 0x156   :  { %v845_v25 = vpop.f32.mrf.mxu0  ;;  %v1036_v38 = vpop.f32.mrf.mxu1  ;;  %2107 = vmatmul.mubr.bf16.gmra.mxu1 %v1447_v34  ;;  %v1353_v49 = vmax.f32 %v842_v37, 0.0 }
 0x157   :  { %v846_v41 = vadd.f32 %v845_v25, %v4208_v6  ;;  %v1037_v42 = vadd.f32 %v1036_v38, %v4204_v5  ;;  %2299 = vmatprep.mubr.bf16.mxu0 %v1450_v39  ;;  %v1357_v46 = vmax.f32 %v844_v16, 0.0  ;;  %v1355_v50 = vmax.f32 %v1035_v19, 0.0 }
 0x158   :  { %v849_v43 = vpop.f32.mrf.mxu0  ;;  %v1038_v44 = vpop.f32.mrf.mxu1  ;;  %2300 = vmatmul.mubr.bf16.gmra.mxu0 %v1449_v35 }
 0x159   :  { %v1358_v47 = vmax.f32 %v846_v41, 0.0  ;;  %v1359_v48 = vmax.f32 %v1037_v42, 0.0  ;;  %v1039_v51 = vadd.f32 %v1038_v44, %v4210_v9  ;;  %v1452_v60 = vpack.c.bf16 %v1357_v46, %v1352_v54 }
 0x15a   :  { %v851_v52 = vpop.f32.mrf.mxu0  ;;  %v1042_v53 = vpop.f32.mrf.mxu1  ;;  %v850_v13 = vadd.f32 %v849_v43, %v4214_v10 }
 0x15b   :  { %v1360_v55 = vmax.f32 %v1039_v51, 0.0  ;;  %v1453_v58 = vpack.c.bf16 %v1358_v47, %v1353_v49  ;;  %v1454_v62 = vpack.c.bf16 %v1359_v48, %v1354_v45  ;;  %v1043_v1 = vadd.f32 %v1042_v53, %v4204_v5 }
 0x15c   :  { %v853_v56 = vpop.f32.mrf.mxu0  ;;  %v1044_v57 = vpop.f32.mrf.mxu1  ;;  %v852_v4 = vadd.f32 %v851_v52, %v4208_v6  ;;  %v1362_v30 = vmax.f32 %v850_v13, 0.0 }
 0x15d   :  { %v854_v3 = vadd.f32 %v853_v56, %v4214_v10  ;;  %v1045_v7 = vadd.f32 %v1044_v57, %v4210_v9  ;;  %2116 = vmatprep.mubr.bf16.mxu1 %v1453_v58  ;;  %v1455_v12 = vpack.c.bf16 %v1360_v55, %v1355_v50  ;;  %v1364_v20 = vmax.f32 %v1043_v1, 0.0 }
 0x15e   :  { %v855_v8 = vpop.f32.mrf.mxu0  ;;  %v1046_v11 = vpop.f32.mrf.mxu1  ;;  %2117 = vmatmul.mubr.bf16.gmra.mxu1 %v1452_v60  ;;  %v1363_v24 = vmax.f32 %v852_v4, 0.0  ;;  %v374_v56 = vsub.s32 4, %v4195_v61 }
 0x15f   :  { %v856_v14 = vadd.f32 %v855_v8, %v4208_v6  ;;  %v1047_v15 = vadd.f32 %v1046_v11, %v4204_v5  ;;  %2309 = vmatprep.mubr.bf16.mxu0 %v1455_v12  ;;  %v1367_v21 = vmax.f32 %v854_v3, 0.0  ;;  %v1365_v26 = vmax.f32 %v1045_v7, 0.0 }
 0x160   :  { %v859_v17 = vpop.f32.mrf.mxu0  ;;  %v1048_v18 = vpop.f32.mrf.mxu1  ;;  %2310 = vmatmul.mubr.bf16.gmra.mxu0 %v1454_v62 }
 0x161   :  { %v1368_v22 = vmax.f32 %v856_v14, 0.0  ;;  %v1369_v23 = vmax.f32 %v1047_v15, 0.0  ;;  %v1049_v27 = vadd.f32 %v1048_v18, %v4210_v9  ;;  %v1457_v35 = vpack.c.bf16 %v1367_v21, %v1362_v30 }
 0x162   :  { %v861_v28 = vpop.f32.mrf.mxu0  ;;  %v1052_v29 = vpop.f32.mrf.mxu1  ;;  %v860_v41 = vadd.f32 %v859_v17, %v4214_v10 }
 0x163   :  { %v1370_v31 = vmax.f32 %v1049_v27, 0.0  ;;  %v1458_v34 = vpack.c.bf16 %v1368_v22, %v1363_v24  ;;  %v1459_v36 = vpack.c.bf16 %v1369_v23, %v1364_v20  ;;  %v1053_v16 = vadd.f32 %v1052_v29, %v4204_v5  ;;  %v3698_v24 = vld [vmem:[%s5004_s2] sm:$0x1f] }
 0x164   :  { %v863_v32 = vpop.f32.mrf.mxu0  ;;  %v1054_v33 = vpop.f32.mrf.mxu1  ;;  %v862_v19 = vadd.f32 %v861_v28, %v4208_v6  ;;  %v1372_v55 = vmax.f32 %v860_v41, 0.0 }
 0x165   :  { %v864_v37 = vadd.f32 %v863_v32, %v4214_v10  ;;  %v1055_v25 = vadd.f32 %v1054_v33, %v4210_v9  ;;  %2126 = vmatprep.mubr.bf16.mxu1 %v1458_v34  ;;  %v1460_v40 = vpack.c.bf16 %v1370_v31, %v1365_v26  ;;  %v1374_v46 = vmax.f32 %v1053_v16, 0.0 }
 0x166   :  { %v865_v38 = vpop.f32.mrf.mxu0  ;;  %v1056_v39 = vpop.f32.mrf.mxu1  ;;  %2127 = vmatmul.mubr.bf16.gmra.mxu1 %v1457_v35  ;;  %v1373_v50 = vmax.f32 %v862_v19, 0.0  ;;  %v4347_v26 = vrot.slane %v3698_v24, %v374_v56 }
 0x167   :  { %v866_v42 = vadd.f32 %v865_v38, %v4208_v6  ;;  %v1057_v43 = vadd.f32 %v1056_v39, %v4204_v5  ;;  %2319 = vmatprep.mubr.bf16.mxu0 %v1460_v40  ;;  %v1377_v47 = vmax.f32 %v864_v37, 0.0  ;;  %v1375_v51 = vmax.f32 %v1055_v25, 0.0 }
 0x168   :  { %v869_v44 = vpop.f32.mrf.mxu0  ;;  %v1058_v45 = vpop.f32.mrf.mxu1  ;;  %2320 = vmatmul.mubr.bf16.gmra.mxu0 %v1459_v36 }
 0x169   :  { %v1378_v48 = vmax.f32 %v866_v42, 0.0  ;;  %v1379_v49 = vmax.f32 %v1057_v43, 0.0  ;;  %v1059_v52 = vadd.f32 %v1058_v45, %v4210_v9  ;;  %v1462_v4 = vpack.c.bf16 %v1377_v47, %v1372_v55 }
 0x16a   :  { %v871_v53 = vpop.f32.mrf.mxu0  ;;  %v1062_v54 = vpop.f32.mrf.mxu1  ;;  %v870_v15 = vadd.f32 %v869_v44, %v4214_v10 }
 0x16b   :  { %v1380_v57 = vmax.f32 %v1059_v52, 0.0  ;;  %v872_v58 = vadd.f32 %v871_v53, %v4208_v6  ;;  %v1063_v60 = vadd.f32 %v1062_v54, %v4204_v5  ;;  %v1463_v3 = vpack.c.bf16 %v1378_v48, %v1373_v50 }
 0x16c   :  { %v873_v62 = vpop.f32.mrf.mxu0  ;;  %v1064_v1 = vpop.f32.mrf.mxu1  ;;  %v1464_v7 = vpack.c.bf16 %v1379_v49, %v1374_v46  ;;  %v1382_v30 = vmax.f32 %v870_v15, 0.0 }
 0x16d   :  { %v874_v8 = vadd.f32 %v873_v62, %v4214_v10  ;;  %v1065_v11 = vadd.f32 %v1064_v1, %v4210_v9  ;;  %2136 = vmatprep.mubr.bf16.mxu1 %v1463_v3  ;;  %v1465_v14 = vpack.c.bf16 %v1380_v57, %v1375_v51  ;;  %v1383_v20 = vmax.f32 %v872_v58, 0.0 }
 0x16e   :  { %v875_v12 = vpop.f32.mrf.mxu0  ;;  %v1066_v13 = vpop.f32.mrf.mxu1  ;;  %2137 = vmatmul.mubr.bf16.gmra.mxu1 %v1462_v4  ;;  %v1384_v21 = vmax.f32 %v1063_v60, 0.0  ;;  %v3682_v4 = vld [vmem:[%s5007_s5 + $0x78] sm:$0xff]  }
 0x16f   :  { %v876_v17 = vadd.f32 %v875_v12, %v4208_v6  ;;  %v1067_v18 = vadd.f32 %v1066_v13, %v4204_v5  ;;  %v1387_v22 = vmax.f32 %v874_v8, 0.0  ;;  %2329 = vmatprep.mubr.bf16.mxu0 %v1465_v14  ;;  %v1385_v28 = vmax.f32 %v1065_v11, 0.0  ;;  %3306 = vmatprep.subr.bf16.mxu0 %v3682_v4  ;;  %v3693_v4 = vld [vmem:[%s5007_s5 + $0x10] sm:$0xff]  }
 0x170   :  { %v1068_v23 = vpop.f32.mrf.mxu1  ;;  %v3454_v27 = vpop.f32.mrf.mxu0  ;;  %2330 = vmatmul.mubr.bf16.gmra.mxu0 %v1464_v7  ;;  %v3683_v7 = vld [vmem:[%s5007_s5 + $0x38] sm:$0xff]  }
 0x171   :  { %v1388_v29 = vmax.f32 %v876_v17, 0.0  ;;  %v1389_v10 = vmax.f32 %v1067_v18, 0.0  ;;  %v1069_v6 = vadd.f32 %v1068_v23, %v4210_v9  ;;  %v1467_v34 = vpack.c.bf16 %v1387_v22, %v1382_v30  ;;  %3307 = vmatpush3.bf16.msra.mxu0 %v3683_v7  ;;  %v3685_v30 = vld [vmem:[%s5007_s5 + $0x30] sm:$0xff]  }
 0x172   :  { %v1105_v5 = vpop.f32.mrf.mxu0  ;;  %v1114_v44 = vadd.f32 %v3454_v27, %v4347_v26 }
 0x173   :  { %v1390_v31 = vmax.f32 %v1069_v6, 0.0  ;;  %v1468_v32 = vpack.c.bf16 %v1388_v29, %v1383_v20  ;;  %v1469_v35 = vpack.c.bf16 %v1389_v10, %v1384_v21  ;;  %v1106_v36 = vadd.f32 %v1105_v5, %v4347_v26  ;;  %v3684_v5 = vld [vmem:[%s5007_s5 + $0x70] sm:$0xff]  }
 0x174   :  { %v3455_v33 = vpop.f32.mrf.mxu0  ;;  %v1246_v48 = vmax.f32 %v1114_v44, 0.0  ;;  %3308 = vmatprep.subr.bf16.mxu0 %v3684_v5 }
 0x175   :  { %2146 = vmatprep.mubr.bf16.mxu1 %v1468_v32  ;;  %v1470_v16 = vpack.c.bf16 %v1390_v31, %v1385_v28  ;;  %v1236_v9 = vmax.f32 %v1106_v36, 0.0  ;;  %v1117_v42 = vadd.f32 %v3455_v33, %v4347_v26  ;;  %3309 = vmatpush3.bf16.msra.mxu0 %v3685_v30 }
 0x176   :  { %v1108_v37 = vpop.f32.mrf.mxu0  ;;  %2147 = vmatmul.mubr.bf16.gmra.mxu1 %v1467_v34 }
 0x177   :  { %v1109_v19 = vadd.f32 %v1108_v37, %v4347_v26  ;;  %2339 = vmatprep.mubr.bf16.mxu0 %v1470_v16  ;;  %2382 = vmatprep.mubr.bf16.mxu1 %v3746_v0  ;;  %v1251_v46 = vmax.f32 %v1117_v42, 0.0  ;;  %v3687_v42 = vld [vmem:[%s5007_s5 + $0x28] sm:$0xff]  }
 0x178   :  { %v3458_v25 = vpop.f32.mrf.mxu0  ;;  %2340 = vmatmul.mubr.bf16.gmra.mxu0 %v1469_v35 }
 0x179   :  { %v1241_v38 = vmax.f32 %v1109_v19, 0.0  ;;  %v1401_v50 = vpack.c.bf16 %v1251_v46, %v1246_v48  ;;  %v1130_v60 = vadd.f32 %v3458_v25, %v4347_v26 }
 0x17a   :  { %v1121_v39 = vpop.f32.mrf.mxu0 }
 0x17b   :  { %v1396_v40 = vpack.c.bf16 %v1241_v38, %v1236_v9  ;;  %v1122_v51 = vadd.f32 %v1121_v39, %v4347_v26  ;;  %v1266_v11 = vmax.f32 %v1130_v60, 0.0 }
 0x17c   :  { %v3459_v41 = vpop.f32.mrf.mxu0 }
 0x17d   :  { %v1256_v55 = vmax.f32 %v1122_v51, 0.0  ;;  %v1133_v62 = vadd.f32 %v3459_v41, %v4347_v26  ;;  %v3686_v41 = vld [vmem:[%s5007_s5 + $0x68] sm:$0xff]   ;;  %v3689_v51 = vld [vmem:[%s5007_s5 + $0x20] sm:$0xff]  }
 0x17e   :  { %v1124_v43 = vpop.f32.mrf.mxu0  ;;  %2383 = vmatmul.mubr.bf16.vlgmr.msra.gmra.mxu1 %v1396_v40  ;;  %3310 = vmatprep.subr.bf16.mxu0 %v3686_v41 }
 0x17f   :  { %2392 = vmatprep.mubr.bf16.mxu1 %v3746_v0  ;;  %v1125_v52 = vadd.f32 %v1124_v43, %v4347_v26  ;;  %v1271_v12 = vmax.f32 %v1133_v62, 0.0  ;;  %3311 = vmatpush3.bf16.msra.mxu0 %v3687_v42 }
 0x180   :  { %v3462_v45 = vpop.f32.mrf.mxu0 }
 0x181   :  { %v1261_v56 = vmax.f32 %v1125_v52, 0.0  ;;  %v1411_v15 = vpack.c.bf16 %v1271_v12, %v1266_v11  ;;  %v1146_v28 = vadd.f32 %v3462_v45, %v4347_v26 }
 0x182   :  { %v1137_v47 = vpop.f32.mrf.mxu0 }
 0x183   :  { %v1406_v1 = vpack.c.bf16 %v1261_v56, %v1256_v55  ;;  %v1138_v17 = vadd.f32 %v1137_v47, %v4347_v26  ;;  %v1286_v31 = vmax.f32 %v1146_v28, 0.0  ;;  %v3690_v55 = vld [vmem:[%s5007_s5 + $0x58] sm:$0xff]  }
 0x184   :  { %v3463_v49 = vpop.f32.mrf.mxu0  ;;  %v3691_v56 = vld [vmem:[%s5007_s5 + $0x18] sm:$0xff]  }
 0x185   :  { %v1276_v22 = vmax.f32 %v1138_v17, 0.0  ;;  %v1149_v29 = vadd.f32 %v3463_v49, %v4347_v26  ;;  %v3695_v17 = vld [vmem:[%s5007_s5 + $0x8] sm:$0xff]  }
 0x186   :  { %v1140_v53 = vpop.f32.mrf.mxu0  ;;  %2393 = vmatmul.mubr.bf16.gmra.mxu1 %v1401_v50  ;;  %v3688_v50 = vld [vmem:[%s5007_s5 + $0x60] sm:$0xff]  }
 0x187   :  { %2402 = vmatprep.mubr.bf16.mxu1 %v3746_v0  ;;  %v1141_v18 = vadd.f32 %v1140_v53, %v4347_v26  ;;  %v1291_v32 = vmax.f32 %v1149_v29, 0.0  ;;  %3312 = vmatprep.subr.bf16.mxu0 %v3688_v50 }
 0x188   :  { %v3466_v54 = vpop.f32.mrf.mxu0  ;;  %3313 = vmatpush3.bf16.msra.mxu0 %v3689_v51 }
 0x189   :  { %v1281_v23 = vmax.f32 %v1141_v18, 0.0  ;;  %v1421_v34 = vpack.c.bf16 %v1291_v32, %v1286_v31  ;;  %v1162_v9 = vadd.f32 %v3466_v54, %v4347_v26  ;;  %3314 = vmatprep.subr.bf16.mxu0 %v3690_v55 }
 0x18a   :  { %v1153_v57 = vpop.f32.mrf.mxu0 }
 0x18b   :  { %v1416_v10 = vpack.c.bf16 %v1281_v23, %v1276_v22  ;;  %v1154_v35 = vadd.f32 %v1153_v57, %v4347_v26  ;;  %v1306_v43 = vmax.f32 %v1162_v9, 0.0 }
 0x18c   :  { %v3467_v58 = vpop.f32.mrf.mxu0  ;;  %3315 = vmatpush3.bf16.msra.mxu0 %v3691_v56 }
 0x18d   :  { %v1296_v37 = vmax.f32 %v1154_v35, 0.0  ;;  %v1165_v38 = vadd.f32 %v3467_v58, %v4347_v26 }
 0x18e   :  { %v1156_v3 = vpop.f32.mrf.mxu0  ;;  %2403 = vmatmul.mubr.bf16.gmra.mxu1 %v1406_v1 }
 0x18f   :  { %2412 = vmatprep.mubr.bf16.mxu1 %v3746_v0  ;;  %v1157_v36 = vadd.f32 %v1156_v3, %v4347_v26  ;;  %v1311_v44 = vmax.f32 %v1165_v38, 0.0  ;;  %v3692_v3 = vld [vmem:[%s5007_s5 + $0x50] sm:$0xff]  }
 0x190   :  { %v4368_v8 = vpop.f32.mrf.mxu0  ;;  %3316 = vmatprep.subr.bf16.mxu0 %v3692_v3 }
 0x191   :  { %v1301_v19 = vmax.f32 %v1157_v36, 0.0  ;;  %v1431_v46 = vpack.c.bf16 %v1311_v44, %v1306_v43  ;;  %v1178_v57 = vadd.f32 %v4368_v8, %v4347_v26  ;;  %3317 = vmatpush3.bf16.msra.mxu0 %v3693_v4 }
 0x192   :  { %v1169_v13 = vpop.f32.mrf.mxu0 }
 0x193   :  { %v1426_v39 = vpack.c.bf16 %v1301_v19, %v1296_v37  ;;  %v1170_v47 = vadd.f32 %v1169_v13, %v4347_v26  ;;  %v1326_v7 = vmax.f32 %v1178_v57, 0.0 }
 0x194   :  { %v4370_v14 = vpop.f32.mrf.mxu0 }
 0x195   :  { %v1316_v52 = vmax.f32 %v1170_v47, 0.0  ;;  %v1181_v58 = vadd.f32 %v4370_v14, %v4347_v26 }
 0x196   :  { %v1172_v20 = vpop.f32.mrf.mxu0  ;;  %2413 = vmatmul.mubr.bf16.gmra.mxu1 %v1411_v15  ;;  %v3694_v15 = vld [vmem:[%s5007_s5 + $0x48] sm:$0xff]  }
 0x197   :  { %2422 = vmatprep.mubr.bf16.mxu1 %v3746_v0  ;;  %v1173_v48 = vadd.f32 %v1172_v20, %v4347_v26  ;;  %v1331_v8 = vmax.f32 %v1181_v58, 0.0  ;;  %3318 = vmatprep.subr.bf16.mxu0 %v3694_v15 }
 0x198   :  { %v4375_v21 = vpop.f32.mrf.mxu0  ;;  %3319 = vmatpush3.bf16.msra.mxu0 %v3695_v17 }
 0x199   :  { %v1321_v53 = vmax.f32 %v1173_v48, 0.0  ;;  %v1441_v18 = vpack.c.bf16 %v1331_v8, %v1326_v7 }
 0x19a   :  { %v4377_v24 = vpop.f32.mrf.mxu0 }
 0x19b   :  { %v1436_v60 = vpack.c.bf16 %v1321_v53, %v1316_v52  ;;  %v1186_v20 = vadd.f32 %v4377_v24, %v4347_v26  ;;  %v3697_v24 = vld [vmem:[%s5007_s5] sm:$0xff]  }
 0x19c   :  { %v4379_v27 = vpop.f32.mrf.mxu0 }
 0x19d   :  { %v1197_v35 = vadd.f32 %v4379_v27, %v4347_v26 }
 0x19e   :  { %v4383_v6 = vpop.f32.mrf.mxu0  ;;  %2423 = vmatmul.mubr.bf16.gmra.mxu1 %v1416_v10  ;;  %v3696_v10 = vld [vmem:[%s5007_s5 + $0x40] sm:$0xff]  }
 0x19f   :  { %2432 = vmatprep.mubr.bf16.mxu1 %v3746_v0  ;;  %v1189_v22 = vadd.f32 %v4383_v6, %v4347_v26  ;;  %v1336_v6 = vmax.f32 %v1186_v20, 0.0  ;;  %3320 = vmatprep.subr.bf16.mxu0 %v3696_v10 }
 0x1a0   :  { %v4392_v33 = vpop.f32.mrf.mxu0  ;;  %3321 = vmatpush3.bf16.msra.mxu0 %v3697_v24 }
 0x1a1   :  { %v1341_v5 = vmax.f32 %v1189_v22, 0.0 }
 0x1a2   :  { %v4396_v16 = vpop.f32.mrf.mxu0 }
 0x1a3   :  { %v1446_v36 = vpack.c.bf16 %v1341_v5, %v1336_v6  ;;  %v1202_v27 = vadd.f32 %v4396_v16, %v4347_v26  ;;  %v1210_v16 = vadd.f32 %v4392_v33, %v4347_v26 }
 0x1a4   :  { %v4399_v25 = vpop.f32.mrf.mxu0 }
 0x1a5   :  { %v1356_v50 = vmax.f32 %v1202_v27, 0.0  ;;  %v1366_v3 = vmax.f32 %v1210_v16, 0.0 }
 0x1a6   :  { %2433 = vmatmul.mubr.bf16.gmra.mxu1 %v1421_v34  ;;  %v4403_v40 = vpop.f32.mrf.mxu0  ;;  %v1194_v34 = vadd.f32 %v4375_v21, %v4347_v26 }
 0x1a7   :  { %2442 = vmatprep.mubr.bf16.mxu1 %v3746_v0  ;;  %v1205_v44 = vadd.f32 %v4403_v40, %v4347_v26  ;;  %v1213_v40 = vadd.f32 %v4399_v25, %v4347_v26 }
 0x1a8   :  { %v4412_v45 = vpop.f32.mrf.mxu0  ;;  %v1346_v38 = vmax.f32 %v1194_v34, 0.0 }
 0x1a9   :  { %v1361_v51 = vmax.f32 %v1205_v44, 0.0  ;;  %v1371_v4 = vmax.f32 %v1213_v40, 0.0 }
 0x1aa   :  { %v4416_v49 = vpop.f32.mrf.mxu0 }
 0x1ab   :  { %v1456_v56 = vpack.c.bf16 %v1361_v51, %v1356_v50  ;;  %v1461_v15 = vpack.c.bf16 %v1371_v4, %v1366_v3  ;;  %v1218_v25 = vadd.f32 %v4416_v49, %v4347_v26  ;;  %v1226_v49 = vadd.f32 %v4412_v45, %v4347_v26 }
 0x1ac   :  { %v4425_v54 = vpop.f32.mrf.mxu0 }
 0x1ad   :  { %v1376_v10 = vmax.f32 %v1218_v25, 0.0 }
 0x1ae   :  { %2443 = vmatmul.mubr.bf16.gmra.mxu1 %v1426_v39  ;;  %v4437_v62 = vpop.f32.mrf.mxu0  ;;  %v1351_v39 = vmax.f32 %v1197_v35, 0.0 }
 0x1af   :  { %2452 = vmatprep.mubr.bf16.mxu1 %v3746_v0  ;;  %v1221_v17 = vadd.f32 %v4437_v62, %v4347_v26  ;;  %v1229_v62 = vadd.f32 %v4425_v54, %v4347_v26 }
 0x1b0   :  { %v1451_v43 = vpack.c.bf16 %v1351_v39, %v1346_v38 }
 0x1b1   :  { %v1381_v24 = vmax.f32 %v1221_v17, 0.0  ;;  %v1391_v27 = vmax.f32 %v1229_v62, 0.0 }
 0x1b3   :  { %v1466_v35 = vpack.c.bf16 %v1381_v24, %v1376_v10 }
 0x1b6   :  { %2453 = vmatmul.mubr.bf16.gmra.mxu1 %v1431_v46 }
 0x1b7   :  { %2462 = vmatprep.mubr.bf16.mxu1 %v3746_v0 }
 0x1be   :  { %v4439_v1 = vpop.f32.mrf.mxu1  ;;  %2463 = vmatmul.mubr.bf16.gmra.mxu1 %v1436_v60 }
 0x1bf   :  { %2472 = vmatprep.mubr.bf16.mxu1 %v3746_v0 }
 0x1c0   :  { %v4448_v11 = vpop.f32.mrf.mxu1  ;;  %v4450_v12 = vpop.f32.mrf.mxu0 }
 0x1c2   :  { %v4452_v13 = vpop.f32.mrf.mxu1  ;;  %v4454_v14 = vpop.f32.mrf.mxu0 }
 0x1c4   :  { %v4466_v23 = vpop.f32.mrf.mxu1  ;;  %v4468_v28 = vpop.f32.mrf.mxu0 }
 0x1c6   :  { %v4470_v29 = vpop.f32.mrf.mxu1  ;;  %2473 = vmatmul.mubr.bf16.gmra.mxu1 %v1441_v18  ;;  %v4479_v30 = vpop.f32.mrf.mxu0 }
 0x1c7   :  { %2482 = vmatprep.mubr.bf16.mxu1 %v3746_v0 }
 0x1c8   :  { %v4481_v31 = vpop.f32.mrf.mxu1  ;;  %v4489_v37 = vpop.f32.mrf.mxu0 }
 0x1ca   :  { %v4483_v32 = vpop.f32.mrf.mxu1  ;;  %v4496_v41 = vpop.f32.mrf.mxu0 }
 0x1cc   :  { %v4491_v19 = vpop.f32.mrf.mxu1  ;;  %v4506_v46 = vpop.f32.mrf.mxu0 }
 0x1ce   :  { %v4493_v9 = vpop.f32.mrf.mxu1  ;;  %2483 = vmatmul.mubr.bf16.gmra.mxu1 %v1446_v36  ;;  %v4513_v52 = vpop.f32.mrf.mxu0 }
 0x1cf   :  { %2492 = vmatprep.mubr.bf16.mxu1 %v3746_v0 }
 0x1d0   :  { %v4498_v42 = vpop.f32.mrf.mxu1  ;;  %v4523_v57 = vpop.f32.mrf.mxu0 }
 0x1d2   :  { %v4500_v21 = vpop.f32.mrf.mxu1  ;;  %v4530_v7 = vpop.f32.mrf.mxu0 }
 0x1d4   :  { %v4508_v47 = vpop.f32.mrf.mxu1  ;;  %v4540_v18 = vpop.f32.mrf.mxu0 }
 0x1d6   :  { %v4510_v48 = vpop.f32.mrf.mxu1  ;;  %2493 = vmatmul.mubr.bf16.gmra.mxu1 %v1451_v43  ;;  %v4547_v6 = vpop.f32.mrf.mxu0  ;;  %v1386_v43 = vmax.f32 %v1226_v49, 0.0 }
 0x1d7   :  { %2502 = vmatprep.mubr.bf16.mxu1 %v3746_v0 }
 0x1d8   :  { %v4515_v53 = vpop.f32.mrf.mxu1  ;;  %v4557_v36 = vpop.f32.mrf.mxu0  ;;  %v1471_v51 = vpack.c.bf16 %v1391_v27, %v1386_v43 }
 0x1da   :  { %v4517_v55 = vpop.f32.mrf.mxu1  ;;  %v4564_v44 = vpop.f32.mrf.mxu0 }
 0x1dc   :  { %v4525_v58 = vpop.f32.mrf.mxu1  ;;  %v4570_v26 = vpop.f32.mrf.mxu0 }
 0x1de   :  { %v4527_v60 = vpop.f32.mrf.mxu1  ;;  %2503 = vmatmul.mubr.bf16.gmra.mxu1 %v1456_v56  ;;  %v4576_v40 = vpop.f32.mrf.mxu0 }
 0x1df   :  { %2512 = vmatprep.mubr.bf16.mxu1 %v3746_v0 }
 0x1e0   :  { %v4532_v8 = vpop.f32.mrf.mxu1  ;;  %v4582_v3 = vpop.f32.mrf.mxu0 }
 0x1e2   :  { %v4534_v33 = vpop.f32.mrf.mxu1  ;;  %v4588_v25 = vpop.f32.mrf.mxu0 }
 0x1e4   :  { %v4542_v20 = vpop.f32.mrf.mxu1  ;;  %v4594_v24 = vpop.f32.mrf.mxu0 }
 0x1e6   :  { %v4544_v22 = vpop.f32.mrf.mxu1  ;;  %2513 = vmatmul.mubr.bf16.gmra.mxu1 %v1461_v15 }
 0x1e7   :  { %2522 = vmatprep.mubr.bf16.mxu1 %v3746_v0 }
 0x1e8   :  { %v4549_v5 = vpop.f32.mrf.mxu1 }
 0x1ea   :  { %v4551_v34 = vpop.f32.mrf.mxu1 }
 0x1ec   :  { %v4559_v38 = vpop.f32.mrf.mxu1 }
 0x1ee   :  { %v4561_v39 = vpop.f32.mrf.mxu1  ;;  %2523 = vmatmul.mubr.bf16.gmra.mxu1 %v1466_v35  ;;  %v4600_v35 = vpop.f32.mrf.mxu0 }
 0x1ef   :  { %2532 = vmatprep.mubr.bf16.mxu1 %v3746_v0 }
 0x1f0   :  { %v4566_v50 = vpop.f32.mrf.mxu1 }
 0x1f1   :  { %5017 = vst [vmem:[#allocation11_spill] sm:$0xff] %v4566_v50 }
 0x1f2   :  { %v4568_v45 = vpop.f32.mrf.mxu1 }
 0x1f3   :  { %5018 = vst [vmem:[#allocation12_spill] sm:$0xff] %v4568_v45 }
 0x1f4   :  { %v4572_v54 = vpop.f32.mrf.mxu1 }
 0x1f5   :  { %5019 = vst [vmem:[#allocation13_spill] sm:$0xff] %v4572_v54 }
 0x1f6   :  { %v4574_v16 = vpop.f32.mrf.mxu1  ;;  %2533 = vmatmul.mubr.bf16.gmra.mxu1 %v1471_v51  ;;  %v4606_v51 = vpop.f32.mrf.mxu0 }
 0x1f7   :  { %5020 = vst [vmem:[#allocation14_spill] sm:$0xff] %v4574_v16 }
 0x1f8   :  { %v4578_v56 = vpop.f32.mrf.mxu1  ;;  %v4612_v2 = vpop.f32.mrf.mxu0 }
 0x1f9   :  { %5021 = vst [vmem:[#allocation15_spill] sm:$0xff] %v4578_v56 }
 0x1fa   :  { %v4580_v0 = vpop.f32.mrf.mxu1 }
 0x1fb   :  { %5022 = vst [vmem:[#allocation16_spill] sm:$0xff] %v4580_v0 }
 0x1fc   :  { %v4584_v4 = vpop.f32.mrf.mxu1 }
 0x1fd   :  { %5023 = vst [vmem:[#allocation17_spill] sm:$0xff] %v4584_v4 }
 0x1fe   :  { %v4586_v15 = vpop.f32.mrf.mxu1 }
 0x1ff   :  { %5024 = vst [vmem:[#allocation18_spill] sm:$0xff] %v4586_v15 }
 0x200   :  { %v4590_v17 = vpop.f32.mrf.mxu1 }
 0x201   :  { %5025 = vst [vmem:[#allocation19_spill] sm:$0xff] %v4590_v17 }
 0x202   :  { %v4592_v10 = vpop.f32.mrf.mxu1 }
 0x203   :  { %5026 = vst [vmem:[#allocation20_spill] sm:$0xff] %v4592_v10 }
 0x204   :  { %v4596_v49 = vpop.f32.mrf.mxu1 }
 0x205   :  { %5027 = vst [vmem:[#allocation21_spill] sm:$0xff] %v4596_v49  ;;  %v4618_v49 = vpop.f32.mrf.mxu0 }
 0x206   :  { %v4598_v62 = vpop.f32.mrf.mxu1 }
 0x207   :  { %5028 = vst [vmem:[#allocation22_spill] sm:$0xff] %v4598_v62 }
 0x208   :  { %v4602_v43 = vpop.f32.mrf.mxu1 }
 0x209   :  { %5029 = vst [vmem:[#allocation23_spill] sm:$0xff] %v4602_v43  ;;  %v4624_v43 = vpop.f32.mrf.mxu0 }
 0x20a   :  { %v4604_v27 = vpop.f32.mrf.mxu1 }
 0x20b   :  { %5030 = vst [vmem:[#allocation24_spill] sm:$0xff] %v4604_v27 }
 0x20c   :  { %v4608_v59 = vpop.f32.mrf.mxu1 }
 0x20d   :  { %5031 = vst [vmem:[#allocation25_spill] sm:$0xff] %v4608_v59  ;;  %v4630_v59 = vpop.f32.mrf.mxu0 }
 0x20e   :  { %v4610_v63 = vpop.f32.mrf.mxu1  ;;  %5039 = vst [vmem:[#allocation33_spill] sm:$0xff] %v4630_v59 }
 0x20f   :  { %5032 = vst [vmem:[#allocation26_spill] sm:$0xff] %v4610_v63 }
 0x210   :  { %v4614_v10 = vpop.f32.mrf.mxu1 }
 0x211   :  { %5033 = vst [vmem:[#allocation27_spill] sm:$0xff] %v4614_v10  ;;  %v4636_v10 = vpop.f32.mrf.mxu0 }
 0x212   :  { %v4616_v17 = vpop.f32.mrf.mxu1  ;;  %5042 = vst [vmem:[#allocation36_spill] sm:$0xff] %v4636_v10 }
 0x213   :  { %5034 = vst [vmem:[#allocation28_spill] sm:$0xff] %v4616_v17 }
 0x214   :  { %v4620_v62 = vpop.f32.mrf.mxu1 }
 0x215   :  { %5035 = vst [vmem:[#allocation29_spill] sm:$0xff] %v4620_v62  ;;  %v4642_v62 = vpop.f32.mrf.mxu0 }
 0x216   :  { %v4622_v15 = vpop.f32.mrf.mxu1  ;;  %5045 = vst [vmem:[#allocation39_spill] sm:$0xff] %v4642_v62 }
 0x217   :  { %5036 = vst [vmem:[#allocation30_spill] sm:$0xff] %v4622_v15 }
 0x218   :  { %v4626_v27 = vpop.f32.mrf.mxu1 }
 0x219   :  { %5037 = vst [vmem:[#allocation31_spill] sm:$0xff] %v4626_v27  ;;  %v4648_v27 = vpop.f32.mrf.mxu0 }
 0x21a   :  { %v4628_v4 = vpop.f32.mrf.mxu1  ;;  %5048 = vst [vmem:[#allocation42_spill] sm:$0xff] %v4648_v27 }
 0x21b   :  { %5038 = vst [vmem:[#allocation32_spill] sm:$0xff] %v4628_v4 }
 0x21c   :  { %v4632_v63 = vpop.f32.mrf.mxu1 }
 0x21d   :  { %5040 = vst [vmem:[#allocation34_spill] sm:$0xff] %v4632_v63  ;;  %v4654_v63 = vpop.f32.mrf.mxu0 }
 0x21e   :  { %v4634_v0 = vpop.f32.mrf.mxu1  ;;  %5051 = vst [vmem:[#allocation45_spill] sm:$0xff] %v4654_v63 }
 0x21f   :  { %5041 = vst [vmem:[#allocation35_spill] sm:$0xff] %v4634_v0 }
 0x220   :  { %v4638_v17 = vpop.f32.mrf.mxu1 }
 0x221   :  { %5043 = vst [vmem:[#allocation37_spill] sm:$0xff] %v4638_v17  ;;  %v4660_v17 = vpop.f32.mrf.mxu0 }
 0x222   :  { %v4640_v56 = vpop.f32.mrf.mxu1  ;;  %5054 = vst [vmem:[#allocation48_spill] sm:$0xff] %v4660_v17 }
 0x223   :  { %5044 = vst [vmem:[#allocation38_spill] sm:$0xff] %v4640_v56 }
 0x224   :  { %v4644_v15 = vpop.f32.mrf.mxu1 }
 0x225   :  { %5046 = vst [vmem:[#allocation40_spill] sm:$0xff] %v4644_v15  ;;  %v4669_v15 = vpop.f32.mrf.mxu0 }
 0x226   :  { %v4646_v16 = vpop.f32.mrf.mxu1  ;;  %5057 = vst [vmem:[#allocation51_spill] sm:$0xff] %v4669_v15 }
 0x227   :  { %5047 = vst [vmem:[#allocation41_spill] sm:$0xff] %v4646_v16  ;;  %v1552_v16 = vld [vmem:[%s5006_s4] sm:$0x3] }
 0x228   :  { %v4650_v4 = vpop.f32.mrf.mxu1 }
 0x229   :  { %5049 = vst [vmem:[#allocation43_spill] sm:$0xff] %v4650_v4 }
 0x22a   :  { %v4652_v54 = vpop.f32.mrf.mxu1 }
 0x22b   :  { %5050 = vst [vmem:[#allocation44_spill] sm:$0xff] %v4652_v54 }
 0x22c   :  { %v4656_v0 = vpop.f32.mrf.mxu1 }
 0x22d   :  { %5052 = vst [vmem:[#allocation46_spill] sm:$0xff] %v4656_v0  ;;  %v5060_v0 = vsub.s32 0, %v4195_v61 }
 0x22e   :  { %v4658_v10 = vpop.f32.mrf.mxu1 }
 0x22f   :  { %5053 = vst [vmem:[#allocation47_spill] sm:$0xff] %v4658_v10  ;;  %v4677_v63 = vrot.slane %v1552_v16, %v5060_v0  ;;  %v4679_v10 = vpop.f32.mrf.mxu0 }
 0x230   :  { %v4662_v56 = vpop.f32.mrf.mxu1  ;;  %5061 = vst [vmem:[#allocation54_spill] sm:$0xff] %v4679_v10 }
 0x231   :  { %5055 = vst [vmem:[#allocation49_spill] sm:$0xff] %v4662_v56  ;;  %v1999_v15 = vadd.f32 %v4439_v1, %v4677_v63  ;;  %v2003_v10 = vadd.f32 %v4452_v13, %v4677_v63 }
 0x232   :  { %v4664_v62 = vpop.f32.mrf.mxu1 }
 0x233   :  { %5056 = vst [vmem:[#allocation50_spill] sm:$0xff] %v4664_v62  ;;  %v5063_v62 = vsub.s32 1, %v4195_v61  ;;  %v2192_v61 = vadd.f32 %v4450_v12, %v1999_v15 }
 0x234   :  { %v4671_v4 = vpop.f32.mrf.mxu1 }
 0x235   :  { %5058 = vst [vmem:[#allocation52_spill] sm:$0xff] %v4671_v4  ;;  %v4685_v56 = vrot.slane %v1552_v16, %v5063_v62  ;;  %v4691_v4 = vpop.f32.mrf.mxu0 }
 0x236   :  { %v4673_v54 = vpop.f32.mrf.mxu1  ;;  %5065 = vst [vmem:[#allocation57_spill] sm:$0xff] %v4691_v4  ;;  %v2196_v4 = vadd.f32 %v4468_v28, %v2003_v10 }
 0x237   :  { %5059 = vst [vmem:[#allocation53_spill] sm:$0xff] %v4673_v54  ;;  %v2001_v0 = vadd.f32 %v4448_v11, %v4685_v56  ;;  %v2005_v16 = vadd.f32 %v4466_v23, %v4685_v56  ;;  %v4702_v62 = vpop.f32.mrf.mxu0  ;;  %v2009_v11 = vadd.f32 %v4470_v29, %v4677_v63  ;;  %v2011_v12 = vadd.f32 %v4481_v31, %v4685_v56 }
 0x238   :  { %v4681_v17 = vpop.f32.mrf.mxu1 }
 0x239   :  { %5062 = vst [vmem:[#allocation55_spill] sm:$0xff] %v4681_v17  ;;  %v2194_v1 = vadd.f32 %v4454_v14, %v2001_v0  ;;  %v2198_v13 = vadd.f32 %v4479_v30, %v2005_v16  ;;  %v4711_v23 = vpop.f32.mrf.mxu0  ;;  %v2013_v14 = vadd.f32 %v4483_v32, %v4677_v63  ;;  %v2015_v30 = vadd.f32 %v4491_v19, %v4685_v56 }
 0x23a   :  { %v4687_v27 = vpop.f32.mrf.mxu1  ;;  %v2204_v16 = vadd.f32 %v4496_v41, %v2011_v12  ;;  %v2023_v41 = vadd.f32 %v4500_v21, %v4677_v63 }
 0x23b   :  { %5064 = vst [vmem:[#allocation56_spill] sm:$0xff] %v4687_v27 }
 0x23c   :  { %v4693_v54 = vpop.f32.mrf.mxu1 }
 0x23d   :  { %5066 = vst [vmem:[#allocation58_spill] sm:$0xff] %v4693_v54 }
 0x23e   :  { %v2384_v17 = vpop.f32.mrf.mxu1 }
 0x23f   :  { %v2385_v54 = vadd.f32 %v2384_v17, %v2192_v61  ;;  %v2202_v17 = vadd.f32 %v4489_v37, %v2009_v11  ;;  %v2208_v11 = vadd.f32 %v4513_v52, %v2015_v30  ;;  %v2025_v52 = vadd.f32 %v4508_v47, %v4685_v56 }
 0x240   :  { %v2386_v27 = vpop.f32.mrf.mxu1 }
 0x241   :  { %v2387_v45 = vadd.f32 %v2386_v27, %v2194_v1  ;;  %v2543_v0 = vmax.f32 %v2385_v54, 0.0  ;;  %v4718_v27 = vpop.f32.mrf.mxu0  ;;  %v2206_v1 = vadd.f32 %v4506_v46, %v2013_v14 }
 0x242   :  { %v2388_v59 = vpop.f32.mrf.mxu1 }
 0x243   :  { %v2389_v50 = vadd.f32 %v2388_v59, %v2196_v4  ;;  %v2544_v10 = vmax.f32 %v2387_v45, 0.0  ;;  %v2021_v45 = vadd.f32 %v4498_v42, %v4685_v56 }
 0x244   :  { %v2390_v15 = vpop.f32.mrf.mxu1 }
 0x245   :  { %v2545_v28 = vmax.f32 %v2389_v50, 0.0  ;;  %v2391_v61 = vadd.f32 %v2390_v15, %v2198_v13  ;;  %v2019_v50 = vadd.f32 %v4493_v9, %v4677_v63  ;;  %v4727_v15 = vpop.f32.mrf.mxu0 }
 0x246   :  { %v2394_v29 = vpop.f32.mrf.mxu1 }
 0x247   :  { %v2607_v59 = vpack.c.bf16 %v2545_v28, %v2543_v0  ;;  %v2546_v4 = vmax.f32 %v2391_v61, 0.0  ;;  %v2395_v54 = vadd.f32 %v2394_v29, %v2202_v17  ;;  %v2212_v9 = vadd.f32 %v4523_v57, %v2019_v50  ;;  %v4734_v42 = vpop.f32.mrf.mxu0 }
 0x248   :  { %v2396_v31 = vpop.f32.mrf.mxu1 }
 0x249   :  { %v2608_v32 = vpack.c.bf16 %v2546_v4, %v2544_v10  ;;  %v2397_v13 = vadd.f32 %v2396_v31, %v2204_v16  ;;  %v2547_v46 = vmax.f32 %v2395_v54, 0.0  ;;  %v2214_v10 = vadd.f32 %v4530_v7, %v2021_v45  ;;  %v4743_v54 = vpop.f32.mrf.mxu0 }
 0x24a   :  { %v2398_v37 = vpop.f32.mrf.mxu1  ;;  %v2029_v31 = vadd.f32 %v4510_v48, %v4677_v63  ;;  %v2218_v16 = vadd.f32 %v4547_v6, %v2025_v52  ;;  %v2033_v7 = vadd.f32 %v4517_v55, %v4677_v63  ;;  %v2035_v6 = vadd.f32 %v4525_v58, %v4685_v56 }
 0x24b   :  { %v2399_v19 = vadd.f32 %v2398_v37, %v2206_v1  ;;  %2806 = vmatprep.mubr.bf16.mxu0 %v2608_v32  ;;  %v2548_v61 = vmax.f32 %v2397_v13, 0.0  ;;  %v2031_v32 = vadd.f32 %v4515_v53, %v4685_v56  ;;  %v4750_v53 = vpop.f32.mrf.mxu0 }
 0x24c   :  { %v2400_v0 = vpop.f32.mrf.mxu1  ;;  %2807 = vmatmul.mubr.bf16.vlgmr.msra.gmra.mxu0 %v2607_v59  ;;  %v2216_v59 = vadd.f32 %v4540_v18, %v2023_v41  ;;  %v2222_v48 = vadd.f32 %v4557_v36, %v2029_v31 }
 0x24d   :  { %v2549_v12 = vmax.f32 %v2399_v19, 0.0  ;;  %v2401_v14 = vadd.f32 %v2400_v0, %v2208_v11 }
 0x24e   :  { %v2404_v28 = vpop.f32.mrf.mxu1 }
 0x24f   :  { %v2609_v17 = vpack.c.bf16 %v2549_v12, %v2547_v46  ;;  %v2550_v29 = vmax.f32 %v2401_v14, 0.0  ;;  %v2405_v4 = vadd.f32 %v2404_v28, %v2212_v9  ;;  %v2224_v46 = vadd.f32 %v4564_v44, %v2031_v32 }
 0x250   :  { %v2406_v30 = vpop.f32.mrf.mxu1  ;;  %v2226_v12 = vadd.f32 %v4570_v26, %v2033_v7  ;;  %v2039_v9 = vadd.f32 %v4527_v60, %v4677_v63  ;;  %v2228_v28 = vadd.f32 %v4576_v40, %v2035_v6  ;;  %v2043_v44 = vadd.f32 %v4534_v33, %v4677_v63 }
 0x251   :  { %v2610_v21 = vpack.c.bf16 %v2550_v29, %v2548_v61  ;;  %v2407_v1 = vadd.f32 %v2406_v30, %v2214_v10  ;;  %v2551_v18 = vmax.f32 %v2405_v4, 0.0  ;;  %v2041_v61 = vadd.f32 %v4532_v8, %v4685_v56 }
 0x252   :  { %v2408_v57 = vpop.f32.mrf.mxu1  ;;  %v2232_v60 = vadd.f32 %v4582_v3, %v2039_v9  ;;  %v2045_v40 = vadd.f32 %v4542_v20, %v4685_v56  ;;  %v2049_v32 = vadd.f32 %v4544_v22, %v4677_v63 }
 0x253   :  { %v2409_v47 = vadd.f32 %v2408_v57, %v2216_v59  ;;  %2814 = vmatprep.mubr.bf16.mxu0 %v2610_v21  ;;  %v2552_v19 = vmax.f32 %v2407_v1, 0.0  ;;  %v2236_v1 = vadd.f32 %v4594_v24, %v2043_v44 }
 0x254   :  { %v2410_v50 = vpop.f32.mrf.mxu1  ;;  %2815 = vmatmul.mubr.bf16.gmra.mxu0 %v2609_v17  ;;  %v4759_v17 = vpop.f32.mrf.mxu0  ;;  %v2242_v22 = vadd.f32 %v4606_v51, %v2049_v32 }
 0x255   :  { %v2553_v37 = vmax.f32 %v2409_v47, 0.0  ;;  %v2411_v11 = vadd.f32 %v2410_v50, %v2218_v16  ;;  %v2234_v16 = vadd.f32 %v4588_v25, %v2041_v61  ;;  %v2238_v50 = vadd.f32 %v4600_v35, %v2045_v40 }
 0x256   :  { %v2414_v13 = vpop.f32.mrf.mxu1  ;;  %v4766_v8 = vpop.f32.mrf.mxu0  ;;  %v2053_v25 = vadd.f32 %v4551_v34, %v4677_v63  ;;  %v2055_v35 = vadd.f32 %v4559_v38, %v4685_v56 }
 0x257   :  { %v2611_v45 = vpack.c.bf16 %v2553_v37, %v2551_v18  ;;  %v2554_v0 = vmax.f32 %v2411_v11, 0.0  ;;  %v2415_v14 = vadd.f32 %v2414_v13, %v2222_v48  ;;  %v2051_v18 = vadd.f32 %v4549_v5, %v4685_v56 }
 0x258   :  { %v2416_v41 = vpop.f32.mrf.mxu1  ;;  %v4775_v37 = vpop.f32.mrf.mxu0  ;;  %v2248_v9 = vadd.f32 %v4624_v43, %v2055_v35  ;;  %v5070_v43 = vld [vmem:[#allocation13_spill] sm:$0xff] }
 0x259   :  { %v2612_v55 = vpack.c.bf16 %v2554_v0, %v2552_v19  ;;  %v2417_v52 = vadd.f32 %v2416_v41, %v2224_v46  ;;  %v2555_v26 = vmax.f32 %v2415_v14, 0.0  ;;  %v2244_v46 = vadd.f32 %v4612_v2, %v2051_v18  ;;  %v5068_v2 = vld [vmem:[#allocation12_spill] sm:$0xff] }
 0x25a   :  { %v2418_v36 = vpop.f32.mrf.mxu1  ;;  %v4782_v5 = vpop.f32.mrf.mxu0  ;;  %v2059_v14 = vadd.f32 %v4561_v39, %v4677_v63  ;;  %v5069_v39 = vld [vmem:[#allocation33_spill] sm:$0xff] }
 0x25b   :  { %v2419_v58 = vadd.f32 %v2418_v36, %v2226_v12  ;;  %2822 = vmatprep.mubr.bf16.mxu0 %v2612_v55  ;;  %v2556_v21 = vmax.f32 %v2417_v52, 0.0  ;;  %v2246_v12 = vadd.f32 %v4618_v49, %v2053_v25  ;;  %v2063_v49 = vadd.f32 %v5068_v2, %v4677_v63 }
 0x25c   :  { %v2420_v29 = vpop.f32.mrf.mxu1  ;;  %2823 = vmatmul.mubr.bf16.gmra.mxu0 %v2611_v45 }
 0x25d   :  { %v2557_v30 = vmax.f32 %v2419_v58, 0.0  ;;  %v2421_v10 = vadd.f32 %v2420_v29, %v2228_v28  ;;  %v5067_v28 = vld [vmem:[#allocation11_spill] sm:$0xff]  ;;  %v4791_v58 = vpop.f32.mrf.mxu0 }
 0x25e   :  { %v2424_v59 = vpop.f32.mrf.mxu1  ;;  %v2061_v52 = vadd.f32 %v5067_v28, %v4685_v56  ;;  %v5079_v28 = vld [vmem:[#allocation48_spill] sm:$0xff] }
 0x25f   :  { %v2613_v4 = vpack.c.bf16 %v2557_v30, %v2555_v26  ;;  %v2558_v31 = vmax.f32 %v2421_v10, 0.0  ;;  %v2425_v47 = vadd.f32 %v2424_v59, %v2232_v60  ;;  %v2252_v30 = vadd.f32 %v5069_v39, %v2059_v14 }
 0x260   :  { %v2426_v57 = vpop.f32.mrf.mxu1  ;;  %v2065_v60 = vadd.f32 %v5070_v43, %v4685_v56 }
 0x261   :  { %v2614_v33 = vpack.c.bf16 %v2558_v31, %v2556_v21  ;;  %v2427_v7 = vadd.f32 %v2426_v57, %v2234_v16  ;;  %v2559_v24 = vmax.f32 %v2425_v47, 0.0  ;;  %v5071_v57 = vld [vmem:[#allocation36_spill] sm:$0xff] }
 0x262   :  { %v2428_v3 = vpop.f32.mrf.mxu1  ;;  %v2254_v16 = vadd.f32 %v5071_v57, %v2061_v52  ;;  %v5084_v57 = vld [vmem:[#allocation20_spill] sm:$0xff] }
 0x263   :  { %v2429_v20 = vadd.f32 %v2428_v3, %v2236_v1  ;;  %2830 = vmatprep.mubr.bf16.mxu0 %v2614_v33  ;;  %v2560_v19 = vmax.f32 %v2427_v7, 0.0  ;;  %v5072_v1 = vld [vmem:[#allocation39_spill] sm:$0xff]  ;;  %v5073_v3 = vld [vmem:[#allocation14_spill] sm:$0xff] }
 0x264   :  { %v2430_v11 = vpop.f32.mrf.mxu1  ;;  %2831 = vmatmul.mubr.bf16.gmra.mxu0 %v2613_v4  ;;  %v4798_v4 = vpop.f32.mrf.mxu0  ;;  %v2256_v33 = vadd.f32 %v5072_v1, %v2063_v49 }
 0x265   :  { %v2561_v48 = vmax.f32 %v2429_v20, 0.0  ;;  %v2431_v13 = vadd.f32 %v2430_v11, %v2238_v50  ;;  %v2069_v50 = vadd.f32 %v5073_v3, %v4677_v63  ;;  %v5074_v20 = vld [vmem:[#allocation42_spill] sm:$0xff] }
 0x266   :  { %v2434_v6 = vpop.f32.mrf.mxu1  ;;  %v2258_v18 = vadd.f32 %v5074_v20, %v2065_v60 }
 0x267   :  { %v2615_v45 = vpack.c.bf16 %v2561_v48, %v2559_v24  ;;  %v2562_v0 = vmax.f32 %v2431_v13, 0.0  ;;  %v2435_v55 = vadd.f32 %v2434_v6, %v2242_v22  ;;  %v5075_v24 = vld [vmem:[#allocation15_spill] sm:$0xff]  ;;  %v4807_v13 = vpop.f32.mrf.mxu0  ;;  %v5076_v6 = vld [vmem:[#allocation16_spill] sm:$0xff] }
 0x268   :  { %v2436_v41 = vpop.f32.mrf.mxu1  ;;  %v2071_v48 = vadd.f32 %v5075_v24, %v4685_v56  ;;  %v2073_v35 = vadd.f32 %v5076_v6, %v4677_v63 }
 0x269   :  { %v2616_v34 = vpack.c.bf16 %v2562_v0, %v2560_v19  ;;  %v2437_v36 = vadd.f32 %v2436_v41, %v2244_v46  ;;  %v2563_v29 = vmax.f32 %v2435_v55, 0.0  ;;  %v5077_v41 = vld [vmem:[#allocation45_spill] sm:$0xff] }
 0x26a   :  { %v2438_v51 = vpop.f32.mrf.mxu1  ;;  %v2262_v46 = vadd.f32 %v5077_v41, %v2069_v50  ;;  %v2264_v52 = vadd.f32 %v5079_v28, %v2071_v48 }
 0x26b   :  { %v2439_v38 = vadd.f32 %v2438_v51, %v2246_v12  ;;  %2838 = vmatprep.mubr.bf16.mxu0 %v2616_v34  ;;  %v2564_v59 = vmax.f32 %v2437_v36, 0.0  ;;  %v5078_v34 = vld [vmem:[#allocation17_spill] sm:$0xff]  ;;  %v4814_v36 = vpop.f32.mrf.mxu0 }
 0x26c   :  { %v2440_v61 = vpop.f32.mrf.mxu1  ;;  %2839 = vmatmul.mubr.bf16.gmra.mxu0 %v2615_v45  ;;  %v2075_v55 = vadd.f32 %v5078_v34, %v4685_v56 }
 0x26d   :  { %v2565_v44 = vmax.f32 %v2439_v38, 0.0  ;;  %v2441_v26 = vadd.f32 %v2440_v61, %v2248_v9  ;;  %v5080_v61 = vld [vmem:[#allocation51_spill] sm:$0xff] }
 0x26e   :  { %v2444_v10 = vpop.f32.mrf.mxu1  ;;  %v2266_v2 = vadd.f32 %v5080_v61, %v2073_v35 }
 0x26f   :  { %v2617_v40 = vpack.c.bf16 %v2565_v44, %v2563_v29  ;;  %v2566_v21 = vmax.f32 %v2441_v26, 0.0  ;;  %v2445_v32 = vadd.f32 %v2444_v10, %v2252_v30  ;;  %v5081_v44 = vld [vmem:[#allocation18_spill] sm:$0xff] }
 0x270   :  { %v2446_v31 = vpop.f32.mrf.mxu1  ;;  %v2079_v26 = vadd.f32 %v5081_v44, %v4677_v63  ;;  %v5082_v30 = vld [vmem:[#allocation54_spill] sm:$0xff] }
 0x271   :  { %v2618_v47 = vpack.c.bf16 %v2566_v21, %v2564_v59  ;;  %v2447_v11 = vadd.f32 %v2446_v31, %v2254_v16  ;;  %v2567_v19 = vmax.f32 %v2445_v32, 0.0  ;;  %v2268_v10 = vadd.f32 %v5082_v30, %v2075_v55  ;;  %v5083_v59 = vld [vmem:[#allocation19_spill] sm:$0xff]  ;;  %v4823_v21 = vpop.f32.mrf.mxu0  ;;  %v5085_v32 = vld [vmem:[#allocation57_spill] sm:$0xff] }
 0x272   :  { %v2448_v7 = vpop.f32.mrf.mxu1  ;;  %v2083_v16 = vadd.f32 %v5084_v57, %v4677_v63  ;;  %v2272_v3 = vadd.f32 %v5085_v32, %v2079_v26  ;;  %v5088_v55 = vld [vmem:[#allocation23_spill] sm:$0xff] }
 0x273   :  { %v2449_v25 = vadd.f32 %v2448_v7, %v2256_v33  ;;  %2846 = vmatprep.mubr.bf16.mxu0 %v2618_v47  ;;  %v2568_v14 = vmax.f32 %v2447_v11, 0.0  ;;  %v5086_v7 = vld [vmem:[#allocation21_spill] sm:$0xff]  ;;  %v4830_v24 = vpop.f32.mrf.mxu0 }
 0x274   :  { %v2450_v22 = vpop.f32.mrf.mxu1  ;;  %2847 = vmatmul.mubr.bf16.gmra.mxu0 %v2617_v40  ;;  %v2081_v40 = vadd.f32 %v5083_v59, %v4685_v56  ;;  %v2085_v20 = vadd.f32 %v5086_v7, %v4685_v56  ;;  %v2276_v6 = vadd.f32 %v4711_v23, %v2083_v16 }
 0x275   :  { %v2569_v45 = vmax.f32 %v2449_v25, 0.0  ;;  %v2451_v0 = vadd.f32 %v2450_v22, %v2258_v18 }
 0x276   :  { %v2454_v12 = vpop.f32.mrf.mxu1  ;;  %v2274_v22 = vadd.f32 %v4702_v62, %v2081_v40  ;;  %v5089_v62 = vld [vmem:[#allocation24_spill] sm:$0xff]  ;;  %v5091_v40 = vld [vmem:[#allocation26_spill] sm:$0xff] }
 0x277   :  { %v2619_v51 = vpack.c.bf16 %v2569_v45, %v2567_v19  ;;  %v2570_v9 = vmax.f32 %v2451_v0, 0.0  ;;  %v2455_v29 = vadd.f32 %v2454_v12, %v2262_v46  ;;  %v5087_v45 = vld [vmem:[#allocation22_spill] sm:$0xff]  ;;  %v2278_v46 = vadd.f32 %v4718_v27, %v2085_v20  ;;  %v5090_v27 = vld [vmem:[#allocation25_spill] sm:$0xff] }
 0x278   :  { %v2456_v38 = vpop.f32.mrf.mxu1  ;;  %v2089_v0 = vadd.f32 %v5087_v45, %v4677_v63  ;;  %v2093_v23 = vadd.f32 %v5089_v62, %v4677_v63  ;;  %v5096_v62 = vld [vmem:[#allocation31_spill] sm:$0xff] }
 0x279   :  { %v2620_v49 = vpack.c.bf16 %v2570_v9, %v2568_v14  ;;  %v2457_v43 = vadd.f32 %v2456_v38, %v2264_v52  ;;  %v2571_v1 = vmax.f32 %v2455_v29, 0.0  ;;  %v2091_v14 = vadd.f32 %v5088_v55, %v4685_v56 }
 0x27a   :  { %v2458_v39 = vpop.f32.mrf.mxu1  ;;  %v2282_v61 = vadd.f32 %v4727_v15, %v2089_v0 }
 0x27b   :  { %v2459_v60 = vadd.f32 %v2458_v39, %v2266_v2  ;;  %2854 = vmatprep.mubr.bf16.mxu0 %v2620_v49  ;;  %v2572_v18 = vmax.f32 %v2457_v43, 0.0  ;;  %v2095_v49 = vadd.f32 %v5090_v27, %v4685_v56  ;;  %v2286_v43 = vadd.f32 %v4743_v54, %v2093_v23 }
 0x27c   :  { %v2460_v31 = vpop.f32.mrf.mxu1  ;;  %2855 = vmatmul.mubr.bf16.gmra.mxu0 %v2619_v51  ;;  %v4839_v51 = vpop.f32.mrf.mxu0  ;;  %v2111_v23 = vadd.f32 %v5096_v62, %v4685_v56 }
 0x27d   :  { %v2573_v33 = vmax.f32 %v2459_v60, 0.0  ;;  %v2461_v47 = vadd.f32 %v2460_v31, %v2268_v10  ;;  %v2284_v10 = vadd.f32 %v4734_v42, %v2091_v14  ;;  %v2099_v31 = vadd.f32 %v5091_v40, %v4677_v63  ;;  %v5093_v42 = vld [vmem:[#allocation28_spill] sm:$0xff] }
 0x27e   :  { %v2464_v50 = vpop.f32.mrf.mxu1  ;;  %v4846_v39 = vpop.f32.mrf.mxu0  ;;  %v2288_v57 = vadd.f32 %v4750_v53, %v2095_v49  ;;  %v2103_v54 = vadd.f32 %v5093_v42, %v4677_v63  ;;  %v5094_v53 = vld [vmem:[#allocation29_spill] sm:$0xff] }
 0x27f   :  { %v2621_v11 = vpack.c.bf16 %v2573_v33, %v2571_v1  ;;  %v2574_v25 = vmax.f32 %v2461_v47, 0.0  ;;  %v2465_v19 = vadd.f32 %v2464_v50, %v2272_v3  ;;  %v5092_v33 = vld [vmem:[#allocation27_spill] sm:$0xff] }
 0x280   :  { %v2466_v48 = vpop.f32.mrf.mxu1  ;;  %v2101_v47 = vadd.f32 %v5092_v33, %v4685_v56  ;;  %v4855_v32 = vpop.f32.mrf.mxu0  ;;  %v2296_v0 = vadd.f32 %v4775_v37, %v2103_v54 }
 0x281   :  { %v2622_v35 = vpack.c.bf16 %v2574_v25, %v2572_v18  ;;  %v2467_v12 = vadd.f32 %v2466_v48, %v2274_v22  ;;  %v2575_v38 = vmax.f32 %v2465_v19, 0.0  ;;  %v2292_v18 = vadd.f32 %v4759_v17, %v2099_v31 }
 0x282   :  { %v2468_v41 = vpop.f32.mrf.mxu1  ;;  %v2105_v25 = vadd.f32 %v5094_v53, %v4685_v56  ;;  %v2294_v45 = vadd.f32 %v4766_v8, %v2101_v47  ;;  %v5097_v8 = vld [vmem:[#allocation32_spill] sm:$0xff]  ;;  %v5100_v47 = vld [vmem:[#allocation37_spill] sm:$0xff] }
 0x283   :  { %v2469_v34 = vadd.f32 %v2468_v41, %v2276_v6  ;;  %2862 = vmatprep.mubr.bf16.mxu0 %v2622_v35  ;;  %v2576_v29 = vmax.f32 %v2467_v12, 0.0  ;;  %v4862_v35 = vpop.f32.mrf.mxu0  ;;  %v5095_v12 = vld [vmem:[#allocation30_spill] sm:$0xff]  ;;  %v2113_v37 = vadd.f32 %v5097_v8, %v4677_v63 }
 0x284   :  { %v2470_v9 = vpop.f32.mrf.mxu1  ;;  %2863 = vmatmul.mubr.bf16.gmra.mxu0 %v2621_v11  ;;  %v2298_v55 = vadd.f32 %v4782_v5, %v2105_v25  ;;  %v5098_v5 = vld [vmem:[#allocation34_spill] sm:$0xff] }
 0x285   :  { %v2577_v28 = vmax.f32 %v2469_v34, 0.0  ;;  %v2471_v52 = vadd.f32 %v2470_v9, %v2278_v46  ;;  %v2109_v34 = vadd.f32 %v5095_v12, %v4677_v63  ;;  %v5103_v12 = vld [vmem:[#allocation41_spill] sm:$0xff] }
 0x286   :  { %v2474_v2 = vpop.f32.mrf.mxu1 }
 0x287   :  { %v2623_v44 = vpack.c.bf16 %v2577_v28, %v2575_v38  ;;  %v2578_v26 = vmax.f32 %v2471_v52, 0.0  ;;  %v2475_v59 = vadd.f32 %v2474_v2, %v2282_v61  ;;  %v4871_v38 = vpop.f32.mrf.mxu0  ;;  %v2302_v27 = vadd.f32 %v4791_v58, %v2109_v34 }
 0x288   :  { %v2476_v30 = vpop.f32.mrf.mxu1  ;;  %v2129_v34 = vadd.f32 %v5103_v12, %v4677_v63 }
 0x289   :  { %v2624_v60 = vpack.c.bf16 %v2578_v26, %v2576_v29  ;;  %v2477_v16 = vadd.f32 %v2476_v30, %v2284_v10  ;;  %v2579_v50 = vmax.f32 %v2475_v59, 0.0  ;;  %v2115_v29 = vadd.f32 %v5098_v5, %v4685_v56  ;;  %v2327_v10 = vpop.f32.mrf.mxu0 }
 0x28a   :  { %v2478_v15 = vpop.f32.mrf.mxu1  ;;  %v2306_v59 = vadd.f32 %v4807_v13, %v2113_v37 }
 0x28b   :  { %v2479_v1 = vadd.f32 %v2478_v15, %v2286_v43  ;;  %2870 = vmatprep.mubr.bf16.mxu0 %v2624_v60  ;;  %v2580_v48 = vmax.f32 %v2477_v16, 0.0  ;;  %v2304_v60 = vadd.f32 %v4798_v4, %v2111_v23  ;;  %v5099_v15 = vld [vmem:[#allocation35_spill] sm:$0xff]  ;;  %v2308_v58 = vadd.f32 %v4814_v36, %v2115_v29  ;;  %v2331_v42 = vpop.f32.mrf.mxu0  ;;  %v5101_v4 = vld [vmem:[#allocation38_spill] sm:$0xff]  ;;  %v5102_v36 = vld [vmem:[#allocation40_spill] sm:$0xff] }
 0x28c   :  { %v2480_v3 = vpop.f32.mrf.mxu1  ;;  %2871 = vmatmul.mubr.bf16.gmra.mxu0 %v2623_v44  ;;  %v2123_v13 = vadd.f32 %v5101_v4, %v4677_v63  ;;  %v2125_v53 = vadd.f32 %v5102_v36, %v4685_v56 }
 0x28d   :  { %v2581_v7 = vmax.f32 %v2479_v1, 0.0  ;;  %v2481_v20 = vadd.f32 %v2480_v3, %v2288_v57  ;;  %v2119_v57 = vadd.f32 %v5099_v15, %v4677_v63  ;;  %v2121_v3 = vadd.f32 %v5100_v47, %v4685_v56 }
 0x28e   :  { %v2484_v11 = vpop.f32.mrf.mxu1 }
 0x28f   :  { %v2625_v22 = vpack.c.bf16 %v2581_v7, %v2579_v50  ;;  %v2582_v6 = vmax.f32 %v2481_v20, 0.0  ;;  %v2485_v46 = vadd.f32 %v2484_v11, %v2292_v18  ;;  %v2312_v18 = vadd.f32 %v4823_v21, %v2119_v57 }
 0x290   :  { %v2486_v19 = vpop.f32.mrf.mxu1  ;;  %v2318_v21 = vadd.f32 %v4846_v39, %v2125_v53  ;;  %v5106_v39 = vld [vmem:[#allocation46_spill] sm:$0xff] }
 0x291   :  { %v2626_v41 = vpack.c.bf16 %v2582_v6, %v2580_v48  ;;  %v2487_v14 = vadd.f32 %v2486_v19, %v2294_v45  ;;  %v2583_v52 = vmax.f32 %v2485_v46, 0.0  ;;  %v2333_v6 = vpop.f32.mrf.mxu0  ;;  %v2314_v45 = vadd.f32 %v4830_v24, %v2121_v3  ;;  %v5105_v24 = vld [vmem:[#allocation44_spill] sm:$0xff] }
 0x292   :  { %v2488_v17 = vpop.f32.mrf.mxu1 }
 0x293   :  { %v2489_v9 = vadd.f32 %v2488_v17, %v2296_v0  ;;  %2878 = vmatprep.mubr.bf16.mxu0 %v2626_v41  ;;  %v2584_v44 = vmax.f32 %v2487_v14, 0.0  ;;  %v2316_v0 = vadd.f32 %v4839_v51, %v2123_v13  ;;  %v2335_v23 = vpop.f32.mrf.mxu0  ;;  %v2133_v51 = vadd.f32 %v5105_v24, %v4677_v63 }
 0x294   :  { %v2490_v28 = vpop.f32.mrf.mxu1  ;;  %2879 = vmatmul.mubr.bf16.gmra.mxu0 %v2625_v22 }
 0x295   :  { %v2585_v61 = vmax.f32 %v2489_v9, 0.0  ;;  %v2491_v2 = vadd.f32 %v2490_v28, %v2298_v55  ;;  %v5104_v9 = vld [vmem:[#allocation43_spill] sm:$0xff] }
 0x296   :  { %v2494_v49 = vpop.f32.mrf.mxu1  ;;  %v2131_v62 = vadd.f32 %v5104_v9, %v4685_v56 }
 0x297   :  { %v2627_v26 = vpack.c.bf16 %v2585_v61, %v2583_v52  ;;  %v2586_v30 = vmax.f32 %v2491_v2, 0.0  ;;  %v2495_v31 = vadd.f32 %v2494_v49, %v2302_v27  ;;  %v2322_v61 = vadd.f32 %v4855_v32, %v2129_v34  ;;  %v5112_v34 = vld [vmem:[#allocation55_spill] sm:$0xff] }
 0x298   :  { %v2496_v43 = vpop.f32.mrf.mxu1  ;;  %v2135_v27 = vadd.f32 %v5106_v39, %v4685_v56 }
 0x299   :  { %v2628_v40 = vpack.c.bf16 %v2586_v30, %v2584_v44  ;;  %v2497_v1 = vadd.f32 %v2496_v43, %v2304_v60  ;;  %v2587_v50 = vmax.f32 %v2495_v31, 0.0  ;;  %v2337_v44 = vpop.f32.mrf.mxu0  ;;  %v2324_v30 = vadd.f32 %v4862_v35, %v2131_v62  ;;  %v5109_v35 = vld [vmem:[#allocation50_spill] sm:$0xff] }
 0x29a   :  { %v2498_v16 = vpop.f32.mrf.mxu1  ;;  %v2326_v43 = vadd.f32 %v4871_v38, %v2133_v51  ;;  %v2328_v32 = vadd.f32 %v2327_v10, %v2135_v27  ;;  %v2143_v3 = vadd.f32 %v5109_v35, %v4677_v63  ;;  %v5114_v51 = vld [vmem:[#allocation58_spill] sm:$0xff] }
 0x29b   :  { %v2499_v33 = vadd.f32 %v2498_v16, %v2306_v59  ;;  %2886 = vmatprep.mubr.bf16.mxu0 %v2628_v40  ;;  %v2588_v25 = vmax.f32 %v2497_v1, 0.0  ;;  %v5107_v40 = vld [vmem:[#allocation47_spill] sm:$0xff] }
 0x29c   :  { %v2500_v54 = vpop.f32.mrf.mxu1  ;;  %2887 = vmatmul.mubr.bf16.gmra.mxu0 %v2627_v26  ;;  %v2139_v31 = vadd.f32 %v5107_v40, %v4677_v63 }
 0x29d   :  { %v2589_v7 = vmax.f32 %v2499_v33, 0.0  ;;  %v2501_v20 = vadd.f32 %v2500_v54, %v2308_v58  ;;  %v5108_v58 = vld [vmem:[#allocation49_spill] sm:$0xff]  ;;  %v2341_v33 = vpop.f32.mrf.mxu0 }
 0x29e   :  { %v2504_v11 = vpop.f32.mrf.mxu1  ;;  %v2141_v1 = vadd.f32 %v5108_v58, %v4685_v56  ;;  %v2332_v13 = vadd.f32 %v2331_v42, %v2139_v31 }
 0x29f   :  { %v2629_v48 = vpack.c.bf16 %v2589_v7, %v2587_v50  ;;  %v2590_v22 = vmax.f32 %v2501_v20, 0.0  ;;  %v2505_v46 = vadd.f32 %v2504_v11, %v2312_v18  ;;  %v5110_v7 = vld [vmem:[#allocation52_spill] sm:$0xff]  ;;  %v2343_v36 = vpop.f32.mrf.mxu0 }
 0x2a0   :  { %v2506_v19 = vpop.f32.mrf.mxu1  ;;  %v2145_v10 = vadd.f32 %v5110_v7, %v4685_v56 }
 0x2a1   :  { %v2630_v41 = vpack.c.bf16 %v2590_v22, %v2588_v25  ;;  %v2507_v55 = vadd.f32 %v2506_v19, %v2314_v45  ;;  %v2591_v8 = vmax.f32 %v2505_v46, 0.0  ;;  %v2334_v25 = vadd.f32 %v2333_v6, %v2141_v1  ;;  %v5111_v45 = vld [vmem:[#allocation53_spill] sm:$0xff] }
 0x2a2   :  { %v2508_v17 = vpop.f32.mrf.mxu1  ;;  %v2338_v46 = vadd.f32 %v2337_v44, %v2145_v10  ;;  %v4923_v1 = vld [vmem:[%s5008_s6] ss:$0 sm:$0xff] }
 0x2a3   :  { %v2509_v14 = vadd.f32 %v2508_v17, %v2316_v0  ;;  %2894 = vmatprep.mubr.bf16.mxu0 %v2630_v41  ;;  %v2592_v49 = vmax.f32 %v2507_v55, 0.0  ;;  %v2149_v0 = vadd.f32 %v5111_v45, %v4677_v63  ;;  %v2151_v17 = vadd.f32 %v5112_v34, %v4685_v56 }
 0x2a4   :  { %v2510_v28 = vpop.f32.mrf.mxu1  ;;  %2895 = vmatmul.mubr.bf16.gmra.mxu0 %v2629_v48  ;;  %v2336_v48 = vadd.f32 %v2335_v23, %v2143_v3 }
 0x2a5   :  { %v2593_v37 = vmax.f32 %v2509_v14, 0.0  ;;  %v2511_v52 = vadd.f32 %v2510_v28, %v2318_v21  ;;  %v2345_v21 = vpop.f32.mrf.mxu0  ;;  %v5113_v14 = vld [vmem:[#allocation56_spill] sm:$0xff]  ;;  %v2342_v28 = vadd.f32 %v2341_v33, %v2149_v0  ;;  %v2344_v27 = vadd.f32 %v2343_v36, %v2151_v17 }
 0x2a6   :  { %v2514_v2 = vpop.f32.mrf.mxu1  ;;  %v2153_v6 = vadd.f32 %v5113_v14, %v4677_v63 }
 0x2a7   :  { %v2631_v5 = vpack.c.bf16 %v2593_v37, %v2591_v8  ;;  %v2594_v29 = vmax.f32 %v2511_v52, 0.0  ;;  %v2515_v59 = vadd.f32 %v2514_v2, %v2322_v61  ;;  %v2155_v8 = vadd.f32 %v5114_v51, %v4685_v56  ;;  %v2347_v2 = vpop.f32.mrf.mxu0 }
 0x2a8   :  { %v2516_v26 = vpop.f32.mrf.mxu1 }
 0x2a9   :  { %v2632_v60 = vpack.c.bf16 %v2594_v29, %v2592_v49  ;;  %v2517_v57 = vadd.f32 %v2516_v26, %v2324_v30  ;;  %v2595_v38 = vmax.f32 %v2515_v59, 0.0  ;;  %v2346_v49 = vadd.f32 %v2345_v21, %v2153_v6 }
 0x2aa   :  { %v2518_v15 = vpop.f32.mrf.mxu1  ;;  %v2348_v26 = vadd.f32 %v2347_v2, %v2155_v8 }
 0x2ab   :  { %v2519_v16 = vadd.f32 %v2518_v15, %v2326_v43  ;;  %2902 = vmatprep.mubr.bf16.mxu0 %v2632_v60  ;;  %v2596_v20 = vmax.f32 %v2517_v57, 0.0 }
 0x2ac   :  { %v2520_v47 = vpop.f32.mrf.mxu1  ;;  %2903 = vmatmul.mubr.bf16.gmra.mxu0 %v2631_v5 }
 0x2ad   :  { %v2597_v54 = vmax.f32 %v2519_v16, 0.0  ;;  %v2521_v4 = vadd.f32 %v2520_v47, %v2328_v32 }
 0x2ae   :  { %v2524_v50 = vpop.f32.mrf.mxu1 }
 0x2af   :  { %v2633_v18 = vpack.c.bf16 %v2597_v54, %v2595_v38  ;;  %v2598_v11 = vmax.f32 %v2521_v4, 0.0  ;;  %v2525_v19 = vadd.f32 %v2524_v50, %v2332_v13 }
 0x2b0   :  { %v2526_v53 = vpop.f32.mrf.mxu1 }
 0x2b1   :  { %v2634_v22 = vpack.c.bf16 %v2598_v11, %v2596_v20  ;;  %v2527_v12 = vadd.f32 %v2526_v53, %v2334_v25  ;;  %v2599_v9 = vmax.f32 %v2525_v19, 0.0 }
 0x2b2   :  { %v2528_v41 = vpop.f32.mrf.mxu1 }
 0x2b3   :  { %v2529_v42 = vadd.f32 %v2528_v41, %v2336_v48  ;;  %2910 = vmatprep.mubr.bf16.mxu0 %v2634_v22  ;;  %v2600_v37 = vmax.f32 %v2527_v12, 0.0 }
 0x2b4   :  { %v2530_v55 = vpop.f32.mrf.mxu1  ;;  %2911 = vmatmul.mubr.bf16.gmra.mxu0 %v2633_v18 }
 0x2b5   :  { %v2601_v62 = vmax.f32 %v2529_v42, 0.0  ;;  %v2531_v23 = vadd.f32 %v2530_v55, %v2338_v46 }
 0x2b6   :  { %v2534_v24 = vpop.f32.mrf.mxu1 }
 0x2b7   :  { %v2635_v52 = vpack.c.bf16 %v2601_v62, %v2599_v9  ;;  %v2602_v61 = vmax.f32 %v2531_v23, 0.0  ;;  %v2535_v29 = vadd.f32 %v2534_v24, %v2342_v28 }
 0x2b8   :  { %v2536_v39 = vpop.f32.mrf.mxu1 }
 0x2b9   :  { %v2636_v5 = vpack.c.bf16 %v2602_v61, %v2600_v37  ;;  %v2537_v63 = vadd.f32 %v2536_v39, %v2344_v27  ;;  %v2603_v60 = vmax.f32 %v2535_v29, 0.0 }
 0x2ba   :  { %v2538_v44 = vpop.f32.mrf.mxu1 }
 0x2bb   :  { %v2539_v30 = vadd.f32 %v2538_v44, %v2346_v49  ;;  %2918 = vmatprep.mubr.bf16.mxu0 %v2636_v5  ;;  %v2604_v56 = vmax.f32 %v2537_v63, 0.0 }
 0x2bc   :  { %v2540_v43 = vpop.f32.mrf.mxu1  ;;  %2919 = vmatmul.mubr.bf16.gmra.mxu0 %v2635_v52 }
 0x2bd   :  { %v2605_v59 = vmax.f32 %v2539_v30, 0.0  ;;  %v2541_v40 = vadd.f32 %v2540_v43, %v2348_v26 }
 0x2bf   :  { %v2637_v31 = vpack.c.bf16 %v2605_v59, %v2603_v60  ;;  %v2606_v15 = vmax.f32 %v2541_v40, 0.0 }
 0x2c1   :  { %v2638_v32 = vpack.c.bf16 %v2606_v15, %v2604_v56 }
 0x2c3   :  { %2926 = vmatprep.mubr.bf16.mxu0 %v2638_v32 }
 0x2c4   :  { %2927 = vmatmul.mubr.bf16.gmra.mxu0 %v2637_v31 }
 0x30c   :  { %v3322_v57 = vpop.f32.mrf.mxu0 }
 0x30e   :  { %v3323_v16 = vpop.f32.mrf.mxu0 }
 0x30f   :  { %v3324_v58 = vadd.f32 %v3323_v16, %v3322_v57 }
 0x310   :  { %v3325_v33 = vpop.f32.mrf.mxu0 }
 0x311   :  { %v2809_v35 = vadd.f32 %v3324_v58, %v4923_v1 }
 0x312   :  { %v3326_v47 = vpop.f32.mrf.mxu0 }
 0x313   :  { %v3327_v3 = vadd.f32 %v3326_v47, %v3325_v33  ;;  %v2935_v13 = vmax.f32 %v2809_v35, 0.0 }
 0x314   :  { %v3328_v38 = vpop.f32.mrf.mxu0 }
 0x315   :  { %v2812_v54 = vadd.f32 %v3327_v3, %v4923_v1 }
 0x316   :  { %v3329_v4 = vpop.f32.mrf.mxu0 }
 0x317   :  { %v2936_v50 = vmax.f32 %v2812_v54, 0.0  ;;  %v3330_v7 = vadd.f32 %v3329_v4, %v3328_v38 }
 0x318   :  { %v3331_v10 = vpop.f32.mrf.mxu0 }
 0x319   :  { %v4927_v20 = vpack.c.bf16 %v2936_v50, %v2935_v13  ;;  %v2817_v11 = vadd.f32 %v3330_v7, %v4923_v1 }
 0x31a   :  { %v3332_v18 = vpop.f32.mrf.mxu0 }
 0x31b   :  { %v3333_v36 = vadd.f32 %v3332_v18, %v3331_v10  ;;  %v2937_v22 = vmax.f32 %v2817_v11, 0.0 }
 0x31c   :  { %v3334_v53 = vpop.f32.mrf.mxu0 }
 0x31d   :  { %v2820_v25 = vadd.f32 %v3333_v36, %v4923_v1 }
 0x31e   :  { %v3335_v48 = vpop.f32.mrf.mxu0 }
 0x31f   :  { %v2938_v19 = vmax.f32 %v2820_v25, 0.0  ;;  %v3336_v45 = vadd.f32 %v3335_v48, %v3334_v53 }
 0x320   :  { %v3337_v0 = vpop.f32.mrf.mxu0 }
 0x321   :  { %v4931_v41 = vpack.c.bf16 %v2938_v19, %v2937_v22  ;;  %v2825_v12 = vadd.f32 %v3336_v45, %v4923_v1  ;;  %v4957_v45 = vld [vmem:[%s5009_s7] sm:$0x1] }
 0x322   :  { %v3338_v46 = vpop.f32.mrf.mxu0  ;;  %3434 = vmatprep.mubr.bf16.mxu1 %v4957_v45 }
 0x323   :  { %v3339_v42 = vadd.f32 %v3338_v46, %v3337_v0  ;;  %v2939_v55 = vmax.f32 %v2825_v12, 0.0 }
 0x324   :  { %v3340_v34 = vpop.f32.mrf.mxu0 }
 0x325   :  { %v2828_v17 = vadd.f32 %v3339_v42, %v4923_v1 }
 0x326   :  { %v3341_v21 = vpop.f32.mrf.mxu0 }
 0x327   :  { %v2940_v14 = vmax.f32 %v2828_v17, 0.0  ;;  %v3342_v6 = vadd.f32 %v3341_v21, %v3340_v34 }
 0x328   :  { %v3343_v9 = vpop.f32.mrf.mxu0 }
 0x329   :  { %v4935_v62 = vpack.c.bf16 %v2940_v14, %v2939_v55  ;;  %v2833_v28 = vadd.f32 %v3342_v6, %v4923_v1 }
 0x32a   :  { %v3344_v23 = vpop.f32.mrf.mxu0 }
 0x32b   :  { %v3345_v24 = vadd.f32 %v3344_v23, %v3343_v9  ;;  %v2941_v52 = vmax.f32 %v2833_v28, 0.0 }
 0x32c   :  { %v3346_v51 = vpop.f32.mrf.mxu0 }
 0x32d   :  { %v2836_v8 = vadd.f32 %v3345_v24, %v4923_v1 }
 0x32e   :  { %v3347_v37 = vpop.f32.mrf.mxu0 }
 0x32f   :  { %v2942_v61 = vmax.f32 %v2836_v8, 0.0  ;;  %v3348_v2 = vadd.f32 %v3347_v37, %v3346_v51 }
 0x330   :  { %v3349_v39 = vpop.f32.mrf.mxu0 }
 0x331   :  { %v4939_v27 = vpack.c.bf16 %v2942_v61, %v2941_v52  ;;  %v2841_v5 = vadd.f32 %v3348_v2, %v4923_v1 }
 0x332   :  { %v3350_v49 = vpop.f32.mrf.mxu0 }
 0x333   :  { %v3351_v29 = vadd.f32 %v3350_v49, %v3349_v39  ;;  %v2943_v30 = vmax.f32 %v2841_v5, 0.0 }
 0x334   :  { %v3352_v44 = vpop.f32.mrf.mxu0 }
 0x335   :  { %v2844_v26 = vadd.f32 %v3351_v29, %v4923_v1 }
 0x336   :  { %v3353_v63 = vpop.f32.mrf.mxu0 }
 0x337   :  { %v2944_v43 = vmax.f32 %v2844_v26, 0.0  ;;  %v3354_v60 = vadd.f32 %v3353_v63, %v3352_v44 }
 0x338   :  { %v3355_v59 = vpop.f32.mrf.mxu0 }
 0x339   :  { %v4943_v40 = vpack.c.bf16 %v2944_v43, %v2943_v30  ;;  %v2849_v31 = vadd.f32 %v3354_v60, %v4923_v1 }
 0x33a   :  { %v3356_v56 = vpop.f32.mrf.mxu0 }
 0x33b   :  { %v3357_v15 = vadd.f32 %v3356_v56, %v3355_v59  ;;  %v2945_v58 = vmax.f32 %v2849_v31, 0.0 }
 0x33c   :  { %v3358_v32 = vpop.f32.mrf.mxu0 }
 0x33d   :  { %v2852_v57 = vadd.f32 %v3357_v15, %v4923_v1 }
 0x33e   :  { %v3359_v16 = vpop.f32.mrf.mxu0 }
 0x33f   :  { %v2946_v33 = vmax.f32 %v2852_v57, 0.0  ;;  %v3360_v47 = vadd.f32 %v3359_v16, %v3358_v32 }
 0x340   :  { %v3361_v35 = vpop.f32.mrf.mxu0 }
 0x341   :  { %v4947_v3 = vpack.c.bf16 %v2946_v33, %v2945_v58  ;;  %v2857_v54 = vadd.f32 %v3360_v47, %v4923_v1 }
 0x342   :  { %v3362_v38 = vpop.f32.mrf.mxu0 }
 0x343   :  { %v3363_v4 = vadd.f32 %v3362_v38, %v3361_v35  ;;  %v2947_v10 = vmax.f32 %v2857_v54, 0.0 }
 0x344   :  { %v3364_v13 = vpop.f32.mrf.mxu0 }
 0x345   :  { %v2860_v50 = vadd.f32 %v3363_v4, %v4923_v1 }
 0x346   :  { %v3365_v7 = vpop.f32.mrf.mxu0 }
 0x347   :  { %v2948_v18 = vmax.f32 %v2860_v50, 0.0  ;;  %v3366_v11 = vadd.f32 %v3365_v7, %v3364_v13 }
 0x348   :  { %v3367_v36 = vpop.f32.mrf.mxu0 }
 0x349   :  { %v4951_v53 = vpack.c.bf16 %v2948_v18, %v2947_v10  ;;  %v2865_v48 = vadd.f32 %v3366_v11, %v4923_v1 }
 0x34a   :  { %v3368_v25 = vpop.f32.mrf.mxu0 }
 0x34b   :  { %v3369_v22 = vadd.f32 %v3368_v25, %v3367_v36  ;;  %v2949_v12 = vmax.f32 %v2865_v48, 0.0 }
 0x34c   :  { %v3370_v19 = vpop.f32.mrf.mxu0 }
 0x34d   :  { %v2868_v0 = vadd.f32 %v3369_v22, %v4923_v1 }
 0x34e   :  { %v3371_v46 = vpop.f32.mrf.mxu0 }
 0x34f   :  { %v2950_v42 = vmax.f32 %v2868_v0, 0.0  ;;  %v3372_v34 = vadd.f32 %v3371_v46, %v3370_v19 }
 0x350   :  { %v3373_v17 = vpop.f32.mrf.mxu0 }
 0x351   :  { %v4961_v21 = vpack.c.bf16 %v2950_v42, %v2949_v12  ;;  %v2873_v14 = vadd.f32 %v3372_v34, %v4923_v1 }
 0x352   :  { %v3374_v55 = vpop.f32.mrf.mxu0 }
 0x353   :  { %v3375_v6 = vadd.f32 %v3374_v55, %v3373_v17  ;;  %v2951_v24 = vmax.f32 %v2873_v14, 0.0 }
 0x354   :  { %v3376_v9 = vpop.f32.mrf.mxu0 }
 0x355   :  { %v2876_v23 = vadd.f32 %v3375_v6, %v4923_v1 }
 0x356   :  { %v3377_v28 = vpop.f32.mrf.mxu0 }
 0x357   :  { %v2952_v51 = vmax.f32 %v2876_v23, 0.0  ;;  %v3378_v8 = vadd.f32 %v3377_v28, %v3376_v9 }
 0x358   :  { %v3379_v37 = vpop.f32.mrf.mxu0 }
 0x359   :  { %v4965_v52 = vpack.c.bf16 %v2952_v51, %v2951_v24  ;;  %v2881_v2 = vadd.f32 %v3378_v8, %v4923_v1 }
 0x35a   :  { %v3380_v61 = vpop.f32.mrf.mxu0 }
 0x35b   :  { %v3381_v39 = vadd.f32 %v3380_v61, %v3379_v37  ;;  %v2953_v44 = vmax.f32 %v2881_v2, 0.0 }
 0x35c   :  { %v3382_v49 = vpop.f32.mrf.mxu0 }
 0x35d   :  { %v2884_v5 = vadd.f32 %v3381_v39, %v4923_v1 }
 0x35e   :  { %v3383_v29 = vpop.f32.mrf.mxu0 }
 0x35f   :  { %v2954_v26 = vmax.f32 %v2884_v5, 0.0  ;;  %v3384_v63 = vadd.f32 %v3383_v29, %v3382_v49 }
 0x360   :  { %v3385_v30 = vpop.f32.mrf.mxu0 }
 0x361   :  { %v4969_v43 = vpack.c.bf16 %v2954_v26, %v2953_v44  ;;  %v2889_v59 = vadd.f32 %v3384_v63, %v4923_v1 }
 0x362   :  { %v3386_v60 = vpop.f32.mrf.mxu0 }
 0x363   :  { %v3387_v56 = vadd.f32 %v3386_v60, %v3385_v30  ;;  %v2955_v57 = vmax.f32 %v2889_v59, 0.0 }
 0x364   :  { %v3388_v31 = vpop.f32.mrf.mxu0 }
 0x365   :  { %v2892_v15 = vadd.f32 %v3387_v56, %v4923_v1 }
 0x366   :  { %v3389_v32 = vpop.f32.mrf.mxu0 }
 0x367   :  { %v2956_v16 = vmax.f32 %v2892_v15, 0.0  ;;  %v3390_v56 = vadd.f32 %v3389_v32, %v3388_v31 }
 0x368   :  { %v3391_v58 = vpop.f32.mrf.mxu0 }
 0x369   :  { %v2978_v33 = vpack.c.bf16 %v2956_v16, %v2955_v57  ;;  %v2897_v16 = vadd.f32 %v3390_v56, %v4923_v1 }
 0x36a   :  { %v3392_v47 = vpop.f32.mrf.mxu0 }
 0x36b   :  { %v3393_v60 = vadd.f32 %v3392_v47, %v3391_v58 }
 0x36c   :  { %v3394_v35 = vpop.f32.mrf.mxu0 }
 0x36e   :  { %v3395_v38 = vpop.f32.mrf.mxu0 }
 0x36f   :  { %v3396_v29 = vadd.f32 %v3395_v38, %v3394_v35  ;;  %v2957_v38 = vmax.f32 %v2897_v16, 0.0 }
 0x370   :  { %v3397_v54 = vpop.f32.mrf.mxu0 }
 0x371   :  { %v2905_v30 = vadd.f32 %v3396_v29, %v4923_v1 }
 0x372   :  { %v3398_v4 = vpop.f32.mrf.mxu0 }
 0x373   :  { %v3399_v49 = vadd.f32 %v3398_v4, %v3397_v54  ;;  %v2959_v15 = vmax.f32 %v2905_v30, 0.0 }
 0x374   :  { %v3400_v13 = vpop.f32.mrf.mxu0 }
 0x375   :  { %v2908_v26 = vadd.f32 %v3399_v49, %v4923_v1 }
 0x376   :  { %v3401_v50 = vpop.f32.mrf.mxu0 }
 0x377   :  { %v3402_v51 = vadd.f32 %v3401_v50, %v3400_v13  ;;  %v2960_v59 = vmax.f32 %v2908_v26, 0.0 }
 0x378   :  { %v3403_v7 = vpop.f32.mrf.mxu0 }
 0x379   :  { %v2913_v39 = vadd.f32 %v3402_v51, %v4923_v1  ;;  %v2980_v57 = vpack.c.bf16 %v2960_v59, %v2959_v15 }
 0x37a   :  { %v3404_v10 = vpop.f32.mrf.mxu0 }
 0x37b   :  { %v3405_v9 = vadd.f32 %v3404_v10, %v3403_v7  ;;  %v2961_v44 = vmax.f32 %v2913_v39, 0.0 }
 0x37c   :  { %v3406_v18 = vpop.f32.mrf.mxu0 }
 0x37d   :  { %v2916_v61 = vadd.f32 %v3405_v9, %v4923_v1 }
 0x37e   :  { %v3407_v11 = vpop.f32.mrf.mxu0 }
 0x37f   :  { %v3408_v12 = vadd.f32 %v3407_v11, %v3406_v18  ;;  %v2962_v5 = vmax.f32 %v2916_v61, 0.0 }
 0x380   :  { %v3409_v36 = vpop.f32.mrf.mxu0 }
 0x381   :  { %v2921_v14 = vadd.f32 %v3408_v12, %v4923_v1  ;;  %v2981_v63 = vpack.c.bf16 %v2962_v5, %v2961_v44 }
 0x382   :  { %v3410_v25 = vpop.f32.mrf.mxu0 }
 0x383   :  { %v3411_v19 = vadd.f32 %v3410_v25, %v3409_v36  ;;  %v2963_v8 = vmax.f32 %v2921_v14, 0.0 }
 0x384   :  { %v3412_v48 = vpop.f32.mrf.mxu0 }
 0x385   :  { %v2924_v34 = vadd.f32 %v3411_v19, %v4923_v1 }
 0x386   :  { %v3413_v22 = vpop.f32.mrf.mxu0 }
 0x387   :  { %v3414_v0 = vadd.f32 %v3413_v22, %v3412_v48  ;;  %v2964_v23 = vmax.f32 %v2924_v34, 0.0 }
 0x388   :  { %v3415_v46 = vpop.f32.mrf.mxu0 }
 0x389   :  { %v2929_v17 = vadd.f32 %v3414_v0, %v4923_v1  ;;  %v2982_v2 = vpack.c.bf16 %v2964_v23, %v2963_v8 }
 0x38a   :  { %v3416_v42 = vpop.f32.mrf.mxu0 }
 0x38b   :  { %v3417_v55 = vadd.f32 %v3416_v42, %v3415_v46  ;;  %v2965_v28 = vmax.f32 %v2929_v17, 0.0 }
 0x38d   :  { %v2932_v6 = vadd.f32 %v3417_v55, %v4923_v1 }
 0x38f   :  { %v2966_v24 = vmax.f32 %v2932_v6, 0.0 }
 0x391   :  { %v2983_v37 = vpack.c.bf16 %v2966_v24, %v2965_v28 }
 0x393   :  { %3418 = vmatprep.subr.bf16.mxu1 %v2983_v37 }
 0x394   :  { %3419 = vmatpush3.bf16.xpose.msra.mxu1 %v4961_v21  ;;  %v2900_v21 = vadd.f32 %v3393_v60, %v4923_v1  ;;  %v3747_v1 = vmov 1966171168  }
 0x395   :  { %3420 = vmatprep.subr.bf16.mxu1 %v2982_v2 }
 0x396   :  { %v2958_v35 = vmax.f32 %v2900_v21, 0.0 }
 0x398   :  { %v2979_v54 = vpack.c.bf16 %v2958_v35, %v2957_v38 }
 0x39c   :  { %3421 = vmatpush3.bf16.xpose.msra.mxu1 %v4951_v53 }
 0x39d   :  { %3422 = vmatprep.subr.bf16.mxu1 %v2981_v63 }
 0x3a4   :  { %3423 = vmatpush3.bf16.xpose.msra.mxu1 %v4947_v3  ;;  %v3031_v3 = vunpack.c.l.s4 %v3747_v1 }
 0x3a5   :  { %3424 = vmatprep.subr.bf16.mxu1 %v2980_v57 }
 0x3a6   :  { %v3032_v53 = vunpack.c.0.s8 %v3031_v3 }
 0x3ac   :  { %3425 = vmatpush3.bf16.xpose.msra.mxu1 %v4943_v40 }
 0x3ad   :  { %3426 = vmatprep.subr.bf16.mxu1 %v2979_v54 }
 0x3b4   :  { %3427 = vmatpush3.bf16.xpose.msra.mxu1 %v4939_v27  ;;  %v2985_v27 = vstv %s5010_s8 }
 0x3b5   :  { %3428 = vmatprep.subr.bf16.mxu1 %v2978_v33 }
 0x3bc   :  { %3429 = vmatpush3.bf16.xpose.msra.mxu1 %v4935_v62 }
 0x3bd   :  { %3430 = vmatprep.subr.bf16.mxu1 %v4969_v43  ;;  %v5115_v43 = vld [vmem:[#allocation10_spill] sm:$0xff] }
 0x3be   :  { %v3035_v58 = vsub.s32 %v3032_v53, %v5115_v43 }
 0x3c4   :  { %3431 = vmatpush3.bf16.xpose.msra.mxu1 %v4931_v41 }
 0x3c5   :  { %3432 = vmatprep.subr.bf16.mxu1 %v4965_v52 }
 0x3cc   :  { %3433 = vmatpush3.bf16.xpose.msra.mxu1 %v4927_v20 }
 0x3d3   :  { %3435 = vmatmul.mubr.bf16.vlgmr.msra.gmra.mxu1 %v4957_v45  ;;  %v5116_v45 = vlaneseq }
 0x3d5   :  { %vm3047_vm1 = vcmp.lt.s32.totalorder %v5116_v45, 256 }
 0x493   :  { %v3020_v40 = vpop.f32.mrf.mxu1 }
 0x494   :  { %v3021_v62 = vadd.f32 %v3020_v40, %v2985_v27 }
 0x495   :  { %v3022_v31 = vpop.f32.mrf.mxu1 }
 0x496   :  { %v3023_v32 = vadd.f32 %v3022_v31, %v2985_v27 }
 0x497   :  { %v3024_v41 = vpop.f32.mrf.mxu1 }
 0x498   :  { %v3029_v33 = vcombine.low %v3021_v62, %v3023_v32 }
 0x499   :  { %v3025_v52 = vpop.f32.mrf.mxu1 }
 0x49a   :  { %v3036_v20 = vrot.slane %v3029_v33, %v3035_v58 }
 0x49c   :  { %v3043_v47 = vrot.slane %v3036_v20, %v3035_v58 }
 0x49e   :  { %3049 = vst.msk [vmem:[#allocation7] sm:$0x3] %vm3047_vm1, %v3043_v47 }
 0x49f   :  { %3730 = shalt.err (!%p3727_p9)
}
 0x4a0   :  { %3059 = dma.vmem_to_hbm [thread:$0]  %s3057_s18, 32, %s5011_s9, [#allocation6]  }
 0x4a1   :  { %3741 = dma.done.wait [#allocation6], 32  }
 0x4a2   :  { %3742 = vsyncadd [#allocation6], 4294967264 }
 0x4a3   :  { %3063 = vsyncpa [#allocation5], 1 }
 0x4a4   :  { %3064 = vsyncpa [#allocation6], 1 }

</bundles_post_ra>
